<compile_context>
chip_gen: v7x
topology: tpu7x:2x2x1
jax: 0.10.0
libtpu: 0.0.40
codegen_flags: <defaults>
</compile_context>

<pallas_src>
import functools

import jax
import jax.numpy as jnp
from jax.experimental import pallas as pl
from jax.experimental.pallas import tpu as pltpu


# ----------------------------------------------------------------------------
# helpers
# ----------------------------------------------------------------------------
def _round_up(x, m):
    return (x + m - 1) // m * m


def _pick_time_block(T, max_tt=32):
    """Timesteps per grid iteration.  Prefer an exact divisor in
    (max_tt/2, max_tt]; otherwise use max_tt with a masked tail block.
    (v6e can comfortably raise max_tt to 64 to amortize grid-step overhead.)"""
    if T <= max_tt:
        return T
    for tt in range(max_tt, max_tt // 2, -1):
        if T % tt == 0:
            return tt
    return max_tt


def _pick_unroll(tt, max_u=8):
    for u in (8, 4, 2):
        if u <= max_u and tt % u == 0:
            return u
    return 1


# Gate layout: PyTorch LSTM order is (i, f, g, o).  We reorder to (i, f, o, g)
# so the kernel applies a single sigmoid to the first 3*Hp lanes and a single
# tanh to the last Hp lanes.  Each gate segment is zero-padded to Hp (128)
# lanes.  Padding invariant: padded g-gate pre-activation is exactly 0
# (zero weight cols, zero bias) -> tanh = 0, and padded c starts at 0, so
# padded c stays 0 and padded h = o * tanh(0) = 0 for all t.  Padded h lanes
# therefore never contaminate real lanes (their weight rows are zeroed too).
_GATE_PERM = (0, 1, 3, 2)   # i, f, g, o  ->  i, f, o, g


def _prep_gate_cols(w_t, H, Hp):
    """w_t: (In, 4*H) in PyTorch gate order -> (In, 4*Hp), reordered + padded."""
    In = w_t.shape[0]
    w4 = w_t.reshape(In, 4, H)
    w4 = w4[:, jnp.array(_GATE_PERM), :]
    w4 = jnp.pad(w4, ((0, 0), (0, 0), (0, Hp - H)))
    return w4.reshape(In, 4 * Hp)


def _prep_gate_bias(b, H, Hp):
    b4 = b.reshape(4, H)[jnp.array(_GATE_PERM), :]
    b4 = jnp.pad(b4, ((0, 0), (0, Hp - H)))
    return b4.reshape(1, 4 * Hp)


# ----------------------------------------------------------------------------
# Fused two-layer LSTM kernel.
# Grid = (num_batch_blocks, num_time_blocks); time blocks are sequential
# ("arbitrary"), batch blocks are independent ("parallel").
# Refs:
#   x_ref    : (Tt, Bb, Fp)     raw input block (f32, zero-padded)
#   wih1_ref : (Fp, 4*Hp1)      layer-1 input weights  (bf16)
#   whh1_ref : (Hp1, 4*Hp1)     layer-1 recurrent weights (bf16)
#   b1_ref   : (1, 4*Hp1)       layer-1 fused bias (f32)
#   w2_ref   : (Hp1+Hp2, 4*Hp2) layer-2 fused [W_ih2; W_hh2] (bf16)
#   b2_ref   : (1, 4*Hp2)       layer-2 fused bias (f32)
#   out_ref  : (Bb, Hp2)        final layer-2 hidden state (written at last block)
#   g1_sc    : (Tt, Bb, 4*Hp1)  per-block layer-1 gate pre-activations (f32)
#   *_sc     : persistent f32 h/c state (VMEM scratch)
# ----------------------------------------------------------------------------
def _fused_lstm2_kernel(x_ref, wih1_ref, whh1_ref, b1_ref, w2_ref, b2_ref,
                        out_ref, g1_sc, h1_sc, c1_sc, h2_sc, c2_sc,
                        *, hp1, hp2, tt, t_total, unroll):
    t_blk = pl.program_id(1)

    @pl.when(t_blk == 0)
    def _():
        h1_sc[...] = jnp.zeros_like(h1_sc)
        c1_sc[...] = jnp.zeros_like(c1_sc)
        h2_sc[...] = jnp.zeros_like(h2_sc)
        c2_sc[...] = jnp.zeros_like(c2_sc)

    bb = x_ref.shape[1]
    fp = x_ref.shape[2]

    # Weights stay VMEM-resident (constant block index).
    whh1 = whh1_ref[...]
    w2 = w2_ref[...]
    b2 = b2_ref[...]

    # Layer-1 input projection for the whole time block: ONE MXU matmul over
    # all Tt steps (K = Fp is tiny, but so is the data).  Keeps the serial
    # recurrence at exactly 2 matmuls per step.
    x_blk = x_ref[...].reshape(tt * bb, fp).astype(jnp.bfloat16)
    g1_all = jnp.dot(x_blk, wih1_ref[...],
                     preferred_element_type=jnp.float32) + b1_ref[...]
    g1_sc[...] = g1_all.reshape(tt, bb, 4 * hp1)

    def _cell(gates, c, hp):
        # Gate columns pre-ordered (i, f, o, g): one sigmoid push over 3*hp
        # lanes, one tanh push over hp lanes (f32 math; v5e has no bf16 EUP).
        ifo = jax.nn.sigmoid(gates[:, :3 * hp])
        g_g = jnp.tanh(gates[:, 3 * hp:])
        i_g = ifo[:, 0 * hp:1 * hp]
        f_g = ifo[:, 1 * hp:2 * hp]
        o_g = ifo[:, 2 * hp:3 * hp]
        c_new = f_g * c + i_g * g_g
        h_new = o_g * jnp.tanh(c_new)
        return h_new, c_new

    need_mask = (t_total % tt) != 0   # only the padded tail block needs masking

    def step(i, carry):
        h1, c1, h2, c2 = carry
        # Layer 1: precomputed input gates + recurrent matmul.
        g1 = g1_sc[i] + jnp.dot(h1.astype(jnp.bfloat16), whh1,
                                preferred_element_type=jnp.float32)
        h1n, c1n = _cell(g1, c1, hp1)
        # Layer 2: single fused matmul over [h1_t, h2_{t-1}] (K = hp1 + hp2).
        hcat = jnp.concatenate(
            [h1n.astype(jnp.bfloat16), h2.astype(jnp.bfloat16)], axis=-1)
        g2 = jnp.dot(hcat, w2, preferred_element_type=jnp.float32) + b2
        h2n, c2n = _cell(g2, c2, hp2)
        if need_mask:
            valid = (t_blk * tt + i) < t_total
            h1n = jnp.where(valid, h1n, h1)
            c1n = jnp.where(valid, c1n, c1)
            h2n = jnp.where(valid, h2n, h2)
            c2n = jnp.where(valid, c2n, c2)
        return (h1n, c1n, h2n, c2n)

    carry = (h1_sc[...], c1_sc[...], h2_sc[...], c2_sc[...])
    h1, c1, h2, c2 = jax.lax.fori_loop(0, tt, step, carry, unroll=unroll)
    h1_sc[...] = h1
    c1_sc[...] = c1
    h2_sc[...] = h2
    c2_sc[...] = c2

    # Only the final layer-2 hidden state is needed; one lane-dense write.
    @pl.when(t_blk == pl.num_programs(1) - 1)
    def _():
        out_ref[...] = h2


# ----------------------------------------------------------------------------
# LSTMEncoder forward (matches the PyTorch module)
# ----------------------------------------------------------------------------
def init_lstm_encoder_params(key, seq_len, n_features, embedding_dim=64):
    hidden_dim = 2 * embedding_dim

    def init_lstm(key, input_size, hidden_size):
        k = 1.0 / jnp.sqrt(hidden_size)
        ks = jax.random.split(key, 4)
        return dict(
            w_ih=jax.random.uniform(ks[0], (4 * hidden_size, input_size),
                                    minval=-k, maxval=k, dtype=jnp.float32),
            w_hh=jax.random.uniform(ks[1], (4 * hidden_size, hidden_size),
                                    minval=-k, maxval=k, dtype=jnp.float32),
            b_ih=jax.random.uniform(ks[2], (4 * hidden_size,),
                                    minval=-k, maxval=k, dtype=jnp.float32),
            b_hh=jax.random.uniform(ks[3], (4 * hidden_size,),
                                    minval=-k, maxval=k, dtype=jnp.float32),
        )

    k1, k2 = jax.random.split(key)
    return dict(
        rnn1=init_lstm(k1, n_features, hidden_dim),
        rnn2=init_lstm(k2, hidden_dim, embedding_dim),
    )


@jax.jit
def lstm_encoder_forward(x, params):
    """x: (B, T, n_features) batch_first, like the PyTorch module.
    Returns hidden_n.permute(1, 0, 2) -> (B, 1, embedding_dim)."""
    x = jnp.asarray(x, jnp.float32)
    B, T, F = x.shape
    p1, p2 = params["rnn1"], params["rnn2"]
    H1 = p1["w_ih"].shape[0] // 4          # hidden_dim = 2 * embedding_dim
    H2 = p2["w_ih"].shape[0] // 4          # embedding_dim

    Hp1 = _round_up(H1, 128)               # 128-lane-aligned gate segments
    Hp2 = _round_up(H2, 128)
    Fp = _round_up(F, 8)                   # pad features for a clean MXU K dim
    # Bb <= 32 keeps the recurrent loop's live state vreg-resident.
    # TODO(synk): on v7x pick Bb so nb >= 2 for B >= 16 to occupy both TCs.
    Bb = min(_round_up(B, 8), 32)
    Bp = _round_up(B, Bb)
    Tt = _pick_time_block(T)
    nt = pl.cdiv(T, Tt)
    T_pad = nt * Tt
    nb = Bp // Bb
    unroll = _pick_unroll(Tt)

    # ---- input stream: (T_pad, Bp, Fp) f32, zero-padded (tiny vs gate stream)
    x_tm = jnp.transpose(x, (1, 0, 2))                          # (T, B, F)
    x_tm = jnp.pad(x_tm, ((0, T_pad - T), (0, Bp - B), (0, Fp - F)))

    # ---- weights: bf16 matmul operands, gate-reordered (i,f,o,g), zero-padded
    wih1 = jnp.pad(_prep_gate_cols(jnp.asarray(p1["w_ih"], jnp.float32).T, H1, Hp1),
                   ((0, Fp - F), (0, 0))).astype(jnp.bfloat16)         # (Fp, 4Hp1)
    whh1 = jnp.pad(_prep_gate_cols(jnp.asarray(p1["w_hh"], jnp.float32).T, H1, Hp1),
                   ((0, Hp1 - H1), (0, 0))).astype(jnp.bfloat16)       # (Hp1, 4Hp1)
    wih2 = jnp.pad(_prep_gate_cols(jnp.asarray(p2["w_ih"], jnp.float32).T, H2, Hp2),
                   ((0, Hp1 - H1), (0, 0)))                            # (Hp1, 4Hp2)
    whh2 = jnp.pad(_prep_gate_cols(jnp.asarray(p2["w_hh"], jnp.float32).T, H2, Hp2),
                   ((0, Hp2 - H2), (0, 0)))                            # (Hp2, 4Hp2)
    w2 = jnp.concatenate([wih2, whh2], axis=0).astype(jnp.bfloat16)    # (Hp1+Hp2, 4Hp2)
    b1 = _prep_gate_bias(jnp.asarray(p1["b_ih"], jnp.float32)
                         + jnp.asarray(p1["b_hh"], jnp.float32), H1, Hp1)  # (1, 4Hp1)
    b2 = _prep_gate_bias(jnp.asarray(p2["b_ih"], jnp.float32)
                         + jnp.asarray(p2["b_hh"], jnp.float32), H2, Hp2)  # (1, 4Hp2)

    kernel = functools.partial(_fused_lstm2_kernel, hp1=Hp1, hp2=Hp2,
                               tt=Tt, t_total=T, unroll=unroll)

    flops = 2 * T_pad * Bp * (Fp * 4 * Hp1 + Hp1 * 4 * Hp1
                              + (Hp1 + Hp2) * 4 * Hp2)
    transcendentals = T_pad * Bp * 5 * (Hp1 + Hp2)
    bytes_accessed = (x_tm.size * 4 + wih1.size * 2 + whh1.size * 2
                      + w2.size * 2 + b1.size * 4 + b2.size * 4 + Bp * Hp2 * 4)

    out_full = pl.pallas_call(
        kernel,
        out_shape=jax.ShapeDtypeStruct((Bp, Hp2), jnp.float32),
        grid_spec=pltpu.PrefetchScalarGridSpec(
            num_scalar_prefetch=0,
            grid=(nb, nt),
            in_specs=[
                pl.BlockSpec((Tt, Bb, Fp), lambda b, t: (t, b, 0)),
                pl.BlockSpec((Fp, 4 * Hp1), lambda b, t: (0, 0)),
                pl.BlockSpec((Hp1, 4 * Hp1), lambda b, t: (0, 0)),
                pl.BlockSpec((1, 4 * Hp1), lambda b, t: (0, 0)),
                pl.BlockSpec((Hp1 + Hp2, 4 * Hp2), lambda b, t: (0, 0)),
                pl.BlockSpec((1, 4 * Hp2), lambda b, t: (0, 0)),
            ],
            out_specs=pl.BlockSpec((Bb, Hp2), lambda b, t: (b, 0)),
            scratch_shapes=[
                pltpu.VMEM((Tt, Bb, 4 * Hp1), jnp.float32),   # layer-1 gate block
                pltpu.VMEM((Bb, Hp1), jnp.float32),           # h1
                pltpu.VMEM((Bb, Hp1), jnp.float32),           # c1
                pltpu.VMEM((Bb, Hp2), jnp.float32),           # h2
                pltpu.VMEM((Bb, Hp2), jnp.float32),           # c2
            ],
        ),
        compiler_params=pltpu.CompilerParams(
            dimension_semantics=("parallel", "arbitrary")),
        cost_estimate=pl.CostEstimate(
            flops=flops, transcendentals=transcendentals,
            bytes_accessed=bytes_accessed),
    )(x_tm, wih1, whh1, b1, w2, b2)

    hidden_n = out_full[:B, :H2]          # final layer-2 hidden state (B, E)
    return hidden_n[:, None, :]           # == hidden_n.permute(1, 0, 2) in PyTorch


# ----------------------------------------------------------------------------
# Pure-JAX f32 reference (lax.scan) for a correctness check
# ----------------------------------------------------------------------------
def _lstm_layer_ref(x_tbf, p):
    H = p["w_ih"].shape[0] // 4
    B = x_tbf.shape[1]
    b = p["b_ih"] + p["b_hh"]

    def step(carry, x_t):
        h, c = carry
        gates = x_t @ p["w_ih"].T + h @ p["w_hh"].T + b
        i = jax.nn.sigmoid(gates[:, 0 * H:1 * H])
        f = jax.nn.sigmoid(gates[:, 1 * H:2 * H])
        g = jnp.tanh(gates[:, 2 * H:3 * H])
        o = jax.nn.sigmoid(gates[:, 3 * H:4 * H])
        c = f * c + i * g
        h = o * jnp.tanh(c)
        return (h, c), h

    init = (jnp.zeros((B, H), jnp.float32), jnp.zeros((B, H), jnp.float32))
    _, hs = jax.lax.scan(step, init, x_tbf)
    return hs


def lstm_encoder_ref(x, params):
    x_tm = jnp.transpose(x, (1, 0, 2))
    h1 = _lstm_layer_ref(x_tm, params["rnn1"])
    h2 = _lstm_layer_ref(h1, params["rnn2"])
    return h2[-1][:, None, :]


if __name__ == "__main__":
    # Small shapes consistent with the module: batch=2, seq_len=8, n_features=4,
    # embedding_dim=32 (hidden_dim = 64).
    B, T, F, E = 2, 8, 4, 32
    key = jax.random.PRNGKey(0)
    kx, kp = jax.random.split(key)

    x = jax.random.normal(kx, (B, T, F), dtype=jnp.float32)
    params = init_lstm_encoder_params(kp, seq_len=T, n_features=F,
                                      embedding_dim=E)

    out = jax.block_until_ready(lstm_encoder_forward(x, params))
    ref = lstm_encoder_ref(x, params)

    assert out.shape == (B, 1, E), out.shape
    # Matmul operands are bf16 (f32 accumulation), so compare with a
    # bf16-appropriate tolerance against the f32 reference.
    err = float(jnp.max(jnp.abs(out - ref)))
    assert jnp.allclose(out, ref, atol=3e-2, rtol=3e-2), f"mismatch, max err {err}"

    print("KERNEL_OK")
</pallas_src>

<mosaic_0001>
module attributes {stable_mosaic.version = 11 : i64} {
  func.func @_fused_lstm2_kernel(%arg0: i32, %arg1: i32, %arg2: memref<8x8x8xf32, #tpu.memory_space<vmem>>, %arg3: memref<8x512xbf16, #tpu.memory_space<vmem>>, %arg4: memref<128x512xbf16, #tpu.memory_space<vmem>>, %arg5: memref<1x512xf32, #tpu.memory_space<vmem>>, %arg6: memref<256x512xbf16, #tpu.memory_space<vmem>>, %arg7: memref<1x512xf32, #tpu.memory_space<vmem>>, %arg8: memref<8x128xf32, #tpu.memory_space<vmem>>, %arg9: memref<8x8x512xf32, #tpu.memory_space<vmem>>, %arg10: memref<8x128xf32, #tpu.memory_space<vmem>>, %arg11: memref<8x128xf32, #tpu.memory_space<vmem>>, %arg12: memref<8x128xf32, #tpu.memory_space<vmem>>, %arg13: memref<8x128xf32, #tpu.memory_space<vmem>>) attributes {dimension_semantics = [#tpu.dimension_semantics<parallel>, #tpu.dimension_semantics<arbitrary>], iteration_bounds = array<i64: 1, 1>, scalar_prefetch = 0 : i64, scratch_operands = 5 : i64, tpu.core_type = #tpu.core_type<tc>, window_params = [{transform_indices = @transform_0, window_bounds = array<i64: 8, 8, 8>}, {pipeline_mode = #tpu.pipeline_mode<synchronous>, transform_indices = @transform_1, window_bounds = array<i64: 8, 512>}, {pipeline_mode = #tpu.pipeline_mode<synchronous>, transform_indices = @transform_2, window_bounds = array<i64: 128, 512>}, {pipeline_mode = #tpu.pipeline_mode<synchronous>, transform_indices = @transform_3, window_bounds = array<i64: 1, 512>}, {pipeline_mode = #tpu.pipeline_mode<synchronous>, transform_indices = @transform_4, window_bounds = array<i64: 256, 512>}, {pipeline_mode = #tpu.pipeline_mode<synchronous>, transform_indices = @transform_5, window_bounds = array<i64: 1, 512>}, {transform_indices = @transform_6, window_bounds = array<i64: 8, 128>}]} {
    %c0_i32 = arith.constant 0 : i32
    %0 = arith.cmpi eq, %arg1, %c0_i32 : i32
    %1 = arith.extui %0 : i1 to i32
    %c0_i32_0 = arith.constant 0 : i32
    %2 = arith.cmpi ne, %1, %c0_i32_0 : i32
    scf.if %2 {
      %cst_83 = arith.constant 0.000000e+00 : f32
      %379 = vector.broadcast %cst_83 : f32 to vector<8x128xf32>
      %c0_84 = arith.constant 0 : index
      %c0_85 = arith.constant 0 : index
      %380 = vector.load %arg10[%c0_84, %c0_85] : memref<8x128xf32, #tpu.memory_space<vmem>>, vector<8x128xf32>
      tpu.vector_store %arg10[%c0_84, %c0_85], %379 {strides = array<i32>} : memref<8x128xf32, #tpu.memory_space<vmem>>, vector<8x128xf32>,
      %cst_86 = arith.constant 0.000000e+00 : f32
      %381 = vector.broadcast %cst_86 : f32 to vector<8x128xf32>
      %c0_87 = arith.constant 0 : index
      %c0_88 = arith.constant 0 : index
      %382 = vector.load %arg11[%c0_87, %c0_88] : memref<8x128xf32, #tpu.memory_space<vmem>>, vector<8x128xf32>
      tpu.vector_store %arg11[%c0_87, %c0_88], %381 {strides = array<i32>} : memref<8x128xf32, #tpu.memory_space<vmem>>, vector<8x128xf32>,
      %cst_89 = arith.constant 0.000000e+00 : f32
      %383 = vector.broadcast %cst_89 : f32 to vector<8x128xf32>
      %c0_90 = arith.constant 0 : index
      %c0_91 = arith.constant 0 : index
      %384 = vector.load %arg12[%c0_90, %c0_91] : memref<8x128xf32, #tpu.memory_space<vmem>>, vector<8x128xf32>
      tpu.vector_store %arg12[%c0_90, %c0_91], %383 {strides = array<i32>} : memref<8x128xf32, #tpu.memory_space<vmem>>, vector<8x128xf32>,
      %cst_92 = arith.constant 0.000000e+00 : f32
      %385 = vector.broadcast %cst_92 : f32 to vector<8x128xf32>
      %c0_93 = arith.constant 0 : index
      %c0_94 = arith.constant 0 : index
      %386 = vector.load %arg13[%c0_93, %c0_94] : memref<8x128xf32, #tpu.memory_space<vmem>>, vector<8x128xf32>
      tpu.vector_store %arg13[%c0_93, %c0_94], %385 {strides = array<i32>} : memref<8x128xf32, #tpu.memory_space<vmem>>, vector<8x128xf32>,
    } else {
    }
    %c0 = arith.constant 0 : index
    %c0_1 = arith.constant 0 : index
    %3 = vector.load %arg4[%c0, %c0_1] : memref<128x512xbf16, #tpu.memory_space<vmem>>, vector<128x512xbf16>
    %c0_2 = arith.constant 0 : index
    %c0_3 = arith.constant 0 : index
    %4 = vector.load %arg6[%c0_2, %c0_3] : memref<256x512xbf16, #tpu.memory_space<vmem>>, vector<256x512xbf16>
    %c0_4 = arith.constant 0 : index
    %c0_5 = arith.constant 0 : index
    %5 = vector.load %arg7[%c0_4, %c0_5] : memref<1x512xf32, #tpu.memory_space<vmem>>, vector<1x512xf32>
    %c0_6 = arith.constant 0 : index
    %c0_7 = arith.constant 0 : index
    %c0_8 = arith.constant 0 : index
    %6 = vector.load %arg2[%c0_6, %c0_7, %c0_8] : memref<8x8x8xf32, #tpu.memory_space<vmem>>, vector<8x8x8xf32>
    %7 = vector.shape_cast %6 : vector<8x8x8xf32> to vector<64x8xf32>
    %8 = arith.truncf %7 : vector<64x8xf32> to vector<64x8xbf16>
    %c0_9 = arith.constant 0 : index
    %c0_10 = arith.constant 0 : index
    %9 = vector.load %arg3[%c0_9, %c0_10] : memref<8x512xbf16, #tpu.memory_space<vmem>>, vector<8x512xbf16>
    %cst = arith.constant dense<0.000000e+00> : vector<64x512xf32>
    %10 = tpu.matmul %8, %9, %cst {dimension_numbers = #tpu.dot_dimension_numbers<[1], [0], [0], [1], [0, 0, 1, 1], [], []>} : vector<64x8xbf16>, vector<8x512xbf16>, vector<64x512xf32> -> vector<64x512xf32>
    %c0_11 = arith.constant 0 : index
    %c0_12 = arith.constant 0 : index
    %11 = vector.load %arg5[%c0_11, %c0_12] : memref<1x512xf32, #tpu.memory_space<vmem>>, vector<1x512xf32>
    %12 = vector.broadcast %11 : vector<1x512xf32> to vector<64x512xf32>
    %13 = arith.addf %10, %12 : vector<64x512xf32>
    %14 = vector.shape_cast %13 : vector<64x512xf32> to vector<8x8x512xf32>
    %c0_13 = arith.constant 0 : index
    %c0_14 = arith.constant 0 : index
    %c0_15 = arith.constant 0 : index
    %15 = vector.load %arg9[%c0_13, %c0_14, %c0_15] : memref<8x8x512xf32, #tpu.memory_space<vmem>>, vector<8x8x512xf32>
    tpu.vector_store %arg9[%c0_13, %c0_14, %c0_15], %14 {strides = array<i32>} : memref<8x8x512xf32, #tpu.memory_space<vmem>>, vector<8x8x512xf32>,
    %c0_16 = arith.constant 0 : index
    %c0_17 = arith.constant 0 : index
    %16 = vector.load %arg10[%c0_16, %c0_17] : memref<8x128xf32, #tpu.memory_space<vmem>>, vector<8x128xf32>
    %c0_18 = arith.constant 0 : index
    %c0_19 = arith.constant 0 : index
    %17 = vector.load %arg11[%c0_18, %c0_19] : memref<8x128xf32, #tpu.memory_space<vmem>>, vector<8x128xf32>
    %c0_20 = arith.constant 0 : index
    %c0_21 = arith.constant 0 : index
    %18 = vector.load %arg12[%c0_20, %c0_21] : memref<8x128xf32, #tpu.memory_space<vmem>>, vector<8x128xf32>
    %c0_22 = arith.constant 0 : index
    %c0_23 = arith.constant 0 : index
    %19 = vector.load %arg13[%c0_22, %c0_23] : memref<8x128xf32, #tpu.memory_space<vmem>>, vector<8x128xf32>
    %c0_i32_24 = arith.constant 0 : i32
    %20 = arith.index_cast %c0_i32_24 : i32 to index
    %c0_25 = arith.constant 0 : index
    %c0_26 = arith.constant 0 : index
    %21 = vector.load %arg9[%20, %c0_25, %c0_26] : memref<8x8x512xf32, #tpu.memory_space<vmem>>, vector<1x8x512xf32>
    %22 = vector.shape_cast %21 : vector<1x8x512xf32> to vector<8x512xf32>
    %23 = arith.truncf %16 : vector<8x128xf32> to vector<8x128xbf16>
    %cst_27 = arith.constant dense<0.000000e+00> : vector<8x512xf32>
    %24 = tpu.matmul %23, %3, %cst_27 {dimension_numbers = #tpu.dot_dimension_numbers<[1], [0], [0], [1], [0, 0, 1, 1], [], []>} : vector<8x128xbf16>, vector<128x512xbf16>, vector<8x512xf32> -> vector<8x512xf32>
    %25 = arith.addf %22, %24 : vector<8x512xf32>
    %26 = vector.extract_strided_slice %25 {offsets = [0, 0], sizes = [8, 384], strides = [1, 1]} : vector<8x512xf32> to vector<8x384xf32>
    %27 = arith.negf %26 : vector<8x384xf32>
    %28 = math.exp %27 : vector<8x384xf32>
    %cst_28 = arith.constant 1.000000e+00 : f32
    %29 = vector.broadcast %cst_28 : f32 to vector<8x384xf32>
    %30 = arith.addf %29, %28 : vector<8x384xf32>
    %31 = arith.divf %29, %30 : vector<8x384xf32>
    %32 = vector.extract_strided_slice %25 {offsets = [0, 384], sizes = [8, 128], strides = [1, 1]} : vector<8x512xf32> to vector<8x128xf32>
    %33 = math.tanh %32 : vector<8x128xf32>
    %34 = vector.extract_strided_slice %31 {offsets = [0, 0], sizes = [8, 128], strides = [1, 1]} : vector<8x384xf32> to vector<8x128xf32>
    %35 = vector.extract_strided_slice %31 {offsets = [0, 128], sizes = [8, 128], strides = [1, 1]} : vector<8x384xf32> to vector<8x128xf32>
    %36 = vector.extract_strided_slice %31 {offsets = [0, 256], sizes = [8, 128], strides = [1, 1]} : vector<8x384xf32> to vector<8x128xf32>
    %37 = arith.mulf %35, %17 : vector<8x128xf32>
    %38 = arith.mulf %34, %33 : vector<8x128xf32>
    %39 = arith.addf %37, %38 : vector<8x128xf32>
    %40 = math.tanh %39 : vector<8x128xf32>
    %41 = arith.mulf %36, %40 : vector<8x128xf32>
    %42 = arith.truncf %41 : vector<8x128xf32> to vector<8x128xbf16>
    %43 = arith.truncf %18 : vector<8x128xf32> to vector<8x128xbf16>
    %44 = tpu.concatenate %42, %43 in 1 : vector<8x128xbf16>, vector<8x128xbf16> -> vector<8x256xbf16>
    %cst_29 = arith.constant dense<0.000000e+00> : vector<8x512xf32>
    %45 = tpu.matmul %44, %4, %cst_29 {dimension_numbers = #tpu.dot_dimension_numbers<[1], [0], [0], [1], [0, 0, 1, 1], [], []>} : vector<8x256xbf16>, vector<256x512xbf16>, vector<8x512xf32> -> vector<8x512xf32>
    %46 = vector.broadcast %5 : vector<1x512xf32> to vector<8x512xf32>
    %47 = arith.addf %45, %46 : vector<8x512xf32>
    %48 = vector.extract_strided_slice %47 {offsets = [0, 0], sizes = [8, 384], strides = [1, 1]} : vector<8x512xf32> to vector<8x384xf32>
    %49 = arith.negf %48 : vector<8x384xf32>
    %50 = math.exp %49 : vector<8x384xf32>
    %cst_30 = arith.constant 1.000000e+00 : f32
    %51 = vector.broadcast %cst_30 : f32 to vector<8x384xf32>
    %52 = arith.addf %51, %50 : vector<8x384xf32>
    %53 = arith.divf %51, %52 : vector<8x384xf32>
    %54 = vector.extract_strided_slice %47 {offsets = [0, 384], sizes = [8, 128], strides = [1, 1]} : vector<8x512xf32> to vector<8x128xf32>
    %55 = math.tanh %54 : vector<8x128xf32>
    %56 = vector.extract_strided_slice %53 {offsets = [0, 0], sizes = [8, 128], strides = [1, 1]} : vector<8x384xf32> to vector<8x128xf32>
    %57 = vector.extract_strided_slice %53 {offsets = [0, 128], sizes = [8, 128], strides = [1, 1]} : vector<8x384xf32> to vector<8x128xf32>
    %58 = vector.extract_strided_slice %53 {offsets = [0, 256], sizes = [8, 128], strides = [1, 1]} : vector<8x384xf32> to vector<8x128xf32>
    %59 = arith.mulf %57, %19 : vector<8x128xf32>
    %60 = arith.mulf %56, %55 : vector<8x128xf32>
    %61 = arith.addf %59, %60 : vector<8x128xf32>
    %62 = math.tanh %61 : vector<8x128xf32>
    %63 = arith.mulf %58, %62 : vector<8x128xf32>
    %c1_i32 = arith.constant 1 : i32
    %64 = arith.index_cast %c1_i32 : i32 to index
    %c0_31 = arith.constant 0 : index
    %c0_32 = arith.constant 0 : index
    %65 = vector.load %arg9[%64, %c0_31, %c0_32] : memref<8x8x512xf32, #tpu.memory_space<vmem>>, vector<1x8x512xf32>
    %66 = vector.shape_cast %65 : vector<1x8x512xf32> to vector<8x512xf32>
    %67 = arith.truncf %41 : vector<8x128xf32> to vector<8x128xbf16>
    %cst_33 = arith.constant dense<0.000000e+00> : vector<8x512xf32>
    %68 = tpu.matmul %67, %3, %cst_33 {dimension_numbers = #tpu.dot_dimension_numbers<[1], [0], [0], [1], [0, 0, 1, 1], [], []>} : vector<8x128xbf16>, vector<128x512xbf16>, vector<8x512xf32> -> vector<8x512xf32>
    %69 = arith.addf %66, %68 : vector<8x512xf32>
    %70 = vector.extract_strided_slice %69 {offsets = [0, 0], sizes = [8, 384], strides = [1, 1]} : vector<8x512xf32> to vector<8x384xf32>
    %71 = arith.negf %70 : vector<8x384xf32>
    %72 = math.exp %71 : vector<8x384xf32>
    %cst_34 = arith.constant 1.000000e+00 : f32
    %73 = vector.broadcast %cst_34 : f32 to vector<8x384xf32>
    %74 = arith.addf %73, %72 : vector<8x384xf32>
    %75 = arith.divf %73, %74 : vector<8x384xf32>
    %76 = vector.extract_strided_slice %69 {offsets = [0, 384], sizes = [8, 128], strides = [1, 1]} : vector<8x512xf32> to vector<8x128xf32>
    %77 = math.tanh %76 : vector<8x128xf32>
    %78 = vector.extract_strided_slice %75 {offsets = [0, 0], sizes = [8, 128], strides = [1, 1]} : vector<8x384xf32> to vector<8x128xf32>
    %79 = vector.extract_strided_slice %75 {offsets = [0, 128], sizes = [8, 128], strides = [1, 1]} : vector<8x384xf32> to vector<8x128xf32>
    %80 = vector.extract_strided_slice %75 {offsets = [0, 256], sizes = [8, 128], strides = [1, 1]} : vector<8x384xf32> to vector<8x128xf32>
    %81 = arith.mulf %79, %39 : vector<8x128xf32>
    %82 = arith.mulf %78, %77 : vector<8x128xf32>
    %83 = arith.addf %81, %82 : vector<8x128xf32>
    %84 = math.tanh %83 : vector<8x128xf32>
    %85 = arith.mulf %80, %84 : vector<8x128xf32>
    %86 = arith.truncf %85 : vector<8x128xf32> to vector<8x128xbf16>
    %87 = arith.truncf %63 : vector<8x128xf32> to vector<8x128xbf16>
    %88 = tpu.concatenate %86, %87 in 1 : vector<8x128xbf16>, vector<8x128xbf16> -> vector<8x256xbf16>
    %cst_35 = arith.constant dense<0.000000e+00> : vector<8x512xf32>
    %89 = tpu.matmul %88, %4, %cst_35 {dimension_numbers = #tpu.dot_dimension_numbers<[1], [0], [0], [1], [0, 0, 1, 1], [], []>} : vector<8x256xbf16>, vector<256x512xbf16>, vector<8x512xf32> -> vector<8x512xf32>
    %90 = vector.broadcast %5 : vector<1x512xf32> to vector<8x512xf32>
    %91 = arith.addf %89, %90 : vector<8x512xf32>
    %92 = vector.extract_strided_slice %91 {offsets = [0, 0], sizes = [8, 384], strides = [1, 1]} : vector<8x512xf32> to vector<8x384xf32>
    %93 = arith.negf %92 : vector<8x384xf32>
    %94 = math.exp %93 : vector<8x384xf32>
    %cst_36 = arith.constant 1.000000e+00 : f32
    %95 = vector.broadcast %cst_36 : f32 to vector<8x384xf32>
    %96 = arith.addf %95, %94 : vector<8x384xf32>
    %97 = arith.divf %95, %96 : vector<8x384xf32>
    %98 = vector.extract_strided_slice %91 {offsets = [0, 384], sizes = [8, 128], strides = [1, 1]} : vector<8x512xf32> to vector<8x128xf32>
    %99 = math.tanh %98 : vector<8x128xf32>
    %100 = vector.extract_strided_slice %97 {offsets = [0, 0], sizes = [8, 128], strides = [1, 1]} : vector<8x384xf32> to vector<8x128xf32>
    %101 = vector.extract_strided_slice %97 {offsets = [0, 128], sizes = [8, 128], strides = [1, 1]} : vector<8x384xf32> to vector<8x128xf32>
    %102 = vector.extract_strided_slice %97 {offsets = [0, 256], sizes = [8, 128], strides = [1, 1]} : vector<8x384xf32> to vector<8x128xf32>
    %103 = arith.mulf %101, %61 : vector<8x128xf32>
    %104 = arith.mulf %100, %99 : vector<8x128xf32>
    %105 = arith.addf %103, %104 : vector<8x128xf32>
    %106 = math.tanh %105 : vector<8x128xf32>
    %107 = arith.mulf %102, %106 : vector<8x128xf32>
    %c2_i32 = arith.constant 2 : i32
    %108 = arith.index_cast %c2_i32 : i32 to index
    %c0_37 = arith.constant 0 : index
    %c0_38 = arith.constant 0 : index
    %109 = vector.load %arg9[%108, %c0_37, %c0_38] : memref<8x8x512xf32, #tpu.memory_space<vmem>>, vector<1x8x512xf32>
    %110 = vector.shape_cast %109 : vector<1x8x512xf32> to vector<8x512xf32>
    %111 = arith.truncf %85 : vector<8x128xf32> to vector<8x128xbf16>
    %cst_39 = arith.constant dense<0.000000e+00> : vector<8x512xf32>
    %112 = tpu.matmul %111, %3, %cst_39 {dimension_numbers = #tpu.dot_dimension_numbers<[1], [0], [0], [1], [0, 0, 1, 1], [], []>} : vector<8x128xbf16>, vector<128x512xbf16>, vector<8x512xf32> -> vector<8x512xf32>
    %113 = arith.addf %110, %112 : vector<8x512xf32>
    %114 = vector.extract_strided_slice %113 {offsets = [0, 0], sizes = [8, 384], strides = [1, 1]} : vector<8x512xf32> to vector<8x384xf32>
    %115 = arith.negf %114 : vector<8x384xf32>
    %116 = math.exp %115 : vector<8x384xf32>
    %cst_40 = arith.constant 1.000000e+00 : f32
    %117 = vector.broadcast %cst_40 : f32 to vector<8x384xf32>
    %118 = arith.addf %117, %116 : vector<8x384xf32>
    %119 = arith.divf %117, %118 : vector<8x384xf32>
    %120 = vector.extract_strided_slice %113 {offsets = [0, 384], sizes = [8, 128], strides = [1, 1]} : vector<8x512xf32> to vector<8x128xf32>
    %121 = math.tanh %120 : vector<8x128xf32>
    %122 = vector.extract_strided_slice %119 {offsets = [0, 0], sizes = [8, 128], strides = [1, 1]} : vector<8x384xf32> to vector<8x128xf32>
    %123 = vector.extract_strided_slice %119 {offsets = [0, 128], sizes = [8, 128], strides = [1, 1]} : vector<8x384xf32> to vector<8x128xf32>
    %124 = vector.extract_strided_slice %119 {offsets = [0, 256], sizes = [8, 128], strides = [1, 1]} : vector<8x384xf32> to vector<8x128xf32>
    %125 = arith.mulf %123, %83 : vector<8x128xf32>
    %126 = arith.mulf %122, %121 : vector<8x128xf32>
    %127 = arith.addf %125, %126 : vector<8x128xf32>
    %128 = math.tanh %127 : vector<8x128xf32>
    %129 = arith.mulf %124, %128 : vector<8x128xf32>
    %130 = arith.truncf %129 : vector<8x128xf32> to vector<8x128xbf16>
    %131 = arith.truncf %107 : vector<8x128xf32> to vector<8x128xbf16>
    %132 = tpu.concatenate %130, %131 in 1 : vector<8x128xbf16>, vector<8x128xbf16> -> vector<8x256xbf16>
    %cst_41 = arith.constant dense<0.000000e+00> : vector<8x512xf32>
    %133 = tpu.matmul %132, %4, %cst_41 {dimension_numbers = #tpu.dot_dimension_numbers<[1], [0], [0], [1], [0, 0, 1, 1], [], []>} : vector<8x256xbf16>, vector<256x512xbf16>, vector<8x512xf32> -> vector<8x512xf32>
    %134 = vector.broadcast %5 : vector<1x512xf32> to vector<8x512xf32>
    %135 = arith.addf %133, %134 : vector<8x512xf32>
    %136 = vector.extract_strided_slice %135 {offsets = [0, 0], sizes = [8, 384], strides = [1, 1]} : vector<8x512xf32> to vector<8x384xf32>
    %137 = arith.negf %136 : vector<8x384xf32>
    %138 = math.exp %137 : vector<8x384xf32>
    %cst_42 = arith.constant 1.000000e+00 : f32
    %139 = vector.broadcast %cst_42 : f32 to vector<8x384xf32>
    %140 = arith.addf %139, %138 : vector<8x384xf32>
    %141 = arith.divf %139, %140 : vector<8x384xf32>
    %142 = vector.extract_strided_slice %135 {offsets = [0, 384], sizes = [8, 128], strides = [1, 1]} : vector<8x512xf32> to vector<8x128xf32>
    %143 = math.tanh %142 : vector<8x128xf32>
    %144 = vector.extract_strided_slice %141 {offsets = [0, 0], sizes = [8, 128], strides = [1, 1]} : vector<8x384xf32> to vector<8x128xf32>
    %145 = vector.extract_strided_slice %141 {offsets = [0, 128], sizes = [8, 128], strides = [1, 1]} : vector<8x384xf32> to vector<8x128xf32>
    %146 = vector.extract_strided_slice %141 {offsets = [0, 256], sizes = [8, 128], strides = [1, 1]} : vector<8x384xf32> to vector<8x128xf32>
    %147 = arith.mulf %145, %105 : vector<8x128xf32>
    %148 = arith.mulf %144, %143 : vector<8x128xf32>
    %149 = arith.addf %147, %148 : vector<8x128xf32>
    %150 = math.tanh %149 : vector<8x128xf32>
    %151 = arith.mulf %146, %150 : vector<8x128xf32>
    %c3_i32 = arith.constant 3 : i32
    %152 = arith.index_cast %c3_i32 : i32 to index
    %c0_43 = arith.constant 0 : index
    %c0_44 = arith.constant 0 : index
    %153 = vector.load %arg9[%152, %c0_43, %c0_44] : memref<8x8x512xf32, #tpu.memory_space<vmem>>, vector<1x8x512xf32>
    %154 = vector.shape_cast %153 : vector<1x8x512xf32> to vector<8x512xf32>
    %155 = arith.truncf %129 : vector<8x128xf32> to vector<8x128xbf16>
    %cst_45 = arith.constant dense<0.000000e+00> : vector<8x512xf32>
    %156 = tpu.matmul %155, %3, %cst_45 {dimension_numbers = #tpu.dot_dimension_numbers<[1], [0], [0], [1], [0, 0, 1, 1], [], []>} : vector<8x128xbf16>, vector<128x512xbf16>, vector<8x512xf32> -> vector<8x512xf32>
    %157 = arith.addf %154, %156 : vector<8x512xf32>
    %158 = vector.extract_strided_slice %157 {offsets = [0, 0], sizes = [8, 384], strides = [1, 1]} : vector<8x512xf32> to vector<8x384xf32>
    %159 = arith.negf %158 : vector<8x384xf32>
    %160 = math.exp %159 : vector<8x384xf32>
    %cst_46 = arith.constant 1.000000e+00 : f32
    %161 = vector.broadcast %cst_46 : f32 to vector<8x384xf32>
    %162 = arith.addf %161, %160 : vector<8x384xf32>
    %163 = arith.divf %161, %162 : vector<8x384xf32>
    %164 = vector.extract_strided_slice %157 {offsets = [0, 384], sizes = [8, 128], strides = [1, 1]} : vector<8x512xf32> to vector<8x128xf32>
    %165 = math.tanh %164 : vector<8x128xf32>
    %166 = vector.extract_strided_slice %163 {offsets = [0, 0], sizes = [8, 128], strides = [1, 1]} : vector<8x384xf32> to vector<8x128xf32>
    %167 = vector.extract_strided_slice %163 {offsets = [0, 128], sizes = [8, 128], strides = [1, 1]} : vector<8x384xf32> to vector<8x128xf32>
    %168 = vector.extract_strided_slice %163 {offsets = [0, 256], sizes = [8, 128], strides = [1, 1]} : vector<8x384xf32> to vector<8x128xf32>
    %169 = arith.mulf %167, %127 : vector<8x128xf32>
    %170 = arith.mulf %166, %165 : vector<8x128xf32>
    %171 = arith.addf %169, %170 : vector<8x128xf32>
    %172 = math.tanh %171 : vector<8x128xf32>
    %173 = arith.mulf %168, %172 : vector<8x128xf32>
    %174 = arith.truncf %173 : vector<8x128xf32> to vector<8x128xbf16>
    %175 = arith.truncf %151 : vector<8x128xf32> to vector<8x128xbf16>
    %176 = tpu.concatenate %174, %175 in 1 : vector<8x128xbf16>, vector<8x128xbf16> -> vector<8x256xbf16>
    %cst_47 = arith.constant dense<0.000000e+00> : vector<8x512xf32>
    %177 = tpu.matmul %176, %4, %cst_47 {dimension_numbers = #tpu.dot_dimension_numbers<[1], [0], [0], [1], [0, 0, 1, 1], [], []>} : vector<8x256xbf16>, vector<256x512xbf16>, vector<8x512xf32> -> vector<8x512xf32>
    %178 = vector.broadcast %5 : vector<1x512xf32> to vector<8x512xf32>
    %179 = arith.addf %177, %178 : vector<8x512xf32>
    %180 = vector.extract_strided_slice %179 {offsets = [0, 0], sizes = [8, 384], strides = [1, 1]} : vector<8x512xf32> to vector<8x384xf32>
    %181 = arith.negf %180 : vector<8x384xf32>
    %182 = math.exp %181 : vector<8x384xf32>
    %cst_48 = arith.constant 1.000000e+00 : f32
    %183 = vector.broadcast %cst_48 : f32 to vector<8x384xf32>
    %184 = arith.addf %183, %182 : vector<8x384xf32>
    %185 = arith.divf %183, %184 : vector<8x384xf32>
    %186 = vector.extract_strided_slice %179 {offsets = [0, 384], sizes = [8, 128], strides = [1, 1]} : vector<8x512xf32> to vector<8x128xf32>
    %187 = math.tanh %186 : vector<8x128xf32>
    %188 = vector.extract_strided_slice %185 {offsets = [0, 0], sizes = [8, 128], strides = [1, 1]} : vector<8x384xf32> to vector<8x128xf32>
    %189 = vector.extract_strided_slice %185 {offsets = [0, 128], sizes = [8, 128], strides = [1, 1]} : vector<8x384xf32> to vector<8x128xf32>
    %190 = vector.extract_strided_slice %185 {offsets = [0, 256], sizes = [8, 128], strides = [1, 1]} : vector<8x384xf32> to vector<8x128xf32>
    %191 = arith.mulf %189, %149 : vector<8x128xf32>
    %192 = arith.mulf %188, %187 : vector<8x128xf32>
    %193 = arith.addf %191, %192 : vector<8x128xf32>
    %194 = math.tanh %193 : vector<8x128xf32>
    %195 = arith.mulf %190, %194 : vector<8x128xf32>
    %c4_i32 = arith.constant 4 : i32
    %196 = arith.index_cast %c4_i32 : i32 to index
    %c0_49 = arith.constant 0 : index
    %c0_50 = arith.constant 0 : index
    %197 = vector.load %arg9[%196, %c0_49, %c0_50] : memref<8x8x512xf32, #tpu.memory_space<vmem>>, vector<1x8x512xf32>
    %198 = vector.shape_cast %197 : vector<1x8x512xf32> to vector<8x512xf32>
    %199 = arith.truncf %173 : vector<8x128xf32> to vector<8x128xbf16>
    %cst_51 = arith.constant dense<0.000000e+00> : vector<8x512xf32>
    %200 = tpu.matmul %199, %3, %cst_51 {dimension_numbers = #tpu.dot_dimension_numbers<[1], [0], [0], [1], [0, 0, 1, 1], [], []>} : vector<8x128xbf16>, vector<128x512xbf16>, vector<8x512xf32> -> vector<8x512xf32>
    %201 = arith.addf %198, %200 : vector<8x512xf32>
    %202 = vector.extract_strided_slice %201 {offsets = [0, 0], sizes = [8, 384], strides = [1, 1]} : vector<8x512xf32> to vector<8x384xf32>
    %203 = arith.negf %202 : vector<8x384xf32>
    %204 = math.exp %203 : vector<8x384xf32>
    %cst_52 = arith.constant 1.000000e+00 : f32
    %205 = vector.broadcast %cst_52 : f32 to vector<8x384xf32>
    %206 = arith.addf %205, %204 : vector<8x384xf32>
    %207 = arith.divf %205, %206 : vector<8x384xf32>
    %208 = vector.extract_strided_slice %201 {offsets = [0, 384], sizes = [8, 128], strides = [1, 1]} : vector<8x512xf32> to vector<8x128xf32>
    %209 = math.tanh %208 : vector<8x128xf32>
    %210 = vector.extract_strided_slice %207 {offsets = [0, 0], sizes = [8, 128], strides = [1, 1]} : vector<8x384xf32> to vector<8x128xf32>
    %211 = vector.extract_strided_slice %207 {offsets = [0, 128], sizes = [8, 128], strides = [1, 1]} : vector<8x384xf32> to vector<8x128xf32>
    %212 = vector.extract_strided_slice %207 {offsets = [0, 256], sizes = [8, 128], strides = [1, 1]} : vector<8x384xf32> to vector<8x128xf32>
    %213 = arith.mulf %211, %171 : vector<8x128xf32>
    %214 = arith.mulf %210, %209 : vector<8x128xf32>
    %215 = arith.addf %213, %214 : vector<8x128xf32>
    %216 = math.tanh %215 : vector<8x128xf32>
    %217 = arith.mulf %212, %216 : vector<8x128xf32>
    %218 = arith.truncf %217 : vector<8x128xf32> to vector<8x128xbf16>
    %219 = arith.truncf %195 : vector<8x128xf32> to vector<8x128xbf16>
    %220 = tpu.concatenate %218, %219 in 1 : vector<8x128xbf16>, vector<8x128xbf16> -> vector<8x256xbf16>
    %cst_53 = arith.constant dense<0.000000e+00> : vector<8x512xf32>
    %221 = tpu.matmul %220, %4, %cst_53 {dimension_numbers = #tpu.dot_dimension_numbers<[1], [0], [0], [1], [0, 0, 1, 1], [], []>} : vector<8x256xbf16>, vector<256x512xbf16>, vector<8x512xf32> -> vector<8x512xf32>
    %222 = vector.broadcast %5 : vector<1x512xf32> to vector<8x512xf32>
    %223 = arith.addf %221, %222 : vector<8x512xf32>
    %224 = vector.extract_strided_slice %223 {offsets = [0, 0], sizes = [8, 384], strides = [1, 1]} : vector<8x512xf32> to vector<8x384xf32>
    %225 = arith.negf %224 : vector<8x384xf32>
    %226 = math.exp %225 : vector<8x384xf32>
    %cst_54 = arith.constant 1.000000e+00 : f32
    %227 = vector.broadcast %cst_54 : f32 to vector<8x384xf32>
    %228 = arith.addf %227, %226 : vector<8x384xf32>
    %229 = arith.divf %227, %228 : vector<8x384xf32>
    %230 = vector.extract_strided_slice %223 {offsets = [0, 384], sizes = [8, 128], strides = [1, 1]} : vector<8x512xf32> to vector<8x128xf32>
    %231 = math.tanh %230 : vector<8x128xf32>
    %232 = vector.extract_strided_slice %229 {offsets = [0, 0], sizes = [8, 128], strides = [1, 1]} : vector<8x384xf32> to vector<8x128xf32>
    %233 = vector.extract_strided_slice %229 {offsets = [0, 128], sizes = [8, 128], strides = [1, 1]} : vector<8x384xf32> to vector<8x128xf32>
    %234 = vector.extract_strided_slice %229 {offsets = [0, 256], sizes = [8, 128], strides = [1, 1]} : vector<8x384xf32> to vector<8x128xf32>
    %235 = arith.mulf %233, %193 : vector<8x128xf32>
    %236 = arith.mulf %232, %231 : vector<8x128xf32>
    %237 = arith.addf %235, %236 : vector<8x128xf32>
    %238 = math.tanh %237 : vector<8x128xf32>
    %239 = arith.mulf %234, %238 : vector<8x128xf32>
    %c5_i32 = arith.constant 5 : i32
    %240 = arith.index_cast %c5_i32 : i32 to index
    %c0_55 = arith.constant 0 : index
    %c0_56 = arith.constant 0 : index
    %241 = vector.load %arg9[%240, %c0_55, %c0_56] : memref<8x8x512xf32, #tpu.memory_space<vmem>>, vector<1x8x512xf32>
    %242 = vector.shape_cast %241 : vector<1x8x512xf32> to vector<8x512xf32>
    %243 = arith.truncf %217 : vector<8x128xf32> to vector<8x128xbf16>
    %cst_57 = arith.constant dense<0.000000e+00> : vector<8x512xf32>
    %244 = tpu.matmul %243, %3, %cst_57 {dimension_numbers = #tpu.dot_dimension_numbers<[1], [0], [0], [1], [0, 0, 1, 1], [], []>} : vector<8x128xbf16>, vector<128x512xbf16>, vector<8x512xf32> -> vector<8x512xf32>
    %245 = arith.addf %242, %244 : vector<8x512xf32>
    %246 = vector.extract_strided_slice %245 {offsets = [0, 0], sizes = [8, 384], strides = [1, 1]} : vector<8x512xf32> to vector<8x384xf32>
    %247 = arith.negf %246 : vector<8x384xf32>
    %248 = math.exp %247 : vector<8x384xf32>
    %cst_58 = arith.constant 1.000000e+00 : f32
    %249 = vector.broadcast %cst_58 : f32 to vector<8x384xf32>
    %250 = arith.addf %249, %248 : vector<8x384xf32>
    %251 = arith.divf %249, %250 : vector<8x384xf32>
    %252 = vector.extract_strided_slice %245 {offsets = [0, 384], sizes = [8, 128], strides = [1, 1]} : vector<8x512xf32> to vector<8x128xf32>
    %253 = math.tanh %252 : vector<8x128xf32>
    %254 = vector.extract_strided_slice %251 {offsets = [0, 0], sizes = [8, 128], strides = [1, 1]} : vector<8x384xf32> to vector<8x128xf32>
    %255 = vector.extract_strided_slice %251 {offsets = [0, 128], sizes = [8, 128], strides = [1, 1]} : vector<8x384xf32> to vector<8x128xf32>
    %256 = vector.extract_strided_slice %251 {offsets = [0, 256], sizes = [8, 128], strides = [1, 1]} : vector<8x384xf32> to vector<8x128xf32>
    %257 = arith.mulf %255, %215 : vector<8x128xf32>
    %258 = arith.mulf %254, %253 : vector<8x128xf32>
    %259 = arith.addf %257, %258 : vector<8x128xf32>
    %260 = math.tanh %259 : vector<8x128xf32>
    %261 = arith.mulf %256, %260 : vector<8x128xf32>
    %262 = arith.truncf %261 : vector<8x128xf32> to vector<8x128xbf16>
    %263 = arith.truncf %239 : vector<8x128xf32> to vector<8x128xbf16>
    %264 = tpu.concatenate %262, %263 in 1 : vector<8x128xbf16>, vector<8x128xbf16> -> vector<8x256xbf16>
    %cst_59 = arith.constant dense<0.000000e+00> : vector<8x512xf32>
    %265 = tpu.matmul %264, %4, %cst_59 {dimension_numbers = #tpu.dot_dimension_numbers<[1], [0], [0], [1], [0, 0, 1, 1], [], []>} : vector<8x256xbf16>, vector<256x512xbf16>, vector<8x512xf32> -> vector<8x512xf32>
    %266 = vector.broadcast %5 : vector<1x512xf32> to vector<8x512xf32>
    %267 = arith.addf %265, %266 : vector<8x512xf32>
    %268 = vector.extract_strided_slice %267 {offsets = [0, 0], sizes = [8, 384], strides = [1, 1]} : vector<8x512xf32> to vector<8x384xf32>
    %269 = arith.negf %268 : vector<8x384xf32>
    %270 = math.exp %269 : vector<8x384xf32>
    %cst_60 = arith.constant 1.000000e+00 : f32
    %271 = vector.broadcast %cst_60 : f32 to vector<8x384xf32>
    %272 = arith.addf %271, %270 : vector<8x384xf32>
    %273 = arith.divf %271, %272 : vector<8x384xf32>
    %274 = vector.extract_strided_slice %267 {offsets = [0, 384], sizes = [8, 128], strides = [1, 1]} : vector<8x512xf32> to vector<8x128xf32>
    %275 = math.tanh %274 : vector<8x128xf32>
    %276 = vector.extract_strided_slice %273 {offsets = [0, 0], sizes = [8, 128], strides = [1, 1]} : vector<8x384xf32> to vector<8x128xf32>
    %277 = vector.extract_strided_slice %273 {offsets = [0, 128], sizes = [8, 128], strides = [1, 1]} : vector<8x384xf32> to vector<8x128xf32>
    %278 = vector.extract_strided_slice %273 {offsets = [0, 256], sizes = [8, 128], strides = [1, 1]} : vector<8x384xf32> to vector<8x128xf32>
    %279 = arith.mulf %277, %237 : vector<8x128xf32>
    %280 = arith.mulf %276, %275 : vector<8x128xf32>
    %281 = arith.addf %279, %280 : vector<8x128xf32>
    %282 = math.tanh %281 : vector<8x128xf32>
    %283 = arith.mulf %278, %282 : vector<8x128xf32>
    %c6_i32 = arith.constant 6 : i32
    %284 = arith.index_cast %c6_i32 : i32 to index
    %c0_61 = arith.constant 0 : index
    %c0_62 = arith.constant 0 : index
    %285 = vector.load %arg9[%284, %c0_61, %c0_62] : memref<8x8x512xf32, #tpu.memory_space<vmem>>, vector<1x8x512xf32>
    %286 = vector.shape_cast %285 : vector<1x8x512xf32> to vector<8x512xf32>
    %287 = arith.truncf %261 : vector<8x128xf32> to vector<8x128xbf16>
    %cst_63 = arith.constant dense<0.000000e+00> : vector<8x512xf32>
    %288 = tpu.matmul %287, %3, %cst_63 {dimension_numbers = #tpu.dot_dimension_numbers<[1], [0], [0], [1], [0, 0, 1, 1], [], []>} : vector<8x128xbf16>, vector<128x512xbf16>, vector<8x512xf32> -> vector<8x512xf32>
    %289 = arith.addf %286, %288 : vector<8x512xf32>
    %290 = vector.extract_strided_slice %289 {offsets = [0, 0], sizes = [8, 384], strides = [1, 1]} : vector<8x512xf32> to vector<8x384xf32>
    %291 = arith.negf %290 : vector<8x384xf32>
    %292 = math.exp %291 : vector<8x384xf32>
    %cst_64 = arith.constant 1.000000e+00 : f32
    %293 = vector.broadcast %cst_64 : f32 to vector<8x384xf32>
    %294 = arith.addf %293, %292 : vector<8x384xf32>
    %295 = arith.divf %293, %294 : vector<8x384xf32>
    %296 = vector.extract_strided_slice %289 {offsets = [0, 384], sizes = [8, 128], strides = [1, 1]} : vector<8x512xf32> to vector<8x128xf32>
    %297 = math.tanh %296 : vector<8x128xf32>
    %298 = vector.extract_strided_slice %295 {offsets = [0, 0], sizes = [8, 128], strides = [1, 1]} : vector<8x384xf32> to vector<8x128xf32>
    %299 = vector.extract_strided_slice %295 {offsets = [0, 128], sizes = [8, 128], strides = [1, 1]} : vector<8x384xf32> to vector<8x128xf32>
    %300 = vector.extract_strided_slice %295 {offsets = [0, 256], sizes = [8, 128], strides = [1, 1]} : vector<8x384xf32> to vector<8x128xf32>
    %301 = arith.mulf %299, %259 : vector<8x128xf32>
    %302 = arith.mulf %298, %297 : vector<8x128xf32>
    %303 = arith.addf %301, %302 : vector<8x128xf32>
    %304 = math.tanh %303 : vector<8x128xf32>
    %305 = arith.mulf %300, %304 : vector<8x128xf32>
    %306 = arith.truncf %305 : vector<8x128xf32> to vector<8x128xbf16>
    %307 = arith.truncf %283 : vector<8x128xf32> to vector<8x128xbf16>
    %308 = tpu.concatenate %306, %307 in 1 : vector<8x128xbf16>, vector<8x128xbf16> -> vector<8x256xbf16>
    %cst_65 = arith.constant dense<0.000000e+00> : vector<8x512xf32>
    %309 = tpu.matmul %308, %4, %cst_65 {dimension_numbers = #tpu.dot_dimension_numbers<[1], [0], [0], [1], [0, 0, 1, 1], [], []>} : vector<8x256xbf16>, vector<256x512xbf16>, vector<8x512xf32> -> vector<8x512xf32>
    %310 = vector.broadcast %5 : vector<1x512xf32> to vector<8x512xf32>
    %311 = arith.addf %309, %310 : vector<8x512xf32>
    %312 = vector.extract_strided_slice %311 {offsets = [0, 0], sizes = [8, 384], strides = [1, 1]} : vector<8x512xf32> to vector<8x384xf32>
    %313 = arith.negf %312 : vector<8x384xf32>
    %314 = math.exp %313 : vector<8x384xf32>
    %cst_66 = arith.constant 1.000000e+00 : f32
    %315 = vector.broadcast %cst_66 : f32 to vector<8x384xf32>
    %316 = arith.addf %315, %314 : vector<8x384xf32>
    %317 = arith.divf %315, %316 : vector<8x384xf32>
    %318 = vector.extract_strided_slice %311 {offsets = [0, 384], sizes = [8, 128], strides = [1, 1]} : vector<8x512xf32> to vector<8x128xf32>
    %319 = math.tanh %318 : vector<8x128xf32>
    %320 = vector.extract_strided_slice %317 {offsets = [0, 0], sizes = [8, 128], strides = [1, 1]} : vector<8x384xf32> to vector<8x128xf32>
    %321 = vector.extract_strided_slice %317 {offsets = [0, 128], sizes = [8, 128], strides = [1, 1]} : vector<8x384xf32> to vector<8x128xf32>
    %322 = vector.extract_strided_slice %317 {offsets = [0, 256], sizes = [8, 128], strides = [1, 1]} : vector<8x384xf32> to vector<8x128xf32>
    %323 = arith.mulf %321, %281 : vector<8x128xf32>
    %324 = arith.mulf %320, %319 : vector<8x128xf32>
    %325 = arith.addf %323, %324 : vector<8x128xf32>
    %326 = math.tanh %325 : vector<8x128xf32>
    %327 = arith.mulf %322, %326 : vector<8x128xf32>
    %c7_i32 = arith.constant 7 : i32
    %328 = arith.index_cast %c7_i32 : i32 to index
    %c0_67 = arith.constant 0 : index
    %c0_68 = arith.constant 0 : index
    %329 = vector.load %arg9[%328, %c0_67, %c0_68] : memref<8x8x512xf32, #tpu.memory_space<vmem>>, vector<1x8x512xf32>
    %330 = vector.shape_cast %329 : vector<1x8x512xf32> to vector<8x512xf32>
    %331 = arith.truncf %305 : vector<8x128xf32> to vector<8x128xbf16>
    %cst_69 = arith.constant dense<0.000000e+00> : vector<8x512xf32>
    %332 = tpu.matmul %331, %3, %cst_69 {dimension_numbers = #tpu.dot_dimension_numbers<[1], [0], [0], [1], [0, 0, 1, 1], [], []>} : vector<8x128xbf16>, vector<128x512xbf16>, vector<8x512xf32> -> vector<8x512xf32>
    %333 = arith.addf %330, %332 : vector<8x512xf32>
    %334 = vector.extract_strided_slice %333 {offsets = [0, 0], sizes = [8, 384], strides = [1, 1]} : vector<8x512xf32> to vector<8x384xf32>
    %335 = arith.negf %334 : vector<8x384xf32>
    %336 = math.exp %335 : vector<8x384xf32>
    %cst_70 = arith.constant 1.000000e+00 : f32
    %337 = vector.broadcast %cst_70 : f32 to vector<8x384xf32>
    %338 = arith.addf %337, %336 : vector<8x384xf32>
    %339 = arith.divf %337, %338 : vector<8x384xf32>
    %340 = vector.extract_strided_slice %333 {offsets = [0, 384], sizes = [8, 128], strides = [1, 1]} : vector<8x512xf32> to vector<8x128xf32>
    %341 = math.tanh %340 : vector<8x128xf32>
    %342 = vector.extract_strided_slice %339 {offsets = [0, 0], sizes = [8, 128], strides = [1, 1]} : vector<8x384xf32> to vector<8x128xf32>
    %343 = vector.extract_strided_slice %339 {offsets = [0, 128], sizes = [8, 128], strides = [1, 1]} : vector<8x384xf32> to vector<8x128xf32>
    %344 = vector.extract_strided_slice %339 {offsets = [0, 256], sizes = [8, 128], strides = [1, 1]} : vector<8x384xf32> to vector<8x128xf32>
    %345 = arith.mulf %343, %303 : vector<8x128xf32>
    %346 = arith.mulf %342, %341 : vector<8x128xf32>
    %347 = arith.addf %345, %346 : vector<8x128xf32>
    %348 = math.tanh %347 : vector<8x128xf32>
    %349 = arith.mulf %344, %348 : vector<8x128xf32>
    %350 = arith.truncf %349 : vector<8x128xf32> to vector<8x128xbf16>
    %351 = arith.truncf %327 : vector<8x128xf32> to vector<8x128xbf16>
    %352 = tpu.concatenate %350, %351 in 1 : vector<8x128xbf16>, vector<8x128xbf16> -> vector<8x256xbf16>
    %cst_71 = arith.constant dense<0.000000e+00> : vector<8x512xf32>
    %353 = tpu.matmul %352, %4, %cst_71 {dimension_numbers = #tpu.dot_dimension_numbers<[1], [0], [0], [1], [0, 0, 1, 1], [], []>} : vector<8x256xbf16>, vector<256x512xbf16>, vector<8x512xf32> -> vector<8x512xf32>
    %354 = vector.broadcast %5 : vector<1x512xf32> to vector<8x512xf32>
    %355 = arith.addf %353, %354 : vector<8x512xf32>
    %356 = vector.extract_strided_slice %355 {offsets = [0, 0], sizes = [8, 384], strides = [1, 1]} : vector<8x512xf32> to vector<8x384xf32>
    %357 = arith.negf %356 : vector<8x384xf32>
    %358 = math.exp %357 : vector<8x384xf32>
    %cst_72 = arith.constant 1.000000e+00 : f32
    %359 = vector.broadcast %cst_72 : f32 to vector<8x384xf32>
    %360 = arith.addf %359, %358 : vector<8x384xf32>
    %361 = arith.divf %359, %360 : vector<8x384xf32>
    %362 = vector.extract_strided_slice %355 {offsets = [0, 384], sizes = [8, 128], strides = [1, 1]} : vector<8x512xf32> to vector<8x128xf32>
    %363 = math.tanh %362 : vector<8x128xf32>
    %364 = vector.extract_strided_slice %361 {offsets = [0, 0], sizes = [8, 128], strides = [1, 1]} : vector<8x384xf32> to vector<8x128xf32>
    %365 = vector.extract_strided_slice %361 {offsets = [0, 128], sizes = [8, 128], strides = [1, 1]} : vector<8x384xf32> to vector<8x128xf32>
    %366 = vector.extract_strided_slice %361 {offsets = [0, 256], sizes = [8, 128], strides = [1, 1]} : vector<8x384xf32> to vector<8x128xf32>
    %367 = arith.mulf %365, %325 : vector<8x128xf32>
    %368 = arith.mulf %364, %363 : vector<8x128xf32>
    %369 = arith.addf %367, %368 : vector<8x128xf32>
    %370 = math.tanh %369 : vector<8x128xf32>
    %371 = arith.mulf %366, %370 : vector<8x128xf32>
    %c8_i32 = arith.constant 8 : i32
    %c0_73 = arith.constant 0 : index
    %c0_74 = arith.constant 0 : index
    %372 = vector.load %arg10[%c0_73, %c0_74] : memref<8x128xf32, #tpu.memory_space<vmem>>, vector<8x128xf32>
    tpu.vector_store %arg10[%c0_73, %c0_74], %349 {strides = array<i32>} : memref<8x128xf32, #tpu.memory_space<vmem>>, vector<8x128xf32>,
    %c0_75 = arith.constant 0 : index
    %c0_76 = arith.constant 0 : index
    %373 = vector.load %arg11[%c0_75, %c0_76] : memref<8x128xf32, #tpu.memory_space<vmem>>, vector<8x128xf32>
    tpu.vector_store %arg11[%c0_75, %c0_76], %347 {strides = array<i32>} : memref<8x128xf32, #tpu.memory_space<vmem>>, vector<8x128xf32>,
    %c0_77 = arith.constant 0 : index
    %c0_78 = arith.constant 0 : index
    %374 = vector.load %arg12[%c0_77, %c0_78] : memref<8x128xf32, #tpu.memory_space<vmem>>, vector<8x128xf32>
    tpu.vector_store %arg12[%c0_77, %c0_78], %371 {strides = array<i32>} : memref<8x128xf32, #tpu.memory_space<vmem>>, vector<8x128xf32>,
    %c0_79 = arith.constant 0 : index
    %c0_80 = arith.constant 0 : index
    %375 = vector.load %arg13[%c0_79, %c0_80] : memref<8x128xf32, #tpu.memory_space<vmem>>, vector<8x128xf32>
    tpu.vector_store %arg13[%c0_79, %c0_80], %369 {strides = array<i32>} : memref<8x128xf32, #tpu.memory_space<vmem>>, vector<8x128xf32>,
    %c0_i32_81 = arith.constant 0 : i32
    %376 = arith.cmpi eq, %arg1, %c0_i32_81 : i32
    %377 = arith.extui %376 : i1 to i32
    %c0_i32_82 = arith.constant 0 : i32
    %378 = arith.cmpi ne, %377, %c0_i32_82 : i32
    scf.if %378 {
      %c0_83 = arith.constant 0 : index
      %c0_84 = arith.constant 0 : index
      %379 = vector.load %arg8[%c0_83, %c0_84] : memref<8x128xf32, #tpu.memory_space<vmem>>, vector<8x128xf32>
      tpu.vector_store %arg8[%c0_83, %c0_84], %371 {strides = array<i32>} : memref<8x128xf32, #tpu.memory_space<vmem>>, vector<8x128xf32>,
    } else {
    }
    return
  }
  func.func @transform_0(%arg0: i32, %arg1: i32) -> (i32, i32, i32) {
    %c0_i32 = arith.constant 0 : i32
    %c0_i32_0 = arith.constant 0 : i32
    return %arg1, %arg0, %c0_i32 : i32, i32, i32
  }
  func.func @transform_1(%arg0: i32, %arg1: i32) -> (i32, i32) {
    %c0_i32 = arith.constant 0 : i32
    %c0_i32_0 = arith.constant 0 : i32
    %c0_i32_1 = arith.constant 0 : i32
    return %c0_i32, %c0_i32_0 : i32, i32
  }
  func.func @transform_2(%arg0: i32, %arg1: i32) -> (i32, i32) {
    %c0_i32 = arith.constant 0 : i32
    %c0_i32_0 = arith.constant 0 : i32
    %c0_i32_1 = arith.constant 0 : i32
    return %c0_i32, %c0_i32_0 : i32, i32
  }
  func.func @transform_3(%arg0: i32, %arg1: i32) -> (i32, i32) {
    %c0_i32 = arith.constant 0 : i32
    %c0_i32_0 = arith.constant 0 : i32
    %c0_i32_1 = arith.constant 0 : i32
    return %c0_i32, %c0_i32_0 : i32, i32
  }
  func.func @transform_4(%arg0: i32, %arg1: i32) -> (i32, i32) {
    %c0_i32 = arith.constant 0 : i32
    %c0_i32_0 = arith.constant 0 : i32
    %c0_i32_1 = arith.constant 0 : i32
    return %c0_i32, %c0_i32_0 : i32, i32
  }
  func.func @transform_5(%arg0: i32, %arg1: i32) -> (i32, i32) {
    %c0_i32 = arith.constant 0 : i32
    %c0_i32_0 = arith.constant 0 : i32
    %c0_i32_1 = arith.constant 0 : i32
    return %c0_i32, %c0_i32_0 : i32, i32
  }
  func.func @transform_6(%arg0: i32, %arg1: i32) -> (i32, i32) {
    %c0_i32 = arith.constant 0 : i32
    %c0_i32_0 = arith.constant 0 : i32
    return %arg0, %c0_i32 : i32, i32
  }
}

</mosaic_0001>

<bundles_post_ra>
// kernel: lstm_encoder_forward.1
= control target key start
LH: loop header
LB: loop body
LE: loop exit
PB: predicated region body
PF: predicated region fallthrough
CT: control target
= control target key end

     0   :  { %vm188_vm0 = vcmask 1043456   ;;  %v5999_v2 = vmov 0   ;;  %vm175_vm1 = vcmask 64512   ;;  %v3437_v53 = vmov 0.0|0.0   ;;  %s5992_s1 = inlined_call_operand.vmem [shape: bf16[8,512], index: 1, kind: input, shape index: {}]   ;;  %s5993_s0 = inlined_call_operand.vmem [shape: f32[8,8,8], index: 0, kind: input, shape index: {}]   ;;  %s5994_s2 = inlined_call_operand.vmem [shape: bf16[128,512], index: 2, kind: input, shape index: {}]   ;;  %s5995_s4 = inlined_call_operand.vmem [shape: bf16[256,512], index: 4, kind: input, shape index: {}]   ;;  %s5996_s3 = inlined_call_operand.vmem [shape: f32[1,512], index: 3, kind: input, shape index: {}]   ;;  %s5997_s5 = inlined_call_operand.vmem [shape: f32[1,512], index: 5, kind: input, shape index: {}]   ;;  %s5998_s6 = inlined_call_operand.vmem [shape: f32[8,128], index: 6, kind: output, shape index: {}]  }
   0x1   :  { %v141_v0 = vld [vmem:[%s5992_s1] sm:$0xff]  ;;  %v142_v1 = vld [vmem:[%s5992_s1 + $0x8] sm:$0xff]  ;;  %233 = vmatprep.mubr.bf16.mxu0 %v5999_v2  ;;  %306 = vmatprep.mubr.bf16.mxu1 %v5999_v2  ;;  %v131_v20 = vld [vmem:[%s5993_s0 + $0x10] sm:$0xff] }
   0x2   :  { %v129_v3 = vld [vmem:[%s5993_s0] sm:$0xff]  ;;  %v2681_v4 = vcombine.high %v141_v0, %v141_v0  ;;  %v2683_v5 = vcombine.high %v142_v1, %v142_v1  ;;  %v2680_v6 = vcombine.low %v141_v0, %v141_v0  ;;  %v2682_v7 = vcombine.low %v142_v1, %v142_v1  ;;  %v130_v8 = vld [vmem:[%s5993_s0 + $0x8] sm:$0xff]  ;;  %v132_v21 = vld [vmem:[%s5993_s0 + $0x18] sm:$0xff] }
   0x3   :  { %v3490_v9 = vld [vmem:[%s5994_s2 + $0x4] ss:$16 sps:$4 sm:$0xff]   ;;  %v137_v12 = vpack.c.bf16 %v130_v8, %v129_v3  ;;  %v3495_v13 = vld [vmem:[%s5994_s2 + $0xc] ss:$16 sps:$4 sm:$0xff]   ;;  %v3500_v14 = vld [vmem:[%s5994_s2] ss:$16 sps:$4 sm:$0xff]   ;;  %v138_v24 = vpack.c.bf16 %v132_v21, %v131_v20 }
   0x4   :  { %2684 = vmatprep.subr.msk.bf16.mxu0 %vm188_vm0, %v2681_v4  ;;  %2689 = vmatprep.subr.msk.bf16.mxu1 %vm188_vm0, %v2683_v5  ;;  %v190_v10 = vsel %vm188_vm0, %v2680_v6, 0  ;;  %v196_v11 = vsel %vm188_vm0, %v2682_v7, 0  ;;  %v3505_v15 = vld [vmem:[%s5994_s2 + $0x8] ss:$16 sps:$4 sm:$0xff]   ;;  %v3512_v16 = vld [vmem:[%s5994_s2 + $0x24] ss:$16 sps:$4 sm:$0xff]  }
   0x5   :  { %202 = vmatpush1.bf16.msra.mxu0 %v190_v10  ;;  %275 = vmatpush1.bf16.msra.mxu1 %v196_v11  ;;  %v3517_v17 = vld [vmem:[%s5994_s2 + $0x2c] ss:$16 sps:$4 sm:$0xff]   ;;  %v3522_v18 = vld [vmem:[%s5994_s2 + $0x20] ss:$16 sps:$4 sm:$0xff]   ;;  %v3529_v19 = vld [vmem:[%s5994_s2 + $0x28] ss:$16 sps:$4 sm:$0xff]  }
   0x6   :  { %548 = vmatprep.subr.bf16.mxu0 %v3490_v9  ;;  %589 = vmatprep.subr.bf16.mxu1 %v3495_v13  ;;  %v3544_v22 = vld [vmem:[%s5994_s2 + $0x44] ss:$16 sps:$4 sm:$0xff]   ;;  %v3549_v23 = vld [vmem:[%s5994_s2 + $0x4c] ss:$16 sps:$4 sm:$0xff]   ;;  %v3558_v25 = vld [vmem:[%s5994_s2 + $0x40] ss:$16 sps:$4 sm:$0xff]  }
   0x7   :  { %v3563_v26 = vld [vmem:[%s5994_s2 + $0x48] ss:$16 sps:$4 sm:$0xff]   ;;  %v3570_v27 = vld [vmem:[%s5994_s2 + $0x64] ss:$16 sps:$4 sm:$0xff]   ;;  %v3575_v28 = vld [vmem:[%s5994_s2 + $0x6c] ss:$16 sps:$4 sm:$0xff]  }
   0x8   :  { %2685 = vmatmul.mubr.msk.bf16.vlgmr.msra.gmra.mrb[0].mxu0 %vm175_vm1, %v137_v12  ;;  %2690 = vmatmul.mubr.msk.bf16.vlgmr.msra.gmra.mrb[0].mxu1 %vm175_vm1, %v137_v12  ;;  %v3580_v29 = vld [vmem:[%s5994_s2 + $0x60] ss:$16 sps:$4 sm:$0xff]   ;;  %v3585_v30 = vld [vmem:[%s5994_s2 + $0x68] ss:$16 sps:$4 sm:$0xff]   ;;  %v3600_v33 = vld [vmem:[%s5994_s2 + $0x84] ss:$16 sps:$4 sm:$0xff]  }
   0x9   :  { %549 = vmatpush1.bf16.msra.mxu0 %v3500_v14  ;;  %590 = vmatpush1.bf16.msra.mxu1 %v3505_v15  ;;  %v133_v31 = vld [vmem:[%s5993_s0 + $0x20] sm:$0xff]  ;;  %v134_v32 = vld [vmem:[%s5993_s0 + $0x28] sm:$0xff]  ;;  %v135_v42 = vld [vmem:[%s5993_s0 + $0x30] sm:$0xff] }
   0xa   :  { %550 = vmatprep.subr.bf16.mxu0 %v3512_v16  ;;  %591 = vmatprep.subr.bf16.mxu1 %v3517_v17  ;;  %v3607_v34 = vld [vmem:[%s5994_s2 + $0x8c] ss:$16 sps:$4 sm:$0xff]   ;;  %v139_v35 = vpack.c.bf16 %v134_v32, %v133_v31  ;;  %v3614_v36 = vld [vmem:[%s5994_s2 + $0x80] ss:$16 sps:$4 sm:$0xff]   ;;  %v3621_v37 = vld [vmem:[%s5994_s2 + $0x88] ss:$16 sps:$4 sm:$0xff]  }
   0xb   :  { %243 = vmatprep.mubr.bf16.mxu0 %v5999_v2  ;;  %316 = vmatprep.mubr.bf16.mxu1 %v5999_v2  ;;  %v3628_v38 = vld [vmem:[%s5994_s2 + $0xa4] ss:$16 sps:$4 sm:$0xff]   ;;  %v3633_v39 = vld [vmem:[%s5994_s2 + $0xac] ss:$16 sps:$4 sm:$0xff]   ;;  %v3640_v40 = vld [vmem:[%s5994_s2 + $0xa0] ss:$16 sps:$4 sm:$0xff]  }
   0xc   :  { %v3647_v41 = vld [vmem:[%s5994_s2 + $0xa8] ss:$16 sps:$4 sm:$0xff]   ;;  %v3660_v44 = vld [vmem:[%s5994_s2 + $0xc4] ss:$16 sps:$4 sm:$0xff]   ;;  %v3665_v45 = vld [vmem:[%s5994_s2 + $0xcc] ss:$16 sps:$4 sm:$0xff]  }
   0xd   :  { %551 = vmatpush1.bf16.msra.mxu0 %v3522_v18  ;;  %592 = vmatpush1.bf16.msra.mxu1 %v3529_v19  ;;  %v136_v43 = vld [vmem:[%s5993_s0 + $0x38] sm:$0xff]  ;;  %v3674_v47 = vld [vmem:[%s5994_s2 + $0xc0] ss:$16 sps:$4 sm:$0xff]   ;;  %v3686_v49 = vld [vmem:[%s5994_s2 + $0xe4] ss:$16 sps:$4 sm:$0xff]  }
   0xe   :  { %552 = vmatprep.subr.bf16.mxu0 %v3544_v22  ;;  %593 = vmatprep.subr.bf16.mxu1 %v3549_v23  ;;  %v140_v46 = vpack.c.bf16 %v136_v43, %v135_v42  ;;  %v3679_v48 = vld [vmem:[%s5994_s2 + $0xc8] ss:$16 sps:$4 sm:$0xff]   ;;  %v3691_v50 = vld [vmem:[%s5994_s2 + $0xec] ss:$16 sps:$4 sm:$0xff]   ;;  %v3700_v51 = vld [vmem:[%s5994_s2 + $0xe0] ss:$16 sps:$4 sm:$0xff]  }
   0xf   :  { %v3705_v52 = vld [vmem:[%s5994_s2 + $0xe8] ss:$16 sps:$4 sm:$0xff]   ;;  %v3716_v54 = vld [vmem:[%s5995_s4 + $0x4] ss:$16 sps:$4 sm:$0xff]   ;;  %v3721_v55 = vld [vmem:[%s5995_s4 + $0xc] ss:$16 sps:$4 sm:$0xff]  }
  0x10   :  { %2686 = vmatmul.mubr.msk.bf16.gmra.mrb[4].mxu0 %vm175_vm1, %v138_v24  ;;  %2691 = vmatmul.mubr.msk.bf16.gmra.mrb[4].mxu1 %vm175_vm1, %v138_v24  ;;  %v3727_v56 = vld [vmem:[%s5995_s4] ss:$16 sps:$4 sm:$0xff]   ;;  %v3732_v57 = vld [vmem:[%s5995_s4 + $0x8] ss:$16 sps:$4 sm:$0xff]   ;;  %v3740_v58 = vld [vmem:[%s5995_s4 + $0x24] ss:$16 sps:$4 sm:$0xff]  }
  0x11   :  { %553 = vmatpush1.bf16.msra.mxu0 %v3558_v25  ;;  %594 = vmatpush1.bf16.msra.mxu1 %v3563_v26  ;;  %v3745_v59 = vld [vmem:[%s5995_s4 + $0x2c] ss:$16 sps:$4 sm:$0xff]   ;;  %v3750_v60 = vld [vmem:[%s5995_s4 + $0x20] ss:$16 sps:$4 sm:$0xff]   ;;  %v3755_v61 = vld [vmem:[%s5995_s4 + $0x28] ss:$16 sps:$4 sm:$0xff]  }
  0x12   :  { %554 = vmatprep.subr.bf16.mxu0 %v3570_v27  ;;  %595 = vmatprep.subr.bf16.mxu1 %v3575_v28  ;;  %v3764_v62 = vld [vmem:[%s5995_s4 + $0x44] ss:$16 sps:$4 sm:$0xff]   ;;  %v3769_v63 = vld [vmem:[%s5995_s4 + $0x4c] ss:$16 sps:$4 sm:$0xff]   ;;  %v3774_v0 = vld [vmem:[%s5995_s4 + $0x40] ss:$16 sps:$4 sm:$0xff]  }
  0x13   :  { %253 = vmatprep.mubr.bf16.mxu0 %v5999_v2  ;;  %326 = vmatprep.mubr.bf16.mxu1 %v5999_v2  ;;  %6373 = vst [vmem:[#allocation7_spill] sm:$0xff] %v3769_v63  ;;  %6374 = vst [vmem:[#allocation8_spill] sm:$0xff] %v3774_v0  ;;  %v3779_v1 = vld [vmem:[%s5995_s4 + $0x48] ss:$16 sps:$4 sm:$0xff]   ;;  %v3788_v3 = vld [vmem:[%s5995_s4 + $0x64] ss:$16 sps:$4 sm:$0xff]  }
  0x14   :  { %6375 = vst [vmem:[#allocation9_spill] sm:$0xff] %v3779_v1  ;;  %6376 = vst [vmem:[#allocation10_spill] sm:$0xff] %v3788_v3  ;;  %v3793_v4 = vld [vmem:[%s5995_s4 + $0x6c] ss:$16 sps:$4 sm:$0xff]   ;;  %v3798_v5 = vld [vmem:[%s5995_s4 + $0x60] ss:$16 sps:$4 sm:$0xff]  }
  0x15   :  { %555 = vmatpush1.bf16.msra.mxu0 %v3580_v29  ;;  %596 = vmatpush1.bf16.msra.mxu1 %v3585_v30  ;;  %6377 = vst [vmem:[#allocation11_spill] sm:$0xff] %v3793_v4  ;;  %6378 = vst [vmem:[#allocation12_spill] sm:$0xff] %v3798_v5  ;;  %v3803_v6 = vld [vmem:[%s5995_s4 + $0x68] ss:$16 sps:$4 sm:$0xff]   ;;  %v3812_v7 = vld [vmem:[%s5995_s4 + $0x84] ss:$16 sps:$4 sm:$0xff]  }
  0x16   :  { %556 = vmatprep.subr.bf16.mxu0 %v3600_v33  ;;  %597 = vmatprep.subr.bf16.mxu1 %v3607_v34  ;;  %6379 = vst [vmem:[#allocation13_spill] sm:$0xff] %v3803_v6  ;;  %6380 = vst [vmem:[#allocation14_spill] sm:$0xff] %v3812_v7  ;;  %v3817_v8 = vld [vmem:[%s5995_s4 + $0x8c] ss:$16 sps:$4 sm:$0xff]   ;;  %v3822_v10 = vld [vmem:[%s5995_s4 + $0x80] ss:$16 sps:$4 sm:$0xff]  }
  0x17   :  { %6381 = vst [vmem:[#allocation15_spill] sm:$0xff] %v3817_v8  ;;  %6382 = vst [vmem:[#allocation16_spill] sm:$0xff] %v3822_v10  ;;  %v3827_v11 = vld [vmem:[%s5995_s4 + $0x88] ss:$16 sps:$4 sm:$0xff]   ;;  %v3836_v12 = vld [vmem:[%s5995_s4 + $0xa4] ss:$16 sps:$4 sm:$0xff]  }
  0x18   :  { %2687 = vmatmul.mubr.msk.bf16.gmra.mrb[8].mxu0 %vm175_vm1, %v139_v35  ;;  %2692 = vmatmul.mubr.msk.bf16.gmra.mrb[8].mxu1 %vm175_vm1, %v139_v35  ;;  %6383 = vst [vmem:[#allocation17_spill] sm:$0xff] %v3827_v11  ;;  %6384 = vst [vmem:[#allocation18_spill] sm:$0xff] %v3836_v12  ;;  %v3841_v20 = vld [vmem:[%s5995_s4 + $0xac] ss:$16 sps:$4 sm:$0xff]   ;;  %v3846_v21 = vld [vmem:[%s5995_s4 + $0xa0] ss:$16 sps:$4 sm:$0xff]  }
  0x19   :  { %557 = vmatpush1.bf16.msra.mxu0 %v3614_v36  ;;  %598 = vmatpush1.bf16.msra.mxu1 %v3621_v37  ;;  %6385 = vst [vmem:[#allocation19_spill] sm:$0xff] %v3841_v20  ;;  %6386 = vst [vmem:[#allocation20_spill] sm:$0xff] %v3846_v21  ;;  %v3851_v24 = vld [vmem:[%s5995_s4 + $0xa8] ss:$16 sps:$4 sm:$0xff]   ;;  %v3860_v31 = vld [vmem:[%s5995_s4 + $0xc4] ss:$16 sps:$4 sm:$0xff]  }
  0x1a   :  { %558 = vmatprep.subr.bf16.mxu0 %v3628_v38  ;;  %599 = vmatprep.subr.bf16.mxu1 %v3633_v39  ;;  %6387 = vst [vmem:[#allocation21_spill] sm:$0xff] %v3851_v24  ;;  %6388 = vst [vmem:[#allocation22_spill] sm:$0xff] %v3860_v31  ;;  %v3865_v32 = vld [vmem:[%s5995_s4 + $0xcc] ss:$16 sps:$4 sm:$0xff]   ;;  %v3870_v35 = vld [vmem:[%s5995_s4 + $0xc0] ss:$16 sps:$4 sm:$0xff]  }
  0x1b   :  { %263 = vmatprep.mubr.bf16.mxu0 %v5999_v2  ;;  %336 = vmatprep.mubr.bf16.mxu1 %v5999_v2  ;;  %6389 = vst [vmem:[#allocation23_spill] sm:$0xff] %v3865_v32  ;;  %6390 = vst [vmem:[#allocation24_spill] sm:$0xff] %v3870_v35  ;;  %v3875_v42 = vld [vmem:[%s5995_s4 + $0xc8] ss:$16 sps:$4 sm:$0xff]   ;;  %v3884_v43 = vld [vmem:[%s5995_s4 + $0xe4] ss:$16 sps:$4 sm:$0xff]  }
  0x1c   :  { %6391 = vst [vmem:[#allocation25_spill] sm:$0xff] %v3875_v42  ;;  %6392 = vst [vmem:[#allocation26_spill] sm:$0xff] %v3884_v43 }
  0x1d   :  { %559 = vmatpush1.bf16.msra.mxu0 %v3640_v40  ;;  %600 = vmatpush1.bf16.msra.mxu1 %v3647_v41 }
  0x1e   :  { %560 = vmatprep.subr.bf16.mxu0 %v3660_v44  ;;  %601 = vmatprep.subr.bf16.mxu1 %v3665_v45 }
  0x20   :  { %2688 = vmatmul.mubr.msk.bf16.gmra.mrb[12].mxu0 %vm175_vm1, %v140_v46  ;;  %2693 = vmatmul.mubr.msk.bf16.gmra.mrb[12].mxu1 %vm175_vm1, %v140_v46  ;;  %v3889_v46 = vld [vmem:[%s5995_s4 + $0xec] ss:$16 sps:$4 sm:$0xff]  }
  0x21   :  { %561 = vmatpush1.bf16.msra.mxu0 %v3674_v47  ;;  %602 = vmatpush1.bf16.msra.mxu1 %v3679_v48  ;;  %6393 = vst [vmem:[#allocation27_spill] sm:$0xff] %v3889_v46 }
  0x22   :  { %562 = vmatprep.subr.bf16.mxu0 %v3686_v49  ;;  %603 = vmatprep.subr.bf16.mxu1 %v3691_v50 }
  0x23   :  { %580 = vmatprep.mubr.bf16.mxu0 %v5999_v2  ;;  %621 = vmatprep.mubr.bf16.mxu1 %v5999_v2  ;;  %v3899_v2 = vld [vmem:[%s5995_s4 + $0xe8] ss:$16 sps:$4 sm:$0xff]  }
  0x24   :  { %6395 = vst [vmem:[#allocation29_spill] sm:$0xff] %v3899_v2 }
  0x25   :  { %563 = vmatpush1.bf16.msra.mxu0 %v3700_v51  ;;  %604 = vmatpush1.bf16.msra.mxu1 %v3705_v52 }
  0x26   :  { %1001 = vmatprep.subr.bf16.mxu0 %v3716_v54  ;;  %1042 = vmatprep.subr.bf16.mxu1 %v3721_v55 }
  0x28   :  { %581 = vmatmul.mubr.bf16.vlgmr.msra.gmra.mrb[16].mxu0 %v3437_v53  ;;  %622 = vmatmul.mubr.bf16.vlgmr.msra.gmra.mrb[16].mxu1 %v3437_v53 }
  0x29   :  { %1033 = vmatprep.mubr.bf16.mxu0 %v3437_v53  ;;  %1074 = vmatprep.mubr.bf16.mxu1 %v3437_v53  ;;  %v3894_v53 = vld [vmem:[%s5995_s4 + $0xe0] ss:$16 sps:$4 sm:$0xff]  }
  0x2a   :  { %1002 = vmatpush1.bf16.msra.mxu0 %v3727_v56  ;;  %1043 = vmatpush1.bf16.msra.mxu1 %v3732_v57  ;;  %6394 = vst [vmem:[#allocation28_spill] sm:$0xff] %v3894_v53 }
  0x2b   :  { %1003 = vmatprep.subr.bf16.mxu0 %v3740_v58  ;;  %1044 = vmatprep.subr.bf16.mxu1 %v3745_v59 }
  0x2e   :  { %1004 = vmatpush1.bf16.msra.mxu0 %v3750_v60  ;;  %1045 = vmatpush1.bf16.msra.mxu1 %v3755_v61 }
  0x2f   :  { %1005 = vmatprep.subr.bf16.mxu0 %v3764_v62  ;;  %1046 = vmatprep.subr.bf16.mxu1 %v3769_v63 }
  0x32   :  { %1006 = vmatpush1.bf16.msra.mxu0 %v3774_v0  ;;  %1047 = vmatpush1.bf16.msra.mxu1 %v3779_v1 }
  0x33   :  { %1007 = vmatprep.subr.bf16.mxu0 %v3788_v3  ;;  %1048 = vmatprep.subr.bf16.mxu1 %v3793_v4 }
  0x36   :  { %1008 = vmatpush1.bf16.msra.mxu0 %v3798_v5  ;;  %1049 = vmatpush1.bf16.msra.mxu1 %v3803_v6 }
  0x37   :  { %1009 = vmatprep.subr.bf16.mxu0 %v3812_v7  ;;  %1050 = vmatprep.subr.bf16.mxu1 %v3817_v8 }
  0x3a   :  { %1010 = vmatpush1.bf16.msra.mxu0 %v3822_v10  ;;  %1051 = vmatpush1.bf16.msra.mxu1 %v3827_v11 }
  0x3b   :  { %1011 = vmatprep.subr.bf16.mxu0 %v3836_v12  ;;  %1052 = vmatprep.subr.bf16.mxu1 %v3841_v20 }
  0x3e   :  { %1012 = vmatpush1.bf16.msra.mxu0 %v3846_v21  ;;  %1053 = vmatpush1.bf16.msra.mxu1 %v3851_v24 }
  0x3f   :  { %1013 = vmatprep.subr.bf16.mxu0 %v3860_v31  ;;  %1054 = vmatprep.subr.bf16.mxu1 %v3865_v32  ;;  %v4062_v32 = vld [vmem:[%s5995_s4 + $0x1c0] ss:$16 sps:$4 sm:$0xff]   ;;  %v4067_v31 = vld [vmem:[%s5995_s4 + $0x1c8] ss:$16 sps:$4 sm:$0xff]  }
  0x40   :  { %6422 = vst [vmem:[#allocation56_spill] sm:$0xff] %v4062_v32  ;;  %6423 = vst [vmem:[#allocation57_spill] sm:$0xff] %v4067_v31 }
  0x42   :  { %1014 = vmatpush1.bf16.msra.mxu0 %v3870_v35  ;;  %1055 = vmatpush1.bf16.msra.mxu1 %v3875_v42  ;;  %v3908_v42 = vld [vmem:[%s5995_s4 + $0x104] ss:$16 sps:$4 sm:$0xff]   ;;  %v3913_v35 = vld [vmem:[%s5995_s4 + $0x10c] ss:$16 sps:$4 sm:$0xff]  }
  0x43   :  { %1015 = vmatprep.subr.bf16.mxu0 %v3884_v43  ;;  %1056 = vmatprep.subr.bf16.mxu1 %v3889_v46  ;;  %6396 = vst [vmem:[#allocation30_spill] sm:$0xff] %v3908_v42  ;;  %6397 = vst [vmem:[#allocation31_spill] sm:$0xff] %v3913_v35  ;;  %v3918_v43 = vld [vmem:[%s5995_s4 + $0x100] ss:$16 sps:$4 sm:$0xff]   ;;  %v3937_v46 = vld [vmem:[%s5995_s4 + $0x12c] ss:$16 sps:$4 sm:$0xff]  }
  0x44   :  { %6398 = vst [vmem:[#allocation32_spill] sm:$0xff] %v3918_v43  ;;  %6401 = vst [vmem:[#allocation35_spill] sm:$0xff] %v3937_v46 }
  0x46   :  { %1016 = vmatpush1.bf16.msra.mxu0 %v3894_v53  ;;  %1057 = vmatpush1.bf16.msra.mxu1 %v3899_v2  ;;  %v3923_v53 = vld [vmem:[%s5995_s4 + $0x108] ss:$16 sps:$4 sm:$0xff]   ;;  %v3932_v2 = vld [vmem:[%s5995_s4 + $0x124] ss:$16 sps:$4 sm:$0xff]  }
  0x47   :  { %6399 = vst [vmem:[#allocation33_spill] sm:$0xff] %v3923_v53  ;;  %1017 = vmatprep.subr.bf16.mxu0 %v3908_v42  ;;  %1058 = vmatprep.subr.bf16.mxu1 %v3913_v35  ;;  %6400 = vst [vmem:[#allocation34_spill] sm:$0xff] %v3932_v2  ;;  %v3942_v42 = vld [vmem:[%s5995_s4 + $0x120] ss:$16 sps:$4 sm:$0xff]   ;;  %v3961_v35 = vld [vmem:[%s5995_s4 + $0x14c] ss:$16 sps:$4 sm:$0xff]  }
  0x48   :  { %6402 = vst [vmem:[#allocation36_spill] sm:$0xff] %v3942_v42  ;;  %6405 = vst [vmem:[#allocation39_spill] sm:$0xff] %v3961_v35 }
  0x4a   :  { %1018 = vmatpush1.bf16.msra.mxu0 %v3918_v43  ;;  %1059 = vmatpush1.bf16.msra.mxu1 %v3923_v53  ;;  %v3947_v43 = vld [vmem:[%s5995_s4 + $0x128] ss:$16 sps:$4 sm:$0xff]   ;;  %v3956_v53 = vld [vmem:[%s5995_s4 + $0x144] ss:$16 sps:$4 sm:$0xff]  }
  0x4b   :  { %6403 = vst [vmem:[#allocation37_spill] sm:$0xff] %v3947_v43  ;;  %1019 = vmatprep.subr.bf16.mxu0 %v3932_v2  ;;  %1060 = vmatprep.subr.bf16.mxu1 %v3937_v46  ;;  %6404 = vst [vmem:[#allocation38_spill] sm:$0xff] %v3956_v53  ;;  %v3966_v2 = vld [vmem:[%s5995_s4 + $0x140] ss:$16 sps:$4 sm:$0xff]   ;;  %v3985_v46 = vld [vmem:[%s5995_s4 + $0x16c] ss:$16 sps:$4 sm:$0xff]  }
  0x4c   :  { %6406 = vst [vmem:[#allocation40_spill] sm:$0xff] %v3966_v2  ;;  %6409 = vst [vmem:[#allocation43_spill] sm:$0xff] %v3985_v46 }
  0x4e   :  { %1020 = vmatpush1.bf16.msra.mxu0 %v3942_v42  ;;  %1061 = vmatpush1.bf16.msra.mxu1 %v3947_v43  ;;  %v3971_v42 = vld [vmem:[%s5995_s4 + $0x148] ss:$16 sps:$4 sm:$0xff]   ;;  %v3980_v43 = vld [vmem:[%s5995_s4 + $0x164] ss:$16 sps:$4 sm:$0xff]  }
  0x4f   :  { %6407 = vst [vmem:[#allocation41_spill] sm:$0xff] %v3971_v42  ;;  %1021 = vmatprep.subr.bf16.mxu0 %v3956_v53  ;;  %1062 = vmatprep.subr.bf16.mxu1 %v3961_v35  ;;  %6408 = vst [vmem:[#allocation42_spill] sm:$0xff] %v3980_v43  ;;  %v3990_v53 = vld [vmem:[%s5995_s4 + $0x160] ss:$16 sps:$4 sm:$0xff]   ;;  %v4009_v35 = vld [vmem:[%s5995_s4 + $0x18c] ss:$16 sps:$4 sm:$0xff]  }
  0x50   :  { %6410 = vst [vmem:[#allocation44_spill] sm:$0xff] %v3990_v53  ;;  %6413 = vst [vmem:[#allocation47_spill] sm:$0xff] %v4009_v35 }
  0x52   :  { %1022 = vmatpush1.bf16.msra.mxu0 %v3966_v2  ;;  %1063 = vmatpush1.bf16.msra.mxu1 %v3971_v42  ;;  %v3995_v2 = vld [vmem:[%s5995_s4 + $0x168] ss:$16 sps:$4 sm:$0xff]   ;;  %v4004_v42 = vld [vmem:[%s5995_s4 + $0x184] ss:$16 sps:$4 sm:$0xff]  }
  0x53   :  { %6411 = vst [vmem:[#allocation45_spill] sm:$0xff] %v3995_v2  ;;  %1023 = vmatprep.subr.bf16.mxu0 %v3980_v43  ;;  %1064 = vmatprep.subr.bf16.mxu1 %v3985_v46  ;;  %6412 = vst [vmem:[#allocation46_spill] sm:$0xff] %v4004_v42  ;;  %v4014_v43 = vld [vmem:[%s5995_s4 + $0x180] ss:$16 sps:$4 sm:$0xff]   ;;  %v4033_v46 = vld [vmem:[%s5995_s4 + $0x1ac] ss:$16 sps:$4 sm:$0xff]  }
  0x54   :  { %6414 = vst [vmem:[#allocation48_spill] sm:$0xff] %v4014_v43  ;;  %6417 = vst [vmem:[#allocation51_spill] sm:$0xff] %v4033_v46 }
  0x56   :  { %1024 = vmatpush1.bf16.msra.mxu0 %v3990_v53  ;;  %1065 = vmatpush1.bf16.msra.mxu1 %v3995_v2  ;;  %v4019_v53 = vld [vmem:[%s5995_s4 + $0x188] ss:$16 sps:$4 sm:$0xff]   ;;  %v4028_v2 = vld [vmem:[%s5995_s4 + $0x1a4] ss:$16 sps:$4 sm:$0xff]  }
  0x57   :  { %6415 = vst [vmem:[#allocation49_spill] sm:$0xff] %v4019_v53  ;;  %1025 = vmatprep.subr.bf16.mxu0 %v4004_v42  ;;  %1066 = vmatprep.subr.bf16.mxu1 %v4009_v35  ;;  %6416 = vst [vmem:[#allocation50_spill] sm:$0xff] %v4028_v2  ;;  %v4038_v42 = vld [vmem:[%s5995_s4 + $0x1a0] ss:$16 sps:$4 sm:$0xff]   ;;  %v4053_v35 = vld [vmem:[%s5995_s4 + $0x1cc] ss:$16 sps:$4 sm:$0xff]  }
  0x58   :  { %6418 = vst [vmem:[#allocation52_spill] sm:$0xff] %v4038_v42  ;;  %6421 = vst [vmem:[#allocation55_spill] sm:$0xff] %v4053_v35 }
  0x5a   :  { %1026 = vmatpush1.bf16.msra.mxu0 %v4014_v43  ;;  %1067 = vmatpush1.bf16.msra.mxu1 %v4019_v53  ;;  %v4043_v43 = vld [vmem:[%s5995_s4 + $0x1a8] ss:$16 sps:$4 sm:$0xff]   ;;  %v4048_v53 = vld [vmem:[%s5995_s4 + $0x1c4] ss:$16 sps:$4 sm:$0xff]  }
  0x5b   :  { %6419 = vst [vmem:[#allocation53_spill] sm:$0xff] %v4043_v43  ;;  %6420 = vst [vmem:[#allocation54_spill] sm:$0xff] %v4048_v53  ;;  %1027 = vmatprep.subr.bf16.mxu0 %v4028_v2  ;;  %1068 = vmatprep.subr.bf16.mxu1 %v4033_v46 }
  0x5e   :  { %1028 = vmatpush1.bf16.msra.mxu0 %v4038_v42  ;;  %1069 = vmatpush1.bf16.msra.mxu1 %v4043_v43  ;;  %v4074_v42 = vld [vmem:[%s5995_s4 + $0x1e4] ss:$16 sps:$4 sm:$0xff]   ;;  %v4079_v43 = vld [vmem:[%s5995_s4 + $0x1ec] ss:$16 sps:$4 sm:$0xff]  }
  0x5f   :  { %1029 = vmatprep.subr.bf16.mxu0 %v4048_v53  ;;  %1070 = vmatprep.subr.bf16.mxu1 %v4053_v35  ;;  %6424 = vst [vmem:[#allocation58_spill] sm:$0xff] %v4074_v42  ;;  %6425 = vst [vmem:[#allocation59_spill] sm:$0xff] %v4079_v43  ;;  %v4086_v53 = vld [vmem:[%s5995_s4 + $0x1e0] ss:$16 sps:$4 sm:$0xff]   ;;  %v4091_v35 = vld [vmem:[%s5995_s4 + $0x1e8] ss:$16 sps:$4 sm:$0xff]  }
  0x60   :  { %6426 = vst [vmem:[#allocation60_spill] sm:$0xff] %v4086_v53  ;;  %6427 = vst [vmem:[#allocation61_spill] sm:$0xff] %v4091_v35 }
  0x62   :  { %1030 = vmatpush1.bf16.msra.mxu0 %v4062_v32  ;;  %1071 = vmatpush1.bf16.msra.mxu1 %v4067_v31  ;;  %v145_v31 = vlaneseq }
  0x63   :  { %1031 = vmatprep.subr.bf16.mxu0 %v4074_v42  ;;  %1072 = vmatprep.subr.bf16.mxu1 %v4079_v43  ;;  %v143_v43 = vld [vmem:[%s5996_s3] sm:$0xf] }
  0x64   :  { %v4099_v32 = vshrl.u32 %v145_v31, 7 }
  0x66   :  { %1032 = vmatpush1.bf16.msra.mxu0 %v4086_v53  ;;  %1073 = vmatpush1.bf16.msra.mxu1 %v4091_v35  ;;  %6428 = vst [vmem:[#allocation62_spill] sm:$0xff] %v4099_v32  ;;  %v6093_v46 = vsub.s32 2, %v4099_v32  ;;  %v6102_v2 = vsub.s32 3, %v4099_v32  ;;  %v6103_v24 = vsub.s32 0, %v4099_v32  ;;  %v6110_v53 = vsub.s32 1, %v4099_v32 }
  0x67   :  { %1112 = vmatprep.subr.bf16.mxu0 %v3490_v9  ;;  %1153 = vmatprep.subr.bf16.mxu1 %v3495_v13 }
  0x68   :  { %v4110_v9 = vrot.slane %v143_v43, %v6093_v46  ;;  %v4118_v35 = vrot.slane %v143_v43, %v6102_v2  ;;  %v148_v42 = vrot.slane %v143_v43, %v6103_v24  ;;  %v152_v12 = vrot.slane %v143_v43, %v6110_v53 }
  0xdb   :  { %v4112_v13 = vpop.f32.mrb[0].mxu0  ;;  %v4114_v31 = vpop.f32.mrb[0].mxu1 }
  0xdc   :  { %v237_v21 = vpop.f32.mrb[1].mxu0  ;;  %v310_v20 = vpop.f32.mrb[1].mxu1 }
  0xdd   :  { %v239_v11 = vpop.f32.mrb[2].mxu0  ;;  %v312_v10 = vpop.f32.mrb[2].mxu1 }
  0xde   :  { %v4124_v46 = vadd.f32 %v239_v11, %v148_v42  ;;  %v241_v8 = vpop.f32.mrb[3].mxu0  ;;  %v4127_v7 = vadd.f32 %v312_v10, %v4110_v9  ;;  %v314_v6 = vpop.f32.mrb[3].mxu1 }
  0xdf   :  { %v4129_v5 = vadd.f32 %v241_v8, %v152_v12  ;;  %v4132_v2 = vadd.f32 %v314_v6, %v4118_v35 }
  0xe0   :  { %6429 = vst [vmem:[#allocation63_spill] sm:$0xff] %v4124_v46  ;;  %6430 = vst [vmem:[#allocation64_spill] sm:$0xff] %v4127_v7 }
  0xe1   :  { %6431 = vst [vmem:[#allocation65_spill] sm:$0xff] %v4129_v5  ;;  %6432 = vst [vmem:[#allocation66_spill] sm:$0xff] %v4132_v2 }
  0xe3   :  { %v245_v24 = vpop.f32.mrb[4].mxu0  ;;  %v318_v4 = vpop.f32.mrb[4].mxu1 }
  0xe4   :  { %v4134_v3 = vadd.f32 %v245_v24, %v148_v42  ;;  %v247_v32 = vpop.f32.mrb[5].mxu0  ;;  %v4137_v43 = vadd.f32 %v318_v4, %v4110_v9  ;;  %v320_v11 = vpop.f32.mrb[5].mxu1 }
  0xe5   :  { %v4139_v53 = vadd.f32 %v247_v32, %v152_v12  ;;  %v249_v46 = vpop.f32.mrb[6].mxu0  ;;  %v4142_v10 = vadd.f32 %v320_v11, %v4118_v35  ;;  %v322_v8 = vpop.f32.mrb[6].mxu1 }
  0xe6   :  { %6433 = vst [vmem:[#allocation67_spill] sm:$0xff] %v4134_v3  ;;  %6434 = vst [vmem:[#allocation68_spill] sm:$0xff] %v4137_v43  ;;  %v4144_v5 = vadd.f32 %v249_v46, %v148_v42  ;;  %v251_v6 = vpop.f32.mrb[7].mxu0  ;;  %v4147_v2 = vadd.f32 %v322_v8, %v4110_v9  ;;  %v324_v24 = vpop.f32.mrb[7].mxu1 }
  0xe7   :  { %6435 = vst [vmem:[#allocation69_spill] sm:$0xff] %v4139_v53  ;;  %6436 = vst [vmem:[#allocation70_spill] sm:$0xff] %v4142_v10  ;;  %v4149_v3 = vadd.f32 %v251_v6, %v152_v12  ;;  %v4152_v4 = vadd.f32 %v324_v24, %v4118_v35 }
  0xe8   :  { %6437 = vst [vmem:[#allocation71_spill] sm:$0xff] %v4144_v5  ;;  %6438 = vst [vmem:[#allocation72_spill] sm:$0xff] %v4147_v2 }
  0xe9   :  { %6439 = vst [vmem:[#allocation73_spill] sm:$0xff] %v4149_v3  ;;  %6440 = vst [vmem:[#allocation74_spill] sm:$0xff] %v4152_v4 }
  0xeb   :  { %v255_v43 = vpop.f32.mrb[8].mxu0  ;;  %v328_v32 = vpop.f32.mrb[8].mxu1 }
  0xec   :  { %v4154_v53 = vadd.f32 %v255_v43, %v148_v42  ;;  %v257_v7 = vpop.f32.mrb[9].mxu0  ;;  %v4157_v11 = vadd.f32 %v328_v32, %v4110_v9  ;;  %v330_v46 = vpop.f32.mrb[9].mxu1 }
  0xed   :  { %v4159_v5 = vadd.f32 %v257_v7, %v152_v12  ;;  %v259_v10 = vpop.f32.mrb[10].mxu0  ;;  %v4162_v8 = vadd.f32 %v330_v46, %v4118_v35  ;;  %v332_v6 = vpop.f32.mrb[10].mxu1 }
  0xee   :  { %6441 = vst [vmem:[#allocation75_spill] sm:$0xff] %v4154_v53  ;;  %6442 = vst [vmem:[#allocation76_spill] sm:$0xff] %v4157_v11  ;;  %v4164_v3 = vadd.f32 %v259_v10, %v148_v42  ;;  %v261_v24 = vpop.f32.mrb[11].mxu0  ;;  %v4167_v4 = vadd.f32 %v332_v6, %v4110_v9  ;;  %v334_v43 = vpop.f32.mrb[11].mxu1 }
  0xef   :  { %6443 = vst [vmem:[#allocation77_spill] sm:$0xff] %v4159_v5  ;;  %6444 = vst [vmem:[#allocation78_spill] sm:$0xff] %v4162_v8  ;;  %v4169_v53 = vadd.f32 %v261_v24, %v152_v12  ;;  %v4172_v32 = vadd.f32 %v334_v43, %v4118_v35 }
  0xf0   :  { %6445 = vst [vmem:[#allocation79_spill] sm:$0xff] %v4164_v3  ;;  %6446 = vst [vmem:[#allocation80_spill] sm:$0xff] %v4167_v4 }
  0xf1   :  { %6447 = vst [vmem:[#allocation81_spill] sm:$0xff] %v4169_v53  ;;  %6448 = vst [vmem:[#allocation82_spill] sm:$0xff] %v4172_v32 }
  0xf3   :  { %v265_v11 = vpop.f32.mrb[12].mxu0  ;;  %v338_v7 = vpop.f32.mrb[12].mxu1 }
  0xf4   :  { %v4174_v5 = vadd.f32 %v265_v11, %v148_v42  ;;  %v267_v2 = vpop.f32.mrb[13].mxu0  ;;  %v4177_v46 = vadd.f32 %v338_v7, %v4110_v9  ;;  %v340_v10 = vpop.f32.mrb[13].mxu1 }
  0xf5   :  { %v4179_v3 = vadd.f32 %v267_v2, %v152_v12  ;;  %v269_v8 = vpop.f32.mrb[14].mxu0  ;;  %v4182_v6 = vadd.f32 %v340_v10, %v4118_v35  ;;  %v342_v24 = vpop.f32.mrb[14].mxu1  ;;  %v236_v2 = vadd.f32 %v4112_v13, %v148_v42  ;;  %v238_v10 = vadd.f32 %v237_v21, %v152_v12 }
  0xf6   :  { %6449 = vst [vmem:[#allocation83_spill] sm:$0xff] %v4174_v5  ;;  %6450 = vst [vmem:[#allocation84_spill] sm:$0xff] %v4177_v46  ;;  %v4184_v53 = vadd.f32 %v269_v8, %v148_v42  ;;  %v271_v43 = vpop.f32.mrb[15].mxu0  ;;  %v4187_v32 = vadd.f32 %v342_v24, %v4110_v9  ;;  %v344_v11 = vpop.f32.mrb[15].mxu1 }
  0xf7   :  { %6451 = vst [vmem:[#allocation85_spill] sm:$0xff] %v4179_v3  ;;  %6452 = vst [vmem:[#allocation86_spill] sm:$0xff] %v4182_v6  ;;  %v4189_v5 = vadd.f32 %v271_v43, %v152_v12  ;;  %v4192_v7 = vadd.f32 %v344_v11, %v4118_v35  ;;  %v309_v3 = vadd.f32 %v4114_v31, %v4110_v9 }
  0xf8   :  { %6453 = vst [vmem:[#allocation87_spill] sm:$0xff] %v4184_v53  ;;  %6454 = vst [vmem:[#allocation88_spill] sm:$0xff] %v4187_v32  ;;  %v311_v6 = vadd.f32 %v310_v20, %v4118_v35 }
  0xf9   :  { %6455 = vst [vmem:[#allocation89_spill] sm:$0xff] %v4189_v5  ;;  %6456 = vst [vmem:[#allocation90_spill] sm:$0xff] %v4192_v7 }
  0xfb   :  { %v582_v8 = vpop.f32.mrb[16].mxu0  ;;  %v623_v53 = vpop.f32.mrb[16].mxu1 }
  0xfc   :  { %v630_v46 = vadd.f32 %v582_v8, %v236_v2  ;;  %v632_v4 = vadd.f32 %v623_v53, %v309_v3  ;;  %v584_v24 = vpop.f32.mrb[17].mxu0  ;;  %v625_v32 = vpop.f32.mrb[17].mxu1  ;;  %v6496_v2 = vld [vmem:[#allocation45_spill] sm:$0xff]  ;;  %v6498_v8 = vld [vmem:[#allocation47_spill] sm:$0xff] }
  0xfd   :  { %v631_v1 = vadd.f32 %v584_v24, %v238_v10  ;;  %v633_v43 = vadd.f32 %v625_v32, %v311_v6  ;;  %v586_v5 = vpop.f32.mrb[18].mxu0  ;;  %v627_v0 = vpop.f32.mrb[18].mxu1  ;;  %v6497_v10 = vld [vmem:[#allocation46_spill] sm:$0xff]  ;;  %v6499_v24 = vld [vmem:[#allocation48_spill] sm:$0xff] }
  0xfe   :  { %v2726_v11 = vmul.f32 -1.442695, %v630_v46  ;;  %v587_v7 = vpop.f32.mrb[19].mxu0  ;;  %v628_v63 = vpop.f32.mrb[19].mxu1  ;;  %v2728_v9 = vmul.f32 -1.442695, %v632_v4 }
  0xff   :  { %v2727_v42 = vmul.f32 -1.442695, %v631_v1  ;;  %v6457_v7 = vmov 0  }
 0x100   :  { %2988 = vpow2.f32 %v2726_v11  ;;  %v6501_v11 = vld [vmem:[#allocation50_spill] sm:$0xff] }
 0x101   :  { %2990 = vpow2.f32 %v2727_v42  ;;  %v6502_v42 = vld [vmem:[#allocation51_spill] sm:$0xff] }
 0x102   :  { %2992 = vtanh.f32 %v633_v43  ;;  %v6500_v43 = vld [vmem:[#allocation49_spill] sm:$0xff] }
 0x103   :  { %2994 = vpow2.f32 %v2728_v9  ;;  %v6503_v9 = vld [vmem:[#allocation52_spill] sm:$0xff] }
 0x10a   :  { %v2989_v12 = vpop.eup %2988 }
 0x10b   :  { %v643_v21 = vadd.f32 1.0, %v2989_v12  ;;  %v2991_v20 = vpop.eup %2990  ;;  %v6504_v12 = vld [vmem:[#allocation53_spill] sm:$0xff] }
 0x10c   :  { %v644_v3 = vadd.f32 1.0, %v2991_v20  ;;  %v2993_v35 = vpop.eup %2992  ;;  %v6506_v20 = vld [vmem:[#allocation55_spill] sm:$0xff] }
 0x10d   :  { %2996 = vrcp.f32 %v643_v21  ;;  %v2995_v53 = vpop.eup %2994  ;;  %v6505_v21 = vld [vmem:[#allocation54_spill] sm:$0xff] }
 0x10e   :  { %2998 = vrcp.f32 %v644_v3  ;;  %v645_v31 = vadd.f32 1.0, %v2995_v53  ;;  %v6507_v3 = vld [vmem:[#allocation56_spill] sm:$0xff]  ;;  %v6509_v53 = vld [vmem:[#allocation58_spill] sm:$0xff] }
 0x110   :  { %3000 = vrcp.f32 %v645_v31  ;;  %v4300_v31 = vld [vmem:[%s5994_s2 + $0x4] ss:$16 sps:$4 sm:$0xff]  }
 0x117   :  { %v2997_v13 = vpop.eup %2996 }
 0x118   :  { %v654_v5 = vmul.f32 %v2997_v13, %v2993_v35  ;;  %v2999_v0 = vpop.eup %2998  ;;  %v6508_v35 = vld [vmem:[#allocation57_spill] sm:$0xff]  ;;  %v6510_v13 = vld [vmem:[#allocation59_spill] sm:$0xff] }
 0x119   :  { %v653_v32 = vmul.f32 0.0, %v2999_v0  ;;  %v6512_v0 = vld [vmem:[#allocation61_spill] sm:$0xff] }
 0x11a   :  { %v3001_v1 = vpop.eup %3000 }
 0x11b   :  { %v4198_v63 = vadd.f32 %v654_v5, %v653_v32  ;;  %v6511_v5 = vld [vmem:[#allocation60_spill] sm:$0xff] }
 0x11c   :  { %v4306_v32 = vld [vmem:[%s5994_s2 + $0xc] ss:$16 sps:$4 sm:$0xff]  }
 0x11d   :  { %3002 = vtanh.f32 %v4198_v63 }
 0x127   :  { %v3003_v4 = vpop.eup %3002 }
 0x128   :  { %v657_v46 = vmul.f32 %v3003_v4, %v3001_v1  ;;  %v128_v1 = vld [vmem:[%s5997_s5] sm:$0xf]  ;;  %v6515_v4 = vld [vmem:[#allocation62_spill] sm:$0xff] }
 0x12a   :  { %v658_v6 = vpack.c.bf16 %v657_v46, %v657_v46  ;;  %v6516_v46 = vsub.s32 0, %v6515_v4 }
 0x12c   :  { %1034 = vmatmul.mubr.bf16.vlgmr.msra.gmra.mrb[20].mxu0 %v658_v6  ;;  %1075 = vmatmul.mubr.bf16.vlgmr.msra.gmra.mrb[20].mxu1 %v658_v6 }
 0x12d   :  { %1113 = vmatpush1.bf16.msra.mxu0 %v3500_v14  ;;  %1154 = vmatpush1.bf16.msra.mxu1 %v3505_v15  ;;  %v6458_v14 = vld [vmem:[#allocation7_spill] sm:$0xff]  ;;  %v6459_v15 = vld [vmem:[#allocation8_spill] sm:$0xff] }
 0x12e   :  { %1114 = vmatprep.subr.bf16.mxu0 %v3512_v16  ;;  %1155 = vmatprep.subr.bf16.mxu1 %v3517_v17  ;;  %v6460_v16 = vld [vmem:[#allocation9_spill] sm:$0xff]  ;;  %v6461_v17 = vld [vmem:[#allocation10_spill] sm:$0xff]  ;;  %6513 = vst [vmem:[#allocation7_spill] sm:$0xff] %v4300_v31  ;;  %6514 = vst [vmem:[#allocation8_spill] sm:$0xff] %v4306_v32 }
 0x12f   :  { %1144 = vmatprep.mubr.bf16.mxu0 %v6457_v7  ;;  %1185 = vmatprep.mubr.bf16.mxu1 %v6457_v7 }
 0x131   :  { %1115 = vmatpush1.bf16.msra.mxu0 %v3522_v18  ;;  %1156 = vmatpush1.bf16.msra.mxu1 %v3529_v19  ;;  %v6462_v18 = vld [vmem:[#allocation11_spill] sm:$0xff]  ;;  %v6463_v19 = vld [vmem:[#allocation12_spill] sm:$0xff] }
 0x132   :  { %1116 = vmatprep.subr.bf16.mxu0 %v3544_v22  ;;  %1157 = vmatprep.subr.bf16.mxu1 %v3549_v23  ;;  %v6464_v22 = vld [vmem:[#allocation13_spill] sm:$0xff]  ;;  %v6465_v23 = vld [vmem:[#allocation14_spill] sm:$0xff] }
 0x135   :  { %1117 = vmatpush1.bf16.msra.mxu0 %v3558_v25  ;;  %1158 = vmatpush1.bf16.msra.mxu1 %v3563_v26  ;;  %v6466_v25 = vld [vmem:[#allocation15_spill] sm:$0xff]  ;;  %v6467_v26 = vld [vmem:[#allocation16_spill] sm:$0xff] }
 0x136   :  { %1118 = vmatprep.subr.bf16.mxu0 %v3570_v27  ;;  %1159 = vmatprep.subr.bf16.mxu1 %v3575_v28  ;;  %v6468_v27 = vld [vmem:[#allocation17_spill] sm:$0xff]  ;;  %v6469_v28 = vld [vmem:[#allocation18_spill] sm:$0xff] }
 0x139   :  { %1119 = vmatpush1.bf16.msra.mxu0 %v3580_v29  ;;  %1160 = vmatpush1.bf16.msra.mxu1 %v3585_v30  ;;  %v6470_v29 = vld [vmem:[#allocation19_spill] sm:$0xff]  ;;  %v6471_v30 = vld [vmem:[#allocation20_spill] sm:$0xff] }
 0x13a   :  { %1120 = vmatprep.subr.bf16.mxu0 %v3600_v33  ;;  %1161 = vmatprep.subr.bf16.mxu1 %v3607_v34  ;;  %v6472_v33 = vld [vmem:[#allocation21_spill] sm:$0xff]  ;;  %v6473_v34 = vld [vmem:[#allocation22_spill] sm:$0xff] }
 0x13d   :  { %1121 = vmatpush1.bf16.msra.mxu0 %v3614_v36  ;;  %1162 = vmatpush1.bf16.msra.mxu1 %v3621_v37  ;;  %v6474_v36 = vld [vmem:[#allocation23_spill] sm:$0xff]  ;;  %v6475_v37 = vld [vmem:[#allocation24_spill] sm:$0xff] }
 0x13e   :  { %1122 = vmatprep.subr.bf16.mxu0 %v3628_v38  ;;  %1163 = vmatprep.subr.bf16.mxu1 %v3633_v39  ;;  %v6476_v38 = vld [vmem:[#allocation25_spill] sm:$0xff]  ;;  %v6477_v39 = vld [vmem:[#allocation26_spill] sm:$0xff] }
 0x141   :  { %1123 = vmatpush1.bf16.msra.mxu0 %v3640_v40  ;;  %1164 = vmatpush1.bf16.msra.mxu1 %v3647_v41  ;;  %v6478_v40 = vld [vmem:[#allocation27_spill] sm:$0xff]  ;;  %v6479_v41 = vld [vmem:[#allocation28_spill] sm:$0xff] }
 0x142   :  { %1124 = vmatprep.subr.bf16.mxu0 %v3660_v44  ;;  %1165 = vmatprep.subr.bf16.mxu1 %v3665_v45  ;;  %v6480_v44 = vld [vmem:[#allocation29_spill] sm:$0xff]  ;;  %v6481_v45 = vld [vmem:[#allocation30_spill] sm:$0xff] }
 0x145   :  { %1125 = vmatpush1.bf16.msra.mxu0 %v3674_v47  ;;  %1166 = vmatpush1.bf16.msra.mxu1 %v3679_v48  ;;  %v6482_v47 = vld [vmem:[#allocation31_spill] sm:$0xff]  ;;  %v6483_v48 = vld [vmem:[#allocation32_spill] sm:$0xff] }
 0x146   :  { %1126 = vmatprep.subr.bf16.mxu0 %v3686_v49  ;;  %1167 = vmatprep.subr.bf16.mxu1 %v3691_v50  ;;  %v6484_v49 = vld [vmem:[#allocation33_spill] sm:$0xff]  ;;  %v6485_v50 = vld [vmem:[#allocation34_spill] sm:$0xff] }
 0x149   :  { %1127 = vmatpush1.bf16.msra.mxu0 %v3700_v51  ;;  %1168 = vmatpush1.bf16.msra.mxu1 %v3705_v52  ;;  %v6486_v51 = vld [vmem:[#allocation35_spill] sm:$0xff]  ;;  %v6487_v52 = vld [vmem:[#allocation36_spill] sm:$0xff] }
 0x14a   :  { %1224 = vmatprep.subr.bf16.mxu0 %v3716_v54  ;;  %1265 = vmatprep.subr.bf16.mxu1 %v3721_v55  ;;  %v6488_v54 = vld [vmem:[#allocation37_spill] sm:$0xff]  ;;  %v6489_v55 = vld [vmem:[#allocation38_spill] sm:$0xff] }
 0x14c   :  { %1145 = vmatmul.mubr.bf16.vlgmr.msra.gmra.mrb[24].mxu0 %v658_v6  ;;  %1186 = vmatmul.mubr.bf16.vlgmr.msra.gmra.mrb[24].mxu1 %v658_v6  ;;  %v4314_v6 = vrot.slane %v128_v1, %v6516_v46  ;;  %v6520_v46 = vsub.s32 2, %v6515_v4 }
 0x14d   :  { %1225 = vmatpush1.bf16.msra.mxu0 %v3727_v56  ;;  %1266 = vmatpush1.bf16.msra.mxu1 %v3732_v57  ;;  %v6490_v56 = vld [vmem:[#allocation39_spill] sm:$0xff]  ;;  %v6491_v57 = vld [vmem:[#allocation40_spill] sm:$0xff] }
 0x14e   :  { %1226 = vmatprep.subr.bf16.mxu0 %v3740_v58  ;;  %1267 = vmatprep.subr.bf16.mxu1 %v3745_v59  ;;  %v6492_v58 = vld [vmem:[#allocation41_spill] sm:$0xff]  ;;  %v6493_v59 = vld [vmem:[#allocation42_spill] sm:$0xff]  ;;  %6517 = vst [vmem:[#allocation9_spill] sm:$0xff] %v4314_v6 }
 0x151   :  { %1227 = vmatpush1.bf16.msra.mxu0 %v3750_v60  ;;  %1268 = vmatpush1.bf16.msra.mxu1 %v3755_v61  ;;  %v6494_v60 = vld [vmem:[#allocation43_spill] sm:$0xff]  ;;  %v6495_v61 = vld [vmem:[#allocation44_spill] sm:$0xff] }
 0x152   :  { %1228 = vmatprep.subr.bf16.mxu0 %v3764_v62  ;;  %1269 = vmatprep.subr.bf16.mxu1 %v6458_v14 }
 0x155   :  { %1229 = vmatpush1.bf16.msra.mxu0 %v6459_v15  ;;  %1270 = vmatpush1.bf16.msra.mxu1 %v6460_v16 }
 0x156   :  { %1230 = vmatprep.subr.bf16.mxu0 %v6461_v17  ;;  %1271 = vmatprep.subr.bf16.mxu1 %v6462_v18 }
 0x159   :  { %1231 = vmatpush1.bf16.msra.mxu0 %v6463_v19  ;;  %1272 = vmatpush1.bf16.msra.mxu1 %v6464_v22 }
 0x15a   :  { %1232 = vmatprep.subr.bf16.mxu0 %v6465_v23  ;;  %1273 = vmatprep.subr.bf16.mxu1 %v6466_v25 }
 0x15d   :  { %1233 = vmatpush1.bf16.msra.mxu0 %v6467_v26  ;;  %1274 = vmatpush1.bf16.msra.mxu1 %v6468_v27 }
 0x15e   :  { %1234 = vmatprep.subr.bf16.mxu0 %v6469_v28  ;;  %1275 = vmatprep.subr.bf16.mxu1 %v6470_v29 }
 0x161   :  { %1235 = vmatpush1.bf16.msra.mxu0 %v6471_v30  ;;  %1276 = vmatpush1.bf16.msra.mxu1 %v6472_v33 }
 0x162   :  { %1236 = vmatprep.subr.bf16.mxu0 %v6473_v34  ;;  %1277 = vmatprep.subr.bf16.mxu1 %v6474_v36 }
 0x165   :  { %1237 = vmatpush1.bf16.msra.mxu0 %v6475_v37  ;;  %1278 = vmatpush1.bf16.msra.mxu1 %v6476_v38 }
 0x166   :  { %1238 = vmatprep.subr.bf16.mxu0 %v6477_v39  ;;  %1279 = vmatprep.subr.bf16.mxu1 %v6478_v40 }
 0x169   :  { %1239 = vmatpush1.bf16.msra.mxu0 %v6479_v41  ;;  %1280 = vmatpush1.bf16.msra.mxu1 %v6480_v44 }
 0x16a   :  { %1240 = vmatprep.subr.bf16.mxu0 %v6481_v45  ;;  %1281 = vmatprep.subr.bf16.mxu1 %v6482_v47 }
 0x16d   :  { %1241 = vmatpush1.bf16.msra.mxu0 %v6483_v48  ;;  %1282 = vmatpush1.bf16.msra.mxu1 %v6484_v49 }
 0x16e   :  { %1242 = vmatprep.subr.bf16.mxu0 %v6485_v50  ;;  %1283 = vmatprep.subr.bf16.mxu1 %v6486_v51 }
 0x171   :  { %1243 = vmatpush1.bf16.msra.mxu0 %v6487_v52  ;;  %1284 = vmatpush1.bf16.msra.mxu1 %v6488_v54 }
 0x172   :  { %1244 = vmatprep.subr.bf16.mxu0 %v6489_v55  ;;  %1285 = vmatprep.subr.bf16.mxu1 %v6490_v56 }
 0x175   :  { %1245 = vmatpush1.bf16.msra.mxu0 %v6491_v57  ;;  %1286 = vmatpush1.bf16.msra.mxu1 %v6492_v58 }
 0x176   :  { %1246 = vmatprep.subr.bf16.mxu0 %v6493_v59  ;;  %1287 = vmatprep.subr.bf16.mxu1 %v6494_v60 }
 0x179   :  { %1247 = vmatpush1.bf16.msra.mxu0 %v6495_v61  ;;  %1288 = vmatpush1.bf16.msra.mxu1 %v6496_v2 }
 0x17a   :  { %1248 = vmatprep.subr.bf16.mxu0 %v6497_v10  ;;  %1289 = vmatprep.subr.bf16.mxu1 %v6498_v8 }
 0x17d   :  { %1249 = vmatpush1.bf16.msra.mxu0 %v6499_v24  ;;  %1290 = vmatpush1.bf16.msra.mxu1 %v6500_v43  ;;  %v4324_v43 = vrot.slane %v128_v1, %v6520_v46 }
 0x17e   :  { %1250 = vmatprep.subr.bf16.mxu0 %v6501_v11  ;;  %1291 = vmatprep.subr.bf16.mxu1 %v6502_v42 }
 0x17f   :  { %6521 = vst [vmem:[#allocation11_spill] sm:$0xff] %v4324_v43 }
 0x181   :  { %1251 = vmatpush1.bf16.msra.mxu0 %v6503_v9  ;;  %1292 = vmatpush1.bf16.msra.mxu1 %v6504_v12 }
 0x182   :  { %1252 = vmatprep.subr.bf16.mxu0 %v6505_v21  ;;  %1293 = vmatprep.subr.bf16.mxu1 %v6506_v20 }
 0x185   :  { %1253 = vmatpush1.bf16.msra.mxu0 %v6507_v3  ;;  %1294 = vmatpush1.bf16.msra.mxu1 %v6508_v35 }
 0x186   :  { %1254 = vmatprep.subr.bf16.mxu0 %v6509_v53  ;;  %1295 = vmatprep.subr.bf16.mxu1 %v6510_v13 }
 0x189   :  { %1255 = vmatpush1.bf16.msra.mxu0 %v6511_v5  ;;  %1296 = vmatpush1.bf16.msra.mxu1 %v6512_v0  ;;  %v6518_v0 = vsub.s32 1, %v6515_v4 }
 0x18a   :  { %1335 = vmatprep.subr.bf16.mxu0 %v4300_v31  ;;  %1376 = vmatprep.subr.bf16.mxu1 %v4306_v32 }
 0x18b   :  { %v4318_v5 = vrot.slane %v128_v1, %v6518_v0  ;;  %v6522_v0 = vsub.s32 3, %v6515_v4 }
 0x18d   :  { %6519 = vst [vmem:[#allocation10_spill] sm:$0xff] %v4318_v5  ;;  %v4328_v24 = vrot.slane %v128_v1, %v6522_v0 }
 0x18f   :  { %6523 = vst [vmem:[#allocation12_spill] sm:$0xff] %v4328_v24 }
 0x1ff   :  { %v1035_v31 = vpop.f32.mrb[20].mxu0  ;;  %v1076_v13 = vpop.f32.mrb[20].mxu1 }
 0x200   :  { %v1036_v53 = vadd.f32 %v1035_v31, %v4314_v6  ;;  %v1037_v35 = vpop.f32.mrb[21].mxu0  ;;  %v1078_v3 = vpop.f32.mrb[21].mxu1  ;;  %v1077_v31 = vadd.f32 %v1076_v13, %v4324_v43 }
 0x201   :  { %v1038_v32 = vadd.f32 %v1037_v35, %v4318_v5  ;;  %v1039_v20 = vpop.f32.mrb[22].mxu0  ;;  %v1080_v21 = vpop.f32.mrb[22].mxu1  ;;  %v1079_v35 = vadd.f32 %v1078_v3, %v4328_v24  ;;  %v6524_v3 = vld [vmem:[#allocation63_spill] sm:$0xff] }
 0x202   :  { %v2793_v12 = vmul.f32 -1.442695, %v1036_v53  ;;  %v1040_v9 = vpop.f32.mrb[23].mxu0  ;;  %v1081_v42 = vpop.f32.mrb[23].mxu1  ;;  %v2795_v20 = vmul.f32 -1.442695, %v1077_v31 }
 0x203   :  { %v2794_v11 = vmul.f32 -1.442695, %v1038_v32 }
 0x204   :  { %3004 = vpow2.f32 %v2793_v12 }
 0x205   :  { %3006 = vpow2.f32 %v2794_v11 }
 0x206   :  { %3008 = vtanh.f32 %v1079_v35 }
 0x207   :  { %3010 = vpow2.f32 %v2795_v20 }
 0x20e   :  { %v3005_v21 = vpop.eup %3004 }
 0x20f   :  { %v1092_v53 = vadd.f32 1.0, %v3005_v21  ;;  %v3007_v42 = vpop.eup %3006  ;;  %v6525_v21 = vld [vmem:[#allocation64_spill] sm:$0xff] }
 0x210   :  { %v1093_v9 = vadd.f32 1.0, %v3007_v42  ;;  %v3009_v12 = vpop.eup %3008 }
 0x211   :  { %3012 = vrcp.f32 %v1092_v53  ;;  %v3011_v32 = vpop.eup %3010  ;;  %v6526_v53 = vld [vmem:[#allocation65_spill] sm:$0xff] }
 0x212   :  { %3014 = vrcp.f32 %v1093_v9  ;;  %v1094_v1 = vadd.f32 1.0, %v3011_v32  ;;  %v6527_v9 = vld [vmem:[#allocation66_spill] sm:$0xff] }
 0x214   :  { %3016 = vrcp.f32 %v1094_v1 }
 0x21b   :  { %v3013_v11 = vpop.eup %3012 }
 0x21c   :  { %v1103_v46 = vmul.f32 %v3013_v11, %v3009_v12  ;;  %v3015_v4 = vpop.eup %3014 }
 0x21d   :  { %v1102_v0 = vmul.f32 0.0, %v3015_v4 }
 0x21f   :  { %v1146_v5 = vpop.f32.mrb[24].mxu0  ;;  %v1187_v13 = vpop.f32.mrb[24].mxu1  ;;  %v4332_v43 = vadd.f32 %v1103_v46, %v1102_v0 }
 0x220   :  { %v1194_v31 = vadd.f32 %v1146_v5, %v6524_v3  ;;  %v1196_v35 = vadd.f32 %v1187_v13, %v6525_v21  ;;  %v1148_v24 = vpop.f32.mrb[25].mxu0  ;;  %v1189_v20 = vpop.f32.mrb[25].mxu1 }
 0x221   :  { %v1195_v42 = vadd.f32 %v1148_v24, %v6526_v53  ;;  %v1197_v6 = vadd.f32 %v1189_v20, %v6527_v9  ;;  %v1150_v8 = vpop.f32.mrb[26].mxu0  ;;  %v1191_v12 = vpop.f32.mrb[26].mxu1  ;;  %3018 = vtanh.f32 %v4332_v43 }
 0x222   :  { %v2796_v11 = vmul.f32 -1.442695, %v1194_v31  ;;  %v1151_v32 = vpop.f32.mrb[27].mxu0  ;;  %v1192_v4 = vpop.f32.mrb[27].mxu1  ;;  %v2798_v13 = vmul.f32 -1.442695, %v1196_v35 }
 0x223   :  { %v2797_v46 = vmul.f32 -1.442695, %v1195_v42  ;;  %v3017_v5 = vpop.eup %3016 }
 0x224   :  { %3020 = vpow2.f32 %v2796_v11 }
 0x225   :  { %3022 = vpow2.f32 %v2797_v46 }
 0x226   :  { %3024 = vtanh.f32 %v1197_v6 }
 0x227   :  { %3026 = vpow2.f32 %v2798_v13  ;;  %v4362_v13 = vld [vmem:[%s5994_s2 + $0x24] ss:$16 sps:$4 sm:$0xff]  }
 0x22b   :  { %v3019_v0 = vpop.eup %3018 }
 0x22c   :  { %v1106_v3 = vmul.f32 %v3019_v0, %v3017_v5  ;;  %v4350_v0 = vld [vmem:[%s5994_s2] ss:$16 sps:$4 sm:$0xff]  }
 0x22e   :  { %v3021_v21 = vpop.eup %3020  ;;  %v1223_v24 = vpack.c.bf16 %v1106_v3, %v1106_v3  ;;  %v4368_v3 = vld [vmem:[%s5994_s2 + $0x2c] ss:$16 sps:$4 sm:$0xff]  }
 0x22f   :  { %v1207_v1 = vadd.f32 1.0, %v3021_v21  ;;  %v3023_v53 = vpop.eup %3022  ;;  %v4376_v21 = vld [vmem:[%s5994_s2 + $0x20] ss:$16 sps:$4 sm:$0xff]  }
 0x230   :  { %v1208_v8 = vadd.f32 1.0, %v3023_v53  ;;  %1256 = vmatprep.mubr.bf16.mxu0 %v1223_v24  ;;  %1297 = vmatprep.mubr.bf16.mxu1 %v1223_v24  ;;  %v3025_v31 = vpop.eup %3024  ;;  %v4388_v24 = vld [vmem:[%s5994_s2 + $0x44] ss:$16 sps:$4 sm:$0xff]   ;;  %v4394_v53 = vld [vmem:[%s5994_s2 + $0x4c] ss:$16 sps:$4 sm:$0xff]  }
 0x231   :  { %3028 = vrcp.f32 %v1207_v1  ;;  %v3027_v20 = vpop.eup %3026  ;;  %v4382_v1 = vld [vmem:[%s5994_s2 + $0x28] ss:$16 sps:$4 sm:$0xff]  }
 0x232   :  { %3030 = vrcp.f32 %v1208_v8  ;;  %v1209_v11 = vadd.f32 1.0, %v3027_v20  ;;  %v4400_v8 = vld [vmem:[%s5994_s2 + $0x40] ss:$16 sps:$4 sm:$0xff]   ;;  %v4412_v20 = vld [vmem:[%s5994_s2 + $0x64] ss:$16 sps:$4 sm:$0xff]  }
 0x234   :  { %3032 = vrcp.f32 %v1209_v11  ;;  %v4436_v11 = vld [vmem:[%s5994_s2 + $0x84] ss:$16 sps:$4 sm:$0xff]  }
 0x23b   :  { %v3029_v42 = vpop.eup %3028 }
 0x23c   :  { %v1218_v9 = vmul.f32 %v3029_v42, %v3025_v31  ;;  %v3031_v12 = vpop.eup %3030  ;;  %v4406_v31 = vld [vmem:[%s5994_s2 + $0x48] ss:$16 sps:$4 sm:$0xff]   ;;  %v4418_v42 = vld [vmem:[%s5994_s2 + $0x6c] ss:$16 sps:$4 sm:$0xff]  }
 0x23d   :  { %v1217_v35 = vmul.f32 %v3031_v12, %v4198_v63  ;;  %v4356_v63 = vld [vmem:[%s5994_s2 + $0x8] ss:$16 sps:$4 sm:$0xff]  }
 0x23e   :  { %v3033_v6 = vpop.eup %3032  ;;  %v4430_v12 = vld [vmem:[%s5994_s2 + $0x68] ss:$16 sps:$4 sm:$0xff]  }
 0x23f   :  { %v4340_v32 = vadd.f32 %v1218_v9, %v1217_v35  ;;  %v4424_v9 = vld [vmem:[%s5994_s2 + $0x60] ss:$16 sps:$4 sm:$0xff]   ;;  %v4442_v35 = vld [vmem:[%s5994_s2 + $0x8c] ss:$16 sps:$4 sm:$0xff]  }
 0x240   :  { %6528 = vst [vmem:[#allocation13_spill] sm:$0xff] %v4442_v35 }
 0x241   :  { %3034 = vtanh.f32 %v4340_v32 }
 0x24b   :  { %v3035_v4 = vpop.eup %3034 }
 0x24c   :  { %v1221_v46 = vmul.f32 %v3035_v4, %v3033_v6  ;;  %v4448_v6 = vld [vmem:[%s5994_s2 + $0x80] ss:$16 sps:$4 sm:$0xff]   ;;  %v4454_v4 = vld [vmem:[%s5994_s2 + $0x88] ss:$16 sps:$4 sm:$0xff]  }
 0x24d   :  { %6529 = vst [vmem:[#allocation14_spill] sm:$0xff] %v4448_v6  ;;  %6530 = vst [vmem:[#allocation15_spill] sm:$0xff] %v4454_v4 }
 0x24e   :  { %v4343_v5 = vpack.c.bf16 %v1221_v46, %v1221_v46  ;;  %v4460_v46 = vld [vmem:[%s5994_s2 + $0xa4] ss:$16 sps:$4 sm:$0xff]  }
 0x24f   :  { %6531 = vst [vmem:[#allocation16_spill] sm:$0xff] %v4460_v46 }
 0x250   :  { %1257 = vmatmul.mubr.bf16.vlgmr.msra.gmra.mrb[28].mxu0 %v4343_v5  ;;  %1298 = vmatmul.mubr.bf16.vlgmr.msra.gmra.mrb[28].mxu1 %v4343_v5 }
 0x251   :  { %1336 = vmatpush1.bf16.msra.mxu0 %v4350_v0  ;;  %1377 = vmatpush1.bf16.msra.mxu1 %v4356_v63 }
 0x252   :  { %1337 = vmatprep.subr.bf16.mxu0 %v4362_v13  ;;  %1378 = vmatprep.subr.bf16.mxu1 %v4368_v3 }
 0x253   :  { %1367 = vmatprep.mubr.bf16.mxu0 %v6457_v7  ;;  %1408 = vmatprep.mubr.bf16.mxu1 %v6457_v7 }
 0x255   :  { %1338 = vmatpush1.bf16.msra.mxu0 %v4376_v21  ;;  %1379 = vmatpush1.bf16.msra.mxu1 %v4382_v1 }
 0x256   :  { %1339 = vmatprep.subr.bf16.mxu0 %v4388_v24  ;;  %1380 = vmatprep.subr.bf16.mxu1 %v4394_v53 }
 0x259   :  { %1340 = vmatpush1.bf16.msra.mxu0 %v4400_v8  ;;  %1381 = vmatpush1.bf16.msra.mxu1 %v4406_v31 }
 0x25a   :  { %1341 = vmatprep.subr.bf16.mxu0 %v4412_v20  ;;  %1382 = vmatprep.subr.bf16.mxu1 %v4418_v42 }
 0x25d   :  { %1342 = vmatpush1.bf16.msra.mxu0 %v4424_v9  ;;  %1383 = vmatpush1.bf16.msra.mxu1 %v4430_v12 }
 0x25e   :  { %1343 = vmatprep.subr.bf16.mxu0 %v4436_v11  ;;  %1384 = vmatprep.subr.bf16.mxu1 %v4442_v35  ;;  %v4466_v35 = vld [vmem:[%s5994_s2 + $0xac] ss:$16 sps:$4 sm:$0xff]  }
 0x25f   :  { %6532 = vst [vmem:[#allocation17_spill] sm:$0xff] %v4466_v35 }
 0x261   :  { %1344 = vmatpush1.bf16.msra.mxu0 %v4448_v6  ;;  %1385 = vmatpush1.bf16.msra.mxu1 %v4454_v4  ;;  %v4472_v6 = vld [vmem:[%s5994_s2 + $0xa0] ss:$16 sps:$4 sm:$0xff]   ;;  %v4478_v4 = vld [vmem:[%s5994_s2 + $0xa8] ss:$16 sps:$4 sm:$0xff]  }
 0x262   :  { %1345 = vmatprep.subr.bf16.mxu0 %v4460_v46  ;;  %1386 = vmatprep.subr.bf16.mxu1 %v4466_v35  ;;  %6533 = vst [vmem:[#allocation18_spill] sm:$0xff] %v4472_v6  ;;  %6534 = vst [vmem:[#allocation19_spill] sm:$0xff] %v4478_v4  ;;  %v4484_v46 = vld [vmem:[%s5994_s2 + $0xc4] ss:$16 sps:$4 sm:$0xff]   ;;  %v4490_v35 = vld [vmem:[%s5994_s2 + $0xcc] ss:$16 sps:$4 sm:$0xff]  }
 0x263   :  { %6535 = vst [vmem:[#allocation20_spill] sm:$0xff] %v4484_v46  ;;  %6536 = vst [vmem:[#allocation21_spill] sm:$0xff] %v4490_v35 }
 0x265   :  { %1346 = vmatpush1.bf16.msra.mxu0 %v4472_v6  ;;  %1387 = vmatpush1.bf16.msra.mxu1 %v4478_v4  ;;  %v4496_v6 = vld [vmem:[%s5994_s2 + $0xc0] ss:$16 sps:$4 sm:$0xff]   ;;  %v4502_v4 = vld [vmem:[%s5994_s2 + $0xc8] ss:$16 sps:$4 sm:$0xff]  }
 0x266   :  { %1347 = vmatprep.subr.bf16.mxu0 %v4484_v46  ;;  %1388 = vmatprep.subr.bf16.mxu1 %v4490_v35  ;;  %6537 = vst [vmem:[#allocation22_spill] sm:$0xff] %v4496_v6  ;;  %6538 = vst [vmem:[#allocation23_spill] sm:$0xff] %v4502_v4  ;;  %v4508_v46 = vld [vmem:[%s5994_s2 + $0xe4] ss:$16 sps:$4 sm:$0xff]   ;;  %v4514_v35 = vld [vmem:[%s5994_s2 + $0xec] ss:$16 sps:$4 sm:$0xff]  }
 0x267   :  { %6539 = vst [vmem:[#allocation24_spill] sm:$0xff] %v4508_v46  ;;  %6540 = vst [vmem:[#allocation25_spill] sm:$0xff] %v4514_v35 }
 0x269   :  { %1348 = vmatpush1.bf16.msra.mxu0 %v4496_v6  ;;  %1389 = vmatpush1.bf16.msra.mxu1 %v4502_v4  ;;  %v4520_v6 = vld [vmem:[%s5994_s2 + $0xe0] ss:$16 sps:$4 sm:$0xff]   ;;  %v4526_v4 = vld [vmem:[%s5994_s2 + $0xe8] ss:$16 sps:$4 sm:$0xff]  }
 0x26a   :  { %1349 = vmatprep.subr.bf16.mxu0 %v4508_v46  ;;  %1390 = vmatprep.subr.bf16.mxu1 %v4514_v35  ;;  %6541 = vst [vmem:[#allocation26_spill] sm:$0xff] %v4526_v4  ;;  %v4532_v46 = vld [vmem:[%s5995_s4 + $0x4] ss:$16 sps:$4 sm:$0xff]   ;;  %v4538_v35 = vld [vmem:[%s5995_s4 + $0xc] ss:$16 sps:$4 sm:$0xff]  }
 0x26b   :  { %6542 = vst [vmem:[#allocation27_spill] sm:$0xff] %v4532_v46  ;;  %6543 = vst [vmem:[#allocation28_spill] sm:$0xff] %v4538_v35 }
 0x26d   :  { %1350 = vmatpush1.bf16.msra.mxu0 %v4520_v6  ;;  %1391 = vmatpush1.bf16.msra.mxu1 %v4526_v4  ;;  %v4546_v4 = vld [vmem:[%s5995_s4] ss:$16 sps:$4 sm:$0xff]  }
 0x26e   :  { %1447 = vmatprep.subr.bf16.mxu0 %v4532_v46  ;;  %1488 = vmatprep.subr.bf16.mxu1 %v4538_v35  ;;  %6544 = vst [vmem:[#allocation29_spill] sm:$0xff] %v4546_v4  ;;  %v4552_v46 = vld [vmem:[%s5995_s4 + $0x8] ss:$16 sps:$4 sm:$0xff]   ;;  %v4558_v35 = vld [vmem:[%s5995_s4 + $0x24] ss:$16 sps:$4 sm:$0xff]  }
 0x26f   :  { %6545 = vst [vmem:[#allocation30_spill] sm:$0xff] %v4552_v46 }
 0x270   :  { %1368 = vmatmul.mubr.bf16.vlgmr.msra.gmra.mrb[32].mxu0 %v4343_v5  ;;  %1409 = vmatmul.mubr.bf16.vlgmr.msra.gmra.mrb[32].mxu1 %v4343_v5  ;;  %v4564_v5 = vld [vmem:[%s5995_s4 + $0x2c] ss:$16 sps:$4 sm:$0xff]  }
 0x271   :  { %1448 = vmatpush1.bf16.msra.mxu0 %v4546_v4  ;;  %1489 = vmatpush1.bf16.msra.mxu1 %v4552_v46  ;;  %v4570_v4 = vld [vmem:[%s5995_s4 + $0x20] ss:$16 sps:$4 sm:$0xff]   ;;  %v4576_v46 = vld [vmem:[%s5995_s4 + $0x28] ss:$16 sps:$4 sm:$0xff]  }
 0x272   :  { %1449 = vmatprep.subr.bf16.mxu0 %v4558_v35  ;;  %1490 = vmatprep.subr.bf16.mxu1 %v4564_v5 }
 0x275   :  { %1450 = vmatpush1.bf16.msra.mxu0 %v4570_v4  ;;  %1491 = vmatpush1.bf16.msra.mxu1 %v4576_v46 }
 0x276   :  { %1451 = vmatprep.subr.bf16.mxu0 %v3764_v62  ;;  %1492 = vmatprep.subr.bf16.mxu1 %v6458_v14  ;;  %v6546_v62 = vld [vmem:[#allocation47_spill] sm:$0xff]  ;;  %v6547_v14 = vld [vmem:[#allocation48_spill] sm:$0xff] }
 0x279   :  { %1452 = vmatpush1.bf16.msra.mxu0 %v6459_v15  ;;  %1493 = vmatpush1.bf16.msra.mxu1 %v6460_v16  ;;  %v6548_v15 = vld [vmem:[#allocation49_spill] sm:$0xff]  ;;  %v6549_v16 = vld [vmem:[#allocation50_spill] sm:$0xff] }
 0x27a   :  { %1453 = vmatprep.subr.bf16.mxu0 %v6461_v17  ;;  %1494 = vmatprep.subr.bf16.mxu1 %v6462_v18  ;;  %v6550_v17 = vld [vmem:[#allocation51_spill] sm:$0xff]  ;;  %v6551_v18 = vld [vmem:[#allocation52_spill] sm:$0xff] }
 0x27d   :  { %1454 = vmatpush1.bf16.msra.mxu0 %v6463_v19  ;;  %1495 = vmatpush1.bf16.msra.mxu1 %v6464_v22  ;;  %v6552_v19 = vld [vmem:[#allocation53_spill] sm:$0xff]  ;;  %v6553_v22 = vld [vmem:[#allocation54_spill] sm:$0xff] }
 0x27e   :  { %1455 = vmatprep.subr.bf16.mxu0 %v6465_v23  ;;  %1496 = vmatprep.subr.bf16.mxu1 %v6466_v25  ;;  %v6554_v23 = vld [vmem:[#allocation55_spill] sm:$0xff]  ;;  %v6555_v25 = vld [vmem:[#allocation56_spill] sm:$0xff] }
 0x281   :  { %1456 = vmatpush1.bf16.msra.mxu0 %v6467_v26  ;;  %1497 = vmatpush1.bf16.msra.mxu1 %v6468_v27  ;;  %v6556_v26 = vld [vmem:[#allocation57_spill] sm:$0xff]  ;;  %v6557_v27 = vld [vmem:[#allocation58_spill] sm:$0xff] }
 0x282   :  { %1457 = vmatprep.subr.bf16.mxu0 %v6469_v28  ;;  %1498 = vmatprep.subr.bf16.mxu1 %v6470_v29  ;;  %v6558_v28 = vld [vmem:[#allocation59_spill] sm:$0xff]  ;;  %v6559_v29 = vld [vmem:[#allocation60_spill] sm:$0xff] }
 0x285   :  { %1458 = vmatpush1.bf16.msra.mxu0 %v6471_v30  ;;  %1499 = vmatpush1.bf16.msra.mxu1 %v6472_v33  ;;  %v6560_v30 = vld [vmem:[#allocation61_spill] sm:$0xff]  ;;  %v6561_v33 = vld [vmem:[#allocation7_spill] sm:$0xff] }
 0x286   :  { %1459 = vmatprep.subr.bf16.mxu0 %v6473_v34  ;;  %1500 = vmatprep.subr.bf16.mxu1 %v6474_v36  ;;  %v6562_v34 = vld [vmem:[#allocation8_spill] sm:$0xff] }
 0x289   :  { %1460 = vmatpush1.bf16.msra.mxu0 %v6475_v37  ;;  %1501 = vmatpush1.bf16.msra.mxu1 %v6476_v38  ;;  %v6563_v38 = vld [vmem:[#allocation9_spill] sm:$0xff] }
 0x28a   :  { %1461 = vmatprep.subr.bf16.mxu0 %v6477_v39  ;;  %1502 = vmatprep.subr.bf16.mxu1 %v6478_v40 }
 0x28d   :  { %1462 = vmatpush1.bf16.msra.mxu0 %v6479_v41  ;;  %1503 = vmatpush1.bf16.msra.mxu1 %v6480_v44  ;;  %v6564_v44 = vld [vmem:[#allocation10_spill] sm:$0xff] }
 0x28e   :  { %1463 = vmatprep.subr.bf16.mxu0 %v6481_v45  ;;  %1504 = vmatprep.subr.bf16.mxu1 %v6482_v47 }
 0x291   :  { %1464 = vmatpush1.bf16.msra.mxu0 %v6483_v48  ;;  %1505 = vmatpush1.bf16.msra.mxu1 %v6484_v49 }
 0x292   :  { %1465 = vmatprep.subr.bf16.mxu0 %v6485_v50  ;;  %1506 = vmatprep.subr.bf16.mxu1 %v6486_v51 }
 0x295   :  { %1466 = vmatpush1.bf16.msra.mxu0 %v6487_v52  ;;  %1507 = vmatpush1.bf16.msra.mxu1 %v6488_v54  ;;  %v6565_v54 = vld [vmem:[#allocation11_spill] sm:$0xff] }
 0x296   :  { %1467 = vmatprep.subr.bf16.mxu0 %v6489_v55  ;;  %1508 = vmatprep.subr.bf16.mxu1 %v6490_v56  ;;  %v6566_v56 = vld [vmem:[#allocation12_spill] sm:$0xff] }
 0x299   :  { %1468 = vmatpush1.bf16.msra.mxu0 %v6491_v57  ;;  %1509 = vmatpush1.bf16.msra.mxu1 %v6492_v58 }
 0x29a   :  { %1469 = vmatprep.subr.bf16.mxu0 %v6493_v59  ;;  %1510 = vmatprep.subr.bf16.mxu1 %v6494_v60 }
 0x29d   :  { %1470 = vmatpush1.bf16.msra.mxu0 %v6495_v61  ;;  %1511 = vmatpush1.bf16.msra.mxu1 %v6496_v2 }
 0x29e   :  { %1471 = vmatprep.subr.bf16.mxu0 %v6497_v10  ;;  %1512 = vmatprep.subr.bf16.mxu1 %v6546_v62 }
 0x2a1   :  { %1472 = vmatpush1.bf16.msra.mxu0 %v6547_v14  ;;  %1513 = vmatpush1.bf16.msra.mxu1 %v6548_v15 }
 0x2a2   :  { %1473 = vmatprep.subr.bf16.mxu0 %v6549_v16  ;;  %1514 = vmatprep.subr.bf16.mxu1 %v6550_v17 }
 0x2a5   :  { %1474 = vmatpush1.bf16.msra.mxu0 %v6551_v18  ;;  %1515 = vmatpush1.bf16.msra.mxu1 %v6552_v19 }
 0x2a6   :  { %1475 = vmatprep.subr.bf16.mxu0 %v6553_v22  ;;  %1516 = vmatprep.subr.bf16.mxu1 %v6554_v23 }
 0x2a9   :  { %1476 = vmatpush1.bf16.msra.mxu0 %v6555_v25  ;;  %1517 = vmatpush1.bf16.msra.mxu1 %v6556_v26  ;;  %v6567_v25 = vld [vmem:[#allocation67_spill] sm:$0xff] }
 0x2aa   :  { %1477 = vmatprep.subr.bf16.mxu0 %v6557_v27  ;;  %1518 = vmatprep.subr.bf16.mxu1 %v6558_v28  ;;  %v6568_v27 = vld [vmem:[#allocation68_spill] sm:$0xff] }
 0x2ad   :  { %1478 = vmatpush1.bf16.msra.mxu0 %v6559_v29  ;;  %1519 = vmatpush1.bf16.msra.mxu1 %v6560_v30 }
 0x2ae   :  { %1558 = vmatprep.subr.bf16.mxu0 %v6561_v33  ;;  %1599 = vmatprep.subr.bf16.mxu1 %v6562_v34 }
 0x323   :  { %v1258_v36 = vpop.f32.mrb[28].mxu0  ;;  %v1299_v37 = vpop.f32.mrb[28].mxu1 }
 0x324   :  { %v1259_v39 = vadd.f32 %v1258_v36, %v6563_v38  ;;  %v1260_v40 = vpop.f32.mrb[29].mxu0  ;;  %v1301_v41 = vpop.f32.mrb[29].mxu1  ;;  %v1300_v55 = vadd.f32 %v1299_v37, %v6565_v54  ;;  %v6569_v36 = vld [vmem:[#allocation69_spill] sm:$0xff] }
 0x325   :  { %v1261_v45 = vadd.f32 %v1260_v40, %v6564_v44  ;;  %v1262_v47 = vpop.f32.mrb[30].mxu0  ;;  %v1303_v48 = vpop.f32.mrb[30].mxu1  ;;  %v1302_v57 = vadd.f32 %v1301_v41, %v6566_v56 }
 0x326   :  { %v2799_v49 = vmul.f32 -1.442695, %v1259_v39  ;;  %v1263_v50 = vpop.f32.mrb[31].mxu0  ;;  %v1304_v51 = vpop.f32.mrb[31].mxu1  ;;  %v2801_v58 = vmul.f32 -1.442695, %v1300_v55 }
 0x327   :  { %v2800_v52 = vmul.f32 -1.442695, %v1261_v45  ;;  %v6570_v39 = vld [vmem:[#allocation70_spill] sm:$0xff] }
 0x328   :  { %3036 = vpow2.f32 %v2799_v49 }
 0x329   :  { %3038 = vpow2.f32 %v2800_v52 }
 0x32a   :  { %3040 = vtanh.f32 %v1302_v57 }
 0x32b   :  { %3042 = vpow2.f32 %v2801_v58 }
 0x332   :  { %v3037_v59 = vpop.eup %3036 }
 0x333   :  { %v1315_v60 = vadd.f32 1.0, %v3037_v59  ;;  %v3039_v61 = vpop.eup %3038 }
 0x334   :  { %v1316_v2 = vadd.f32 1.0, %v3039_v61  ;;  %v3041_v10 = vpop.eup %3040 }
 0x335   :  { %3044 = vrcp.f32 %v1315_v60  ;;  %v3043_v62 = vpop.eup %3042 }
 0x336   :  { %3046 = vrcp.f32 %v1316_v2  ;;  %v1317_v17 = vadd.f32 1.0, %v3043_v62 }
 0x338   :  { %3048 = vrcp.f32 %v1317_v17 }
 0x33f   :  { %v3045_v14 = vpop.eup %3044 }
 0x340   :  { %v1326_v15 = vmul.f32 %v3045_v14, %v3041_v10  ;;  %v3047_v16 = vpop.eup %3046 }
 0x341   :  { %v1325_v18 = vmul.f32 %v3047_v16, %v4332_v43 }
 0x342   :  { %v3049_v50 = vpop.eup %3048 }
 0x343   :  { %v1369_v19 = vpop.f32.mrb[32].mxu0  ;;  %v1410_v22 = vpop.f32.mrb[32].mxu1  ;;  %v4642_v23 = vadd.f32 %v1326_v15, %v1325_v18 }
 0x344   :  { %v1417_v26 = vadd.f32 %v1369_v19, %v6567_v25  ;;  %v1419_v28 = vadd.f32 %v1410_v22, %v6568_v27  ;;  %v1371_v29 = vpop.f32.mrb[33].mxu0  ;;  %v1412_v30 = vpop.f32.mrb[33].mxu1  ;;  %v6572_v27 = vld [vmem:[#allocation14_spill] sm:$0xff] }
 0x345   :  { %v1418_v37 = vadd.f32 %v1371_v29, %v6569_v36  ;;  %v1420_v40 = vadd.f32 %v1412_v30, %v6570_v39  ;;  %v1373_v41 = vpop.f32.mrb[34].mxu0  ;;  %v1414_v45 = vpop.f32.mrb[34].mxu1  ;;  %3050 = vtanh.f32 %v4642_v23  ;;  %v6574_v29 = vld [vmem:[#allocation16_spill] sm:$0xff]  ;;  %v6575_v30 = vld [vmem:[#allocation17_spill] sm:$0xff]  ;;  %v6576_v36 = vld [vmem:[#allocation18_spill] sm:$0xff] }
 0x346   :  { %v2802_v47 = vmul.f32 -1.442695, %v1417_v26  ;;  %v1374_v48 = vpop.f32.mrb[35].mxu0  ;;  %v1415_v43 = vpop.f32.mrb[35].mxu1  ;;  %v2804_v52 = vmul.f32 -1.442695, %v1419_v28 }
 0x347   :  { %v2803_v49 = vmul.f32 -1.442695, %v1418_v37  ;;  %v6573_v28 = vld [vmem:[#allocation15_spill] sm:$0xff]  ;;  %v6578_v39 = vld [vmem:[#allocation20_spill] sm:$0xff]  ;;  %v6580_v41 = vld [vmem:[#allocation22_spill] sm:$0xff] }
 0x348   :  { %3052 = vpow2.f32 %v2802_v47  ;;  %v6577_v37 = vld [vmem:[#allocation19_spill] sm:$0xff]  ;;  %v6582_v47 = vld [vmem:[#allocation24_spill] sm:$0xff]  ;;  %v6583_v48 = vld [vmem:[#allocation25_spill] sm:$0xff] }
 0x349   :  { %3054 = vpow2.f32 %v2803_v49  ;;  %v6581_v45 = vld [vmem:[#allocation23_spill] sm:$0xff]  ;;  %v6584_v43 = vld [vmem:[#allocation26_spill] sm:$0xff] }
 0x34a   :  { %3056 = vtanh.f32 %v1420_v40  ;;  %v6579_v40 = vld [vmem:[#allocation21_spill] sm:$0xff]  ;;  %v6585_v49 = vld [vmem:[#allocation27_spill] sm:$0xff] }
 0x34b   :  { %3058 = vpow2.f32 %v2804_v52  ;;  %v6588_v52 = vld [vmem:[#allocation30_spill] sm:$0xff] }
 0x34f   :  { %v3051_v51 = vpop.eup %3050 }
 0x350   :  { %v1329_v55 = vmul.f32 %v3051_v51, %v3049_v50  ;;  %v6586_v50 = vld [vmem:[#allocation28_spill] sm:$0xff]  ;;  %v6587_v51 = vld [vmem:[#allocation29_spill] sm:$0xff] }
 0x352   :  { %v3053_v57 = vpop.eup %3052  ;;  %v1446_v59 = vpack.c.bf16 %v1329_v55, %v1329_v55  ;;  %v4696_v55 = vld [vmem:[%s5995_s4 + $0x44] ss:$16 sps:$4 sm:$0xff]  }
 0x353   :  { %v1430_v58 = vadd.f32 1.0, %v3053_v57  ;;  %v3055_v60 = vpop.eup %3054  ;;  %v4702_v57 = vld [vmem:[%s5995_s4 + $0x4c] ss:$16 sps:$4 sm:$0xff]  }
 0x354   :  { %v1431_v61 = vadd.f32 1.0, %v3055_v60  ;;  %1479 = vmatprep.mubr.bf16.mxu0 %v1446_v59  ;;  %1520 = vmatprep.mubr.bf16.mxu1 %v1446_v59  ;;  %v3057_v2 = vpop.eup %3056  ;;  %v4714_v59 = vld [vmem:[%s5995_s4 + $0x48] ss:$16 sps:$4 sm:$0xff]   ;;  %v4720_v60 = vld [vmem:[%s5995_s4 + $0x64] ss:$16 sps:$4 sm:$0xff]  }
 0x355   :  { %3060 = vrcp.f32 %v1430_v58  ;;  %v3059_v10 = vpop.eup %3058  ;;  %v4708_v58 = vld [vmem:[%s5995_s4 + $0x40] ss:$16 sps:$4 sm:$0xff]   ;;  %6590 = vst [vmem:[#allocation32_spill] sm:$0xff] %v4714_v59  ;;  %6591 = vst [vmem:[#allocation33_spill] sm:$0xff] %v4720_v60 }
 0x356   :  { %3062 = vrcp.f32 %v1431_v61  ;;  %v1432_v16 = vadd.f32 1.0, %v3059_v10  ;;  %6589 = vst [vmem:[#allocation31_spill] sm:$0xff] %v4708_v58  ;;  %v4726_v61 = vld [vmem:[%s5995_s4 + $0x6c] ss:$16 sps:$4 sm:$0xff]   ;;  %v4738_v10 = vld [vmem:[%s5995_s4 + $0x68] ss:$16 sps:$4 sm:$0xff]  }
 0x357   :  { %6592 = vst [vmem:[#allocation34_spill] sm:$0xff] %v4726_v61  ;;  %6594 = vst [vmem:[#allocation36_spill] sm:$0xff] %v4738_v10 }
 0x358   :  { %3064 = vrcp.f32 %v1432_v16  ;;  %v4762_v16 = vld [vmem:[%s5995_s4 + $0x88] ss:$16 sps:$4 sm:$0xff]  }
 0x359   :  { %6598 = vst [vmem:[#allocation40_spill] sm:$0xff] %v4762_v16 }
 0x35f   :  { %v3061_v62 = vpop.eup %3060 }
 0x360   :  { %v1441_v14 = vmul.f32 %v3061_v62, %v3057_v2  ;;  %v3063_v15 = vpop.eup %3062  ;;  %v4732_v2 = vld [vmem:[%s5995_s4 + $0x60] ss:$16 sps:$4 sm:$0xff]   ;;  %v4744_v62 = vld [vmem:[%s5995_s4 + $0x84] ss:$16 sps:$4 sm:$0xff]  }
 0x361   :  { %v1440_v17 = vmul.f32 %v3063_v15, %v4340_v32  ;;  %v6571_v32 = vld [vmem:[#allocation13_spill] sm:$0xff]  ;;  %6593 = vst [vmem:[#allocation35_spill] sm:$0xff] %v4732_v2  ;;  %6595 = vst [vmem:[#allocation37_spill] sm:$0xff] %v4744_v62 }
 0x362   :  { %v3065_v19 = vpop.eup %3064  ;;  %v4756_v15 = vld [vmem:[%s5995_s4 + $0x80] ss:$16 sps:$4 sm:$0xff]  }
 0x363   :  { %v4650_v18 = vadd.f32 %v1441_v14, %v1440_v17  ;;  %v4750_v14 = vld [vmem:[%s5995_s4 + $0x8c] ss:$16 sps:$4 sm:$0xff]   ;;  %6597 = vst [vmem:[#allocation39_spill] sm:$0xff] %v4756_v15  ;;  %v4768_v17 = vld [vmem:[%s5995_s4 + $0xa4] ss:$16 sps:$4 sm:$0xff]  }
 0x364   :  { %6596 = vst [vmem:[#allocation38_spill] sm:$0xff] %v4750_v14  ;;  %6599 = vst [vmem:[#allocation41_spill] sm:$0xff] %v4768_v17 }
 0x365   :  { %3066 = vtanh.f32 %v4650_v18 }
 0x36f   :  { %v3067_v22 = vpop.eup %3066 }
 0x370   :  { %v1444_v25 = vmul.f32 %v3067_v22, %v3065_v19  ;;  %v4774_v19 = vld [vmem:[%s5995_s4 + $0xac] ss:$16 sps:$4 sm:$0xff]   ;;  %v4780_v22 = vld [vmem:[%s5995_s4 + $0xa0] ss:$16 sps:$4 sm:$0xff]  }
 0x371   :  { %6600 = vst [vmem:[#allocation42_spill] sm:$0xff] %v4774_v19  ;;  %6601 = vst [vmem:[#allocation43_spill] sm:$0xff] %v4780_v22 }
 0x372   :  { %v1445_v26 = vpack.c.bf16 %v1444_v25, %v1444_v25  ;;  %v4786_v25 = vld [vmem:[%s5995_s4 + $0xa8] ss:$16 sps:$4 sm:$0xff]  }
 0x373   :  { %6602 = vst [vmem:[#allocation44_spill] sm:$0xff] %v4786_v25 }
 0x374   :  { %1480 = vmatmul.mubr.bf16.vlgmr.msra.gmra.mrb[36].mxu0 %v1445_v26  ;;  %1521 = vmatmul.mubr.bf16.vlgmr.msra.gmra.mrb[36].mxu1 %v1445_v26 }
 0x375   :  { %1559 = vmatpush1.bf16.msra.mxu0 %v4350_v0  ;;  %1600 = vmatpush1.bf16.msra.mxu1 %v4356_v63 }
 0x376   :  { %1560 = vmatprep.subr.bf16.mxu0 %v4362_v13  ;;  %1601 = vmatprep.subr.bf16.mxu1 %v4368_v3 }
 0x377   :  { %1590 = vmatprep.mubr.bf16.mxu0 %v6457_v7  ;;  %1631 = vmatprep.mubr.bf16.mxu1 %v6457_v7 }
 0x379   :  { %1561 = vmatpush1.bf16.msra.mxu0 %v4376_v21  ;;  %1602 = vmatpush1.bf16.msra.mxu1 %v4382_v1 }
 0x37a   :  { %1562 = vmatprep.subr.bf16.mxu0 %v4388_v24  ;;  %1603 = vmatprep.subr.bf16.mxu1 %v4394_v53 }
 0x37d   :  { %1563 = vmatpush1.bf16.msra.mxu0 %v4400_v8  ;;  %1604 = vmatpush1.bf16.msra.mxu1 %v4406_v31 }
 0x37e   :  { %1564 = vmatprep.subr.bf16.mxu0 %v4412_v20  ;;  %1605 = vmatprep.subr.bf16.mxu1 %v4418_v42 }
 0x381   :  { %1565 = vmatpush1.bf16.msra.mxu0 %v4424_v9  ;;  %1606 = vmatpush1.bf16.msra.mxu1 %v4430_v12 }
 0x382   :  { %1566 = vmatprep.subr.bf16.mxu0 %v4436_v11  ;;  %1607 = vmatprep.subr.bf16.mxu1 %v6571_v32 }
 0x385   :  { %1567 = vmatpush1.bf16.msra.mxu0 %v6572_v27  ;;  %1608 = vmatpush1.bf16.msra.mxu1 %v6573_v28 }
 0x386   :  { %1568 = vmatprep.subr.bf16.mxu0 %v6574_v29  ;;  %1609 = vmatprep.subr.bf16.mxu1 %v6575_v30 }
 0x389   :  { %1569 = vmatpush1.bf16.msra.mxu0 %v6576_v36  ;;  %1610 = vmatpush1.bf16.msra.mxu1 %v6577_v37 }
 0x38a   :  { %1570 = vmatprep.subr.bf16.mxu0 %v6578_v39  ;;  %1611 = vmatprep.subr.bf16.mxu1 %v6579_v40 }
 0x38d   :  { %1571 = vmatpush1.bf16.msra.mxu0 %v6580_v41  ;;  %1612 = vmatpush1.bf16.msra.mxu1 %v6581_v45 }
 0x38e   :  { %1572 = vmatprep.subr.bf16.mxu0 %v6582_v47  ;;  %1613 = vmatprep.subr.bf16.mxu1 %v6583_v48 }
 0x391   :  { %1573 = vmatpush1.bf16.msra.mxu0 %v4520_v6  ;;  %1614 = vmatpush1.bf16.msra.mxu1 %v6584_v43 }
 0x392   :  { %1670 = vmatprep.subr.bf16.mxu0 %v6585_v49  ;;  %1711 = vmatprep.subr.bf16.mxu1 %v6586_v50 }
 0x394   :  { %1591 = vmatmul.mubr.bf16.vlgmr.msra.gmra.mrb[40].mxu0 %v1445_v26  ;;  %1632 = vmatmul.mubr.bf16.vlgmr.msra.gmra.mrb[40].mxu1 %v1445_v26  ;;  %v4792_v26 = vld [vmem:[%s5995_s4 + $0xc4] ss:$16 sps:$4 sm:$0xff]  }
 0x395   :  { %1671 = vmatpush1.bf16.msra.mxu0 %v6587_v51  ;;  %1712 = vmatpush1.bf16.msra.mxu1 %v6588_v52  ;;  %6603 = vst [vmem:[#allocation45_spill] sm:$0xff] %v4792_v26 }
 0x396   :  { %1672 = vmatprep.subr.bf16.mxu0 %v4558_v35  ;;  %1713 = vmatprep.subr.bf16.mxu1 %v4564_v5 }
 0x399   :  { %1673 = vmatpush1.bf16.msra.mxu0 %v4570_v4  ;;  %1714 = vmatpush1.bf16.msra.mxu1 %v4576_v46 }
 0x39a   :  { %1674 = vmatprep.subr.bf16.mxu0 %v4696_v55  ;;  %1715 = vmatprep.subr.bf16.mxu1 %v4702_v57 }
 0x39d   :  { %1675 = vmatpush1.bf16.msra.mxu0 %v4708_v58  ;;  %1716 = vmatpush1.bf16.msra.mxu1 %v4714_v59 }
 0x39e   :  { %1676 = vmatprep.subr.bf16.mxu0 %v4720_v60  ;;  %1717 = vmatprep.subr.bf16.mxu1 %v4726_v61 }
 0x3a1   :  { %1677 = vmatpush1.bf16.msra.mxu0 %v4732_v2  ;;  %1718 = vmatpush1.bf16.msra.mxu1 %v4738_v10 }
 0x3a2   :  { %1678 = vmatprep.subr.bf16.mxu0 %v4744_v62  ;;  %1719 = vmatprep.subr.bf16.mxu1 %v4750_v14 }
 0x3a5   :  { %1679 = vmatpush1.bf16.msra.mxu0 %v4756_v15  ;;  %1720 = vmatpush1.bf16.msra.mxu1 %v4762_v16 }
 0x3a6   :  { %1680 = vmatprep.subr.bf16.mxu0 %v4768_v17  ;;  %1721 = vmatprep.subr.bf16.mxu1 %v4774_v19  ;;  %v4798_v19 = vld [vmem:[%s5995_s4 + $0xcc] ss:$16 sps:$4 sm:$0xff]  }
 0x3a7   :  { %6604 = vst [vmem:[#allocation46_spill] sm:$0xff] %v4798_v19 }
 0x3a9   :  { %1681 = vmatpush1.bf16.msra.mxu0 %v4780_v22  ;;  %1722 = vmatpush1.bf16.msra.mxu1 %v4786_v25  ;;  %v4804_v22 = vld [vmem:[%s5995_s4 + $0xc0] ss:$16 sps:$4 sm:$0xff]   ;;  %v4810_v25 = vld [vmem:[%s5995_s4 + $0xc8] ss:$16 sps:$4 sm:$0xff]  }
 0x3aa   :  { %1682 = vmatprep.subr.bf16.mxu0 %v4792_v26  ;;  %1723 = vmatprep.subr.bf16.mxu1 %v4798_v19  ;;  %6605 = vst [vmem:[#allocation62_spill] sm:$0xff] %v4804_v22  ;;  %6606 = vst [vmem:[#allocation63_spill] sm:$0xff] %v4810_v25  ;;  %v4816_v26 = vld [vmem:[%s5995_s4 + $0xe4] ss:$16 sps:$4 sm:$0xff]   ;;  %v4822_v19 = vld [vmem:[%s5995_s4 + $0xec] ss:$16 sps:$4 sm:$0xff]  }
 0x3ab   :  { %6607 = vst [vmem:[#allocation64_spill] sm:$0xff] %v4816_v26  ;;  %6608 = vst [vmem:[#allocation65_spill] sm:$0xff] %v4822_v19 }
 0x3ad   :  { %1683 = vmatpush1.bf16.msra.mxu0 %v4804_v22  ;;  %1724 = vmatpush1.bf16.msra.mxu1 %v4810_v25  ;;  %v4828_v22 = vld [vmem:[%s5995_s4 + $0xe0] ss:$16 sps:$4 sm:$0xff]   ;;  %v4834_v25 = vld [vmem:[%s5995_s4 + $0xe8] ss:$16 sps:$4 sm:$0xff]  }
 0x3ae   :  { %1684 = vmatprep.subr.bf16.mxu0 %v4816_v26  ;;  %1725 = vmatprep.subr.bf16.mxu1 %v4822_v19  ;;  %6609 = vst [vmem:[#allocation66_spill] sm:$0xff] %v4828_v22  ;;  %6610 = vst [vmem:[#allocation47_spill] sm:$0xff] %v4834_v25  ;;  %v4840_v26 = vld [vmem:[%s5995_s4 + $0x104] ss:$16 sps:$4 sm:$0xff]   ;;  %v4846_v19 = vld [vmem:[%s5995_s4 + $0x10c] ss:$16 sps:$4 sm:$0xff]  }
 0x3af   :  { %6611 = vst [vmem:[#allocation48_spill] sm:$0xff] %v4840_v26  ;;  %6612 = vst [vmem:[#allocation49_spill] sm:$0xff] %v4846_v19 }
 0x3b1   :  { %1685 = vmatpush1.bf16.msra.mxu0 %v4828_v22  ;;  %1726 = vmatpush1.bf16.msra.mxu1 %v4834_v25  ;;  %v4852_v22 = vld [vmem:[%s5995_s4 + $0x100] ss:$16 sps:$4 sm:$0xff]   ;;  %v4858_v25 = vld [vmem:[%s5995_s4 + $0x108] ss:$16 sps:$4 sm:$0xff]  }
 0x3b2   :  { %1686 = vmatprep.subr.bf16.mxu0 %v4840_v26  ;;  %1727 = vmatprep.subr.bf16.mxu1 %v4846_v19  ;;  %6613 = vst [vmem:[#allocation50_spill] sm:$0xff] %v4852_v22  ;;  %6614 = vst [vmem:[#allocation51_spill] sm:$0xff] %v4858_v25  ;;  %v4864_v26 = vld [vmem:[%s5995_s4 + $0x124] ss:$16 sps:$4 sm:$0xff]   ;;  %v4870_v19 = vld [vmem:[%s5995_s4 + $0x12c] ss:$16 sps:$4 sm:$0xff]  }
 0x3b3   :  { %6615 = vst [vmem:[#allocation52_spill] sm:$0xff] %v4864_v26  ;;  %6616 = vst [vmem:[#allocation53_spill] sm:$0xff] %v4870_v19 }
 0x3b5   :  { %1687 = vmatpush1.bf16.msra.mxu0 %v4852_v22  ;;  %1728 = vmatpush1.bf16.msra.mxu1 %v4858_v25  ;;  %v4876_v22 = vld [vmem:[%s5995_s4 + $0x120] ss:$16 sps:$4 sm:$0xff]   ;;  %v4882_v25 = vld [vmem:[%s5995_s4 + $0x128] ss:$16 sps:$4 sm:$0xff]  }
 0x3b6   :  { %1688 = vmatprep.subr.bf16.mxu0 %v4864_v26  ;;  %1729 = vmatprep.subr.bf16.mxu1 %v4870_v19  ;;  %6617 = vst [vmem:[#allocation54_spill] sm:$0xff] %v4876_v22  ;;  %6618 = vst [vmem:[#allocation55_spill] sm:$0xff] %v4882_v25  ;;  %v4888_v26 = vld [vmem:[%s5995_s4 + $0x144] ss:$16 sps:$4 sm:$0xff]   ;;  %v4894_v19 = vld [vmem:[%s5995_s4 + $0x14c] ss:$16 sps:$4 sm:$0xff]  }
 0x3b7   :  { %6619 = vst [vmem:[#allocation56_spill] sm:$0xff] %v4888_v26  ;;  %6620 = vst [vmem:[#allocation57_spill] sm:$0xff] %v4894_v19 }
 0x3b9   :  { %1689 = vmatpush1.bf16.msra.mxu0 %v4876_v22  ;;  %1730 = vmatpush1.bf16.msra.mxu1 %v4882_v25  ;;  %v4900_v22 = vld [vmem:[%s5995_s4 + $0x140] ss:$16 sps:$4 sm:$0xff]   ;;  %v4906_v25 = vld [vmem:[%s5995_s4 + $0x148] ss:$16 sps:$4 sm:$0xff]  }
 0x3ba   :  { %1690 = vmatprep.subr.bf16.mxu0 %v4888_v26  ;;  %1731 = vmatprep.subr.bf16.mxu1 %v4894_v19  ;;  %6621 = vst [vmem:[#allocation58_spill] sm:$0xff] %v4900_v22  ;;  %6622 = vst [vmem:[#allocation59_spill] sm:$0xff] %v4906_v25  ;;  %v4912_v26 = vld [vmem:[%s5995_s4 + $0x164] ss:$16 sps:$4 sm:$0xff]   ;;  %v4918_v19 = vld [vmem:[%s5995_s4 + $0x16c] ss:$16 sps:$4 sm:$0xff]  }
 0x3bb   :  { %6623 = vst [vmem:[#allocation60_spill] sm:$0xff] %v4912_v26  ;;  %6624 = vst [vmem:[#allocation61_spill] sm:$0xff] %v4918_v19 }
 0x3bd   :  { %1691 = vmatpush1.bf16.msra.mxu0 %v4900_v22  ;;  %1732 = vmatpush1.bf16.msra.mxu1 %v4906_v25  ;;  %v4924_v22 = vld [vmem:[%s5995_s4 + $0x160] ss:$16 sps:$4 sm:$0xff]   ;;  %v4930_v25 = vld [vmem:[%s5995_s4 + $0x168] ss:$16 sps:$4 sm:$0xff]  }
 0x3be   :  { %1692 = vmatprep.subr.bf16.mxu0 %v4912_v26  ;;  %1733 = vmatprep.subr.bf16.mxu1 %v4918_v19  ;;  %6625 = vst [vmem:[#allocation7_spill] sm:$0xff] %v4924_v22  ;;  %6626 = vst [vmem:[#allocation8_spill] sm:$0xff] %v4930_v25  ;;  %v4936_v26 = vld [vmem:[%s5995_s4 + $0x184] ss:$16 sps:$4 sm:$0xff]   ;;  %v4942_v19 = vld [vmem:[%s5995_s4 + $0x18c] ss:$16 sps:$4 sm:$0xff]  }
 0x3bf   :  { %6627 = vst [vmem:[#allocation67_spill] sm:$0xff] %v4936_v26  ;;  %6628 = vst [vmem:[#allocation68_spill] sm:$0xff] %v4942_v19 }
 0x3c1   :  { %1693 = vmatpush1.bf16.msra.mxu0 %v4924_v22  ;;  %1734 = vmatpush1.bf16.msra.mxu1 %v4930_v25  ;;  %v4948_v22 = vld [vmem:[%s5995_s4 + $0x180] ss:$16 sps:$4 sm:$0xff]   ;;  %v4954_v25 = vld [vmem:[%s5995_s4 + $0x188] ss:$16 sps:$4 sm:$0xff]  }
 0x3c2   :  { %1694 = vmatprep.subr.bf16.mxu0 %v4936_v26  ;;  %1735 = vmatprep.subr.bf16.mxu1 %v4942_v19  ;;  %6629 = vst [vmem:[#allocation69_spill] sm:$0xff] %v4948_v22  ;;  %6630 = vst [vmem:[#allocation70_spill] sm:$0xff] %v4954_v25  ;;  %v4960_v26 = vld [vmem:[%s5995_s4 + $0x1a4] ss:$16 sps:$4 sm:$0xff]   ;;  %v4966_v19 = vld [vmem:[%s5995_s4 + $0x1ac] ss:$16 sps:$4 sm:$0xff]  }
 0x3c3   :  { %6631 = vst [vmem:[#allocation13_spill] sm:$0xff] %v4960_v26  ;;  %6632 = vst [vmem:[#allocation14_spill] sm:$0xff] %v4966_v19 }
 0x3c5   :  { %1695 = vmatpush1.bf16.msra.mxu0 %v4948_v22  ;;  %1736 = vmatpush1.bf16.msra.mxu1 %v4954_v25  ;;  %v4972_v22 = vld [vmem:[%s5995_s4 + $0x1a0] ss:$16 sps:$4 sm:$0xff]   ;;  %v4978_v25 = vld [vmem:[%s5995_s4 + $0x1a8] ss:$16 sps:$4 sm:$0xff]  }
 0x3c6   :  { %1696 = vmatprep.subr.bf16.mxu0 %v4960_v26  ;;  %1737 = vmatprep.subr.bf16.mxu1 %v4966_v19  ;;  %6633 = vst [vmem:[#allocation15_spill] sm:$0xff] %v4972_v22  ;;  %6634 = vst [vmem:[#allocation16_spill] sm:$0xff] %v4978_v25  ;;  %v4984_v26 = vld [vmem:[%s5995_s4 + $0x1c4] ss:$16 sps:$4 sm:$0xff]   ;;  %v4990_v19 = vld [vmem:[%s5995_s4 + $0x1cc] ss:$16 sps:$4 sm:$0xff]  }
 0x3c7   :  { %6635 = vst [vmem:[#allocation17_spill] sm:$0xff] %v4984_v26  ;;  %6636 = vst [vmem:[#allocation18_spill] sm:$0xff] %v4990_v19 }
 0x3c9   :  { %1697 = vmatpush1.bf16.msra.mxu0 %v4972_v22  ;;  %1738 = vmatpush1.bf16.msra.mxu1 %v4978_v25  ;;  %v4996_v22 = vld [vmem:[%s5995_s4 + $0x1c0] ss:$16 sps:$4 sm:$0xff]   ;;  %v5002_v25 = vld [vmem:[%s5995_s4 + $0x1c8] ss:$16 sps:$4 sm:$0xff]  }
 0x3ca   :  { %1698 = vmatprep.subr.bf16.mxu0 %v4984_v26  ;;  %1739 = vmatprep.subr.bf16.mxu1 %v4990_v19  ;;  %6637 = vst [vmem:[#allocation19_spill] sm:$0xff] %v4996_v22  ;;  %6638 = vst [vmem:[#allocation20_spill] sm:$0xff] %v5002_v25  ;;  %v5008_v26 = vld [vmem:[%s5995_s4 + $0x1e4] ss:$16 sps:$4 sm:$0xff]   ;;  %v5014_v19 = vld [vmem:[%s5995_s4 + $0x1ec] ss:$16 sps:$4 sm:$0xff]  }
 0x3cb   :  { %6639 = vst [vmem:[#allocation21_spill] sm:$0xff] %v5008_v26  ;;  %6640 = vst [vmem:[#allocation22_spill] sm:$0xff] %v5014_v19 }
 0x3cd   :  { %1699 = vmatpush1.bf16.msra.mxu0 %v4996_v22  ;;  %1740 = vmatpush1.bf16.msra.mxu1 %v5002_v25  ;;  %v5020_v22 = vld [vmem:[%s5995_s4 + $0x1e0] ss:$16 sps:$4 sm:$0xff]   ;;  %v5026_v25 = vld [vmem:[%s5995_s4 + $0x1e8] ss:$16 sps:$4 sm:$0xff]  }
 0x3ce   :  { %1700 = vmatprep.subr.bf16.mxu0 %v5008_v26  ;;  %1741 = vmatprep.subr.bf16.mxu1 %v5014_v19  ;;  %6641 = vst [vmem:[#allocation23_spill] sm:$0xff] %v5020_v22  ;;  %6642 = vst [vmem:[#allocation24_spill] sm:$0xff] %v5026_v25 }
 0x3d1   :  { %1701 = vmatpush1.bf16.msra.mxu0 %v5020_v22  ;;  %1742 = vmatpush1.bf16.msra.mxu1 %v5026_v25 }
 0x3d2   :  { %1781 = vmatprep.subr.bf16.mxu0 %v6561_v33  ;;  %1822 = vmatprep.subr.bf16.mxu1 %v6562_v34 }
 0x447   :  { %v1481_v26 = vpop.f32.mrb[36].mxu0  ;;  %v1522_v19 = vpop.f32.mrb[36].mxu1 }
 0x448   :  { %v1482_v17 = vadd.f32 %v1481_v26, %v6563_v38  ;;  %v1483_v16 = vpop.f32.mrb[37].mxu0  ;;  %v1524_v15 = vpop.f32.mrb[37].mxu1  ;;  %v1523_v33 = vadd.f32 %v1522_v19, %v6565_v54  ;;  %v6646_v54 = vld [vmem:[#allocation74_spill] sm:$0xff] }
 0x449   :  { %v1484_v14 = vadd.f32 %v1483_v16, %v6564_v44  ;;  %v1485_v22 = vpop.f32.mrb[38].mxu0  ;;  %v1526_v62 = vpop.f32.mrb[38].mxu1  ;;  %v1525_v34 = vadd.f32 %v1524_v15, %v6566_v56 }
 0x44a   :  { %v2805_v10 = vmul.f32 -1.442695, %v1482_v17  ;;  %v1486_v2 = vpop.f32.mrb[39].mxu0  ;;  %v1527_v61 = vpop.f32.mrb[39].mxu1  ;;  %v2807_v25 = vmul.f32 -1.442695, %v1523_v33 }
 0x44b   :  { %v2806_v60 = vmul.f32 -1.442695, %v1484_v14  ;;  %v6643_v33 = vld [vmem:[#allocation71_spill] sm:$0xff] }
 0x44c   :  { %3068 = vpow2.f32 %v2805_v10 }
 0x44d   :  { %3070 = vpow2.f32 %v2806_v60 }
 0x44e   :  { %3072 = vtanh.f32 %v1525_v34  ;;  %v6644_v34 = vld [vmem:[#allocation72_spill] sm:$0xff] }
 0x44f   :  { %3074 = vpow2.f32 %v2807_v25 }
 0x456   :  { %v3069_v59 = vpop.eup %3068 }
 0x457   :  { %v1538_v58 = vadd.f32 1.0, %v3069_v59  ;;  %v3071_v26 = vpop.eup %3070 }
 0x458   :  { %v1539_v16 = vadd.f32 1.0, %v3071_v26  ;;  %v3073_v62 = vpop.eup %3072  ;;  %v6645_v26 = vld [vmem:[#allocation73_spill] sm:$0xff] }
 0x459   :  { %3076 = vrcp.f32 %v1538_v58  ;;  %v3075_v17 = vpop.eup %3074 }
 0x45a   :  { %3078 = vrcp.f32 %v1539_v16  ;;  %v1540_v10 = vadd.f32 1.0, %v3075_v17 }
 0x45c   :  { %3080 = vrcp.f32 %v1540_v10 }
 0x463   :  { %v3077_v2 = vpop.eup %3076 }
 0x464   :  { %v1549_v61 = vmul.f32 %v3077_v2, %v3073_v62  ;;  %v3079_v14 = vpop.eup %3078 }
 0x465   :  { %v1548_v60 = vmul.f32 %v3079_v14, %v4642_v23 }
 0x466   :  { %v3081_v14 = vpop.eup %3080 }
 0x467   :  { %v1592_v19 = vpop.f32.mrb[40].mxu0  ;;  %v1633_v22 = vpop.f32.mrb[40].mxu1  ;;  %v5036_v15 = vadd.f32 %v1549_v61, %v1548_v60 }
 0x468   :  { %v1640_v59 = vadd.f32 %v1592_v19, %v6643_v33  ;;  %v1642_v56 = vadd.f32 %v1633_v22, %v6644_v34  ;;  %v1594_v25 = vpop.f32.mrb[41].mxu0  ;;  %v1635_v58 = vpop.f32.mrb[41].mxu1 }
 0x469   :  { %v1641_v16 = vadd.f32 %v1594_v25, %v6645_v26  ;;  %v1643_v44 = vadd.f32 %v1635_v58, %v6646_v54  ;;  %v1596_v62 = vpop.f32.mrb[42].mxu0  ;;  %v1637_v2 = vpop.f32.mrb[42].mxu1  ;;  %3082 = vtanh.f32 %v5036_v15 }
 0x46a   :  { %v2808_v17 = vmul.f32 -1.442695, %v1640_v59  ;;  %v1597_v38 = vpop.f32.mrb[43].mxu0  ;;  %v1638_v23 = vpop.f32.mrb[43].mxu1  ;;  %v2810_v19 = vmul.f32 -1.442695, %v1642_v56 }
 0x46b   :  { %v2809_v61 = vmul.f32 -1.442695, %v1641_v16 }
 0x46c   :  { %3084 = vpow2.f32 %v2808_v17 }
 0x46d   :  { %3086 = vpow2.f32 %v2809_v61 }
 0x46e   :  { %3088 = vtanh.f32 %v1643_v44 }
 0x46f   :  { %3090 = vpow2.f32 %v2810_v19  ;;  %v6688_v19 = vld [vmem:[#allocation70_spill] sm:$0xff] }
 0x473   :  { %v3083_v60 = vpop.eup %3082 }
 0x474   :  { %v1552_v22 = vmul.f32 %v3083_v60, %v3081_v14  ;;  %v6686_v14 = vld [vmem:[#allocation68_spill] sm:$0xff]  ;;  %v6687_v60 = vld [vmem:[#allocation69_spill] sm:$0xff] }
 0x476   :  { %v3085_v33 = vpop.eup %3084  ;;  %v1669_v34 = vpack.c.bf16 %v1552_v22, %v1552_v22  ;;  %v6689_v22 = vld [vmem:[#allocation13_spill] sm:$0xff] }
 0x477   :  { %v1653_v10 = vadd.f32 1.0, %v3085_v33  ;;  %v3087_v25 = vpop.eup %3086  ;;  %v6690_v33 = vld [vmem:[#allocation14_spill] sm:$0xff] }
 0x478   :  { %v1654_v54 = vadd.f32 1.0, %v3087_v25  ;;  %1702 = vmatprep.mubr.bf16.mxu0 %v1669_v34  ;;  %1743 = vmatprep.mubr.bf16.mxu1 %v1669_v34  ;;  %v3089_v38 = vpop.eup %3088  ;;  %v6692_v34 = vld [vmem:[#allocation16_spill] sm:$0xff]  ;;  %v6693_v25 = vld [vmem:[#allocation17_spill] sm:$0xff] }
 0x479   :  { %3092 = vrcp.f32 %v1653_v10  ;;  %v3091_v59 = vpop.eup %3090  ;;  %v6691_v10 = vld [vmem:[#allocation15_spill] sm:$0xff] }
 0x47a   :  { %3094 = vrcp.f32 %v1654_v54  ;;  %v1655_v62 = vadd.f32 1.0, %v3091_v59  ;;  %v6694_v54 = vld [vmem:[#allocation18_spill] sm:$0xff]  ;;  %v6696_v59 = vld [vmem:[#allocation20_spill] sm:$0xff] }
 0x47c   :  { %3096 = vrcp.f32 %v1655_v62  ;;  %v6700_v62 = vld [vmem:[#allocation24_spill] sm:$0xff] }
 0x483   :  { %v3093_v58 = vpop.eup %3092 }
 0x484   :  { %v1664_v26 = vmul.f32 %v3093_v58, %v3089_v38  ;;  %v3095_v16 = vpop.eup %3094  ;;  %v6695_v38 = vld [vmem:[#allocation19_spill] sm:$0xff]  ;;  %v6697_v58 = vld [vmem:[#allocation21_spill] sm:$0xff] }
 0x485   :  { %v1663_v56 = vmul.f32 %v3095_v16, %v4650_v18  ;;  %v6667_v18 = vld [vmem:[#allocation66_spill] sm:$0xff]  ;;  %v6699_v16 = vld [vmem:[#allocation23_spill] sm:$0xff] }
 0x486   :  { %v3097_v44 = vpop.eup %3096 }
 0x487   :  { %v5044_v2 = vadd.f32 %v1664_v26, %v1663_v56  ;;  %v6698_v26 = vld [vmem:[#allocation22_spill] sm:$0xff]  ;;  %v5146_v56 = vld [vmem:[%s5994_s2 + $0x4] ss:$16 sps:$4 sm:$0xff]  }
 0x488   :  { %6701 = vst [vmem:[#allocation25_spill] sm:$0xff] %v5146_v56 }
 0x489   :  { %3098 = vtanh.f32 %v5044_v2 }
 0x493   :  { %v3099_v17 = vpop.eup %3098 }
 0x494   :  { %v1667_v23 = vmul.f32 %v3099_v17, %v3097_v44  ;;  %v5152_v44 = vld [vmem:[%s5994_s2 + $0xc] ss:$16 sps:$4 sm:$0xff]  }
 0x495   :  { %6702 = vst [vmem:[#allocation26_spill] sm:$0xff] %v5152_v44 }
 0x496   :  { %v1668_v61 = vpack.c.bf16 %v1667_v23, %v1667_v23 }
 0x498   :  { %1703 = vmatmul.mubr.bf16.vlgmr.msra.gmra.mrb[44].mxu0 %v1668_v61  ;;  %1744 = vmatmul.mubr.bf16.vlgmr.msra.gmra.mrb[44].mxu1 %v1668_v61 }
 0x499   :  { %1782 = vmatpush1.bf16.msra.mxu0 %v4350_v0  ;;  %1823 = vmatpush1.bf16.msra.mxu1 %v4356_v63  ;;  %v6647_v0 = vld [vmem:[#allocation31_spill] sm:$0xff]  ;;  %v6648_v63 = vld [vmem:[#allocation32_spill] sm:$0xff] }
 0x49a   :  { %1783 = vmatprep.subr.bf16.mxu0 %v4362_v13  ;;  %1824 = vmatprep.subr.bf16.mxu1 %v4368_v3  ;;  %v6649_v13 = vld [vmem:[#allocation33_spill] sm:$0xff]  ;;  %v6650_v3 = vld [vmem:[#allocation34_spill] sm:$0xff] }
 0x49b   :  { %1813 = vmatprep.mubr.bf16.mxu0 %v6457_v7  ;;  %1854 = vmatprep.mubr.bf16.mxu1 %v6457_v7 }
 0x49d   :  { %1784 = vmatpush1.bf16.msra.mxu0 %v4376_v21  ;;  %1825 = vmatpush1.bf16.msra.mxu1 %v4382_v1  ;;  %v6651_v21 = vld [vmem:[#allocation35_spill] sm:$0xff]  ;;  %v6652_v1 = vld [vmem:[#allocation36_spill] sm:$0xff] }
 0x49e   :  { %1785 = vmatprep.subr.bf16.mxu0 %v4388_v24  ;;  %1826 = vmatprep.subr.bf16.mxu1 %v4394_v53  ;;  %v6653_v24 = vld [vmem:[#allocation37_spill] sm:$0xff]  ;;  %v6654_v53 = vld [vmem:[#allocation38_spill] sm:$0xff] }
 0x4a1   :  { %1786 = vmatpush1.bf16.msra.mxu0 %v4400_v8  ;;  %1827 = vmatpush1.bf16.msra.mxu1 %v4406_v31  ;;  %v6655_v8 = vld [vmem:[#allocation39_spill] sm:$0xff]  ;;  %v6656_v31 = vld [vmem:[#allocation40_spill] sm:$0xff] }
 0x4a2   :  { %1787 = vmatprep.subr.bf16.mxu0 %v4412_v20  ;;  %1828 = vmatprep.subr.bf16.mxu1 %v4418_v42  ;;  %v6657_v20 = vld [vmem:[#allocation41_spill] sm:$0xff]  ;;  %v6658_v42 = vld [vmem:[#allocation42_spill] sm:$0xff] }
 0x4a5   :  { %1788 = vmatpush1.bf16.msra.mxu0 %v4424_v9  ;;  %1829 = vmatpush1.bf16.msra.mxu1 %v4430_v12  ;;  %v6659_v9 = vld [vmem:[#allocation43_spill] sm:$0xff]  ;;  %v6660_v12 = vld [vmem:[#allocation44_spill] sm:$0xff] }
 0x4a6   :  { %1789 = vmatprep.subr.bf16.mxu0 %v4436_v11  ;;  %1830 = vmatprep.subr.bf16.mxu1 %v6571_v32  ;;  %v6661_v11 = vld [vmem:[#allocation45_spill] sm:$0xff]  ;;  %v6668_v32 = vld [vmem:[#allocation47_spill] sm:$0xff] }
 0x4a9   :  { %1790 = vmatpush1.bf16.msra.mxu0 %v6572_v27  ;;  %1831 = vmatpush1.bf16.msra.mxu1 %v6573_v28  ;;  %v6669_v27 = vld [vmem:[#allocation48_spill] sm:$0xff]  ;;  %v6670_v28 = vld [vmem:[#allocation49_spill] sm:$0xff] }
 0x4aa   :  { %1791 = vmatprep.subr.bf16.mxu0 %v6574_v29  ;;  %1832 = vmatprep.subr.bf16.mxu1 %v6575_v30  ;;  %v6671_v29 = vld [vmem:[#allocation50_spill] sm:$0xff]  ;;  %v6672_v30 = vld [vmem:[#allocation51_spill] sm:$0xff] }
 0x4ad   :  { %1792 = vmatpush1.bf16.msra.mxu0 %v6576_v36  ;;  %1833 = vmatpush1.bf16.msra.mxu1 %v6577_v37  ;;  %v6673_v36 = vld [vmem:[#allocation52_spill] sm:$0xff]  ;;  %v6674_v37 = vld [vmem:[#allocation53_spill] sm:$0xff] }
 0x4ae   :  { %1793 = vmatprep.subr.bf16.mxu0 %v6578_v39  ;;  %1834 = vmatprep.subr.bf16.mxu1 %v6579_v40  ;;  %v6675_v39 = vld [vmem:[#allocation54_spill] sm:$0xff]  ;;  %v6676_v40 = vld [vmem:[#allocation55_spill] sm:$0xff] }
 0x4b1   :  { %1794 = vmatpush1.bf16.msra.mxu0 %v6580_v41  ;;  %1835 = vmatpush1.bf16.msra.mxu1 %v6581_v45  ;;  %v6677_v41 = vld [vmem:[#allocation56_spill] sm:$0xff]  ;;  %v6678_v45 = vld [vmem:[#allocation57_spill] sm:$0xff] }
 0x4b2   :  { %1795 = vmatprep.subr.bf16.mxu0 %v6582_v47  ;;  %1836 = vmatprep.subr.bf16.mxu1 %v6583_v48  ;;  %v6679_v47 = vld [vmem:[#allocation58_spill] sm:$0xff]  ;;  %v6680_v48 = vld [vmem:[#allocation59_spill] sm:$0xff] }
 0x4b5   :  { %1796 = vmatpush1.bf16.msra.mxu0 %v4520_v6  ;;  %1837 = vmatpush1.bf16.msra.mxu1 %v6584_v43  ;;  %v6663_v6 = vld [vmem:[#allocation62_spill] sm:$0xff]  ;;  %v6681_v43 = vld [vmem:[#allocation60_spill] sm:$0xff] }
 0x4b6   :  { %1893 = vmatprep.subr.bf16.mxu0 %v6585_v49  ;;  %1934 = vmatprep.subr.bf16.mxu1 %v6586_v50  ;;  %v6682_v49 = vld [vmem:[#allocation61_spill] sm:$0xff]  ;;  %v6683_v50 = vld [vmem:[#allocation7_spill] sm:$0xff] }
 0x4b8   :  { %1814 = vmatmul.mubr.bf16.vlgmr.msra.gmra.mrb[48].mxu0 %v1668_v61  ;;  %1855 = vmatmul.mubr.bf16.vlgmr.msra.gmra.mrb[48].mxu1 %v1668_v61  ;;  %v6703_v61 = vld [vmem:[#allocation9_spill] sm:$0xff] }
 0x4b9   :  { %1894 = vmatpush1.bf16.msra.mxu0 %v6587_v51  ;;  %1935 = vmatpush1.bf16.msra.mxu1 %v6588_v52  ;;  %v6684_v51 = vld [vmem:[#allocation8_spill] sm:$0xff]  ;;  %v6685_v52 = vld [vmem:[#allocation67_spill] sm:$0xff] }
 0x4ba   :  { %1895 = vmatprep.subr.bf16.mxu0 %v4558_v35  ;;  %1936 = vmatprep.subr.bf16.mxu1 %v4564_v5  ;;  %v6662_v35 = vld [vmem:[#allocation46_spill] sm:$0xff]  ;;  %v6666_v5 = vld [vmem:[#allocation65_spill] sm:$0xff] }
 0x4bd   :  { %1896 = vmatpush1.bf16.msra.mxu0 %v4570_v4  ;;  %1937 = vmatpush1.bf16.msra.mxu1 %v4576_v46  ;;  %v6664_v4 = vld [vmem:[#allocation63_spill] sm:$0xff]  ;;  %v6665_v46 = vld [vmem:[#allocation64_spill] sm:$0xff] }
 0x4be   :  { %1897 = vmatprep.subr.bf16.mxu0 %v4696_v55  ;;  %1938 = vmatprep.subr.bf16.mxu1 %v4702_v57 }
 0x4c1   :  { %1898 = vmatpush1.bf16.msra.mxu0 %v6647_v0  ;;  %1939 = vmatpush1.bf16.msra.mxu1 %v6648_v63 }
 0x4c2   :  { %1899 = vmatprep.subr.bf16.mxu0 %v6649_v13  ;;  %1940 = vmatprep.subr.bf16.mxu1 %v6650_v3 }
 0x4c5   :  { %1900 = vmatpush1.bf16.msra.mxu0 %v6651_v21  ;;  %1941 = vmatpush1.bf16.msra.mxu1 %v6652_v1 }
 0x4c6   :  { %1901 = vmatprep.subr.bf16.mxu0 %v6653_v24  ;;  %1942 = vmatprep.subr.bf16.mxu1 %v6654_v53 }
 0x4c9   :  { %1902 = vmatpush1.bf16.msra.mxu0 %v6655_v8  ;;  %1943 = vmatpush1.bf16.msra.mxu1 %v6656_v31 }
 0x4ca   :  { %1903 = vmatprep.subr.bf16.mxu0 %v6657_v20  ;;  %1944 = vmatprep.subr.bf16.mxu1 %v6658_v42 }
 0x4cd   :  { %1904 = vmatpush1.bf16.msra.mxu0 %v6659_v9  ;;  %1945 = vmatpush1.bf16.msra.mxu1 %v6660_v12 }
 0x4ce   :  { %1905 = vmatprep.subr.bf16.mxu0 %v6661_v11  ;;  %1946 = vmatprep.subr.bf16.mxu1 %v6662_v35 }
 0x4d1   :  { %1906 = vmatpush1.bf16.msra.mxu0 %v6663_v6  ;;  %1947 = vmatpush1.bf16.msra.mxu1 %v6664_v4 }
 0x4d2   :  { %1907 = vmatprep.subr.bf16.mxu0 %v6665_v46  ;;  %1948 = vmatprep.subr.bf16.mxu1 %v6666_v5 }
 0x4d5   :  { %1908 = vmatpush1.bf16.msra.mxu0 %v6667_v18  ;;  %1949 = vmatpush1.bf16.msra.mxu1 %v6668_v32 }
 0x4d6   :  { %1909 = vmatprep.subr.bf16.mxu0 %v6669_v27  ;;  %1950 = vmatprep.subr.bf16.mxu1 %v6670_v28 }
 0x4d9   :  { %1910 = vmatpush1.bf16.msra.mxu0 %v6671_v29  ;;  %1951 = vmatpush1.bf16.msra.mxu1 %v6672_v30 }
 0x4da   :  { %1911 = vmatprep.subr.bf16.mxu0 %v6673_v36  ;;  %1952 = vmatprep.subr.bf16.mxu1 %v6674_v37 }
 0x4dd   :  { %1912 = vmatpush1.bf16.msra.mxu0 %v6675_v39  ;;  %1953 = vmatpush1.bf16.msra.mxu1 %v6676_v40 }
 0x4de   :  { %1913 = vmatprep.subr.bf16.mxu0 %v6677_v41  ;;  %1954 = vmatprep.subr.bf16.mxu1 %v6678_v45 }
 0x4e1   :  { %1914 = vmatpush1.bf16.msra.mxu0 %v6679_v47  ;;  %1955 = vmatpush1.bf16.msra.mxu1 %v6680_v48 }
 0x4e2   :  { %1915 = vmatprep.subr.bf16.mxu0 %v6681_v43  ;;  %1956 = vmatprep.subr.bf16.mxu1 %v6682_v49 }
 0x4e5   :  { %1916 = vmatpush1.bf16.msra.mxu0 %v6683_v50  ;;  %1957 = vmatpush1.bf16.msra.mxu1 %v6684_v51 }
 0x4e6   :  { %1917 = vmatprep.subr.bf16.mxu0 %v6685_v52  ;;  %1958 = vmatprep.subr.bf16.mxu1 %v6686_v14 }
 0x4e9   :  { %1918 = vmatpush1.bf16.msra.mxu0 %v6687_v60  ;;  %1959 = vmatpush1.bf16.msra.mxu1 %v6688_v19  ;;  %v6706_v19 = vld [vmem:[#allocation12_spill] sm:$0xff] }
 0x4ea   :  { %1919 = vmatprep.subr.bf16.mxu0 %v6689_v22  ;;  %1960 = vmatprep.subr.bf16.mxu1 %v6690_v33  ;;  %v6705_v33 = vld [vmem:[#allocation11_spill] sm:$0xff] }
 0x4ed   :  { %1920 = vmatpush1.bf16.msra.mxu0 %v6691_v10  ;;  %1961 = vmatpush1.bf16.msra.mxu1 %v6692_v34 }
 0x4ee   :  { %1921 = vmatprep.subr.bf16.mxu0 %v6693_v25  ;;  %1962 = vmatprep.subr.bf16.mxu1 %v6694_v54 }
 0x4f1   :  { %1922 = vmatpush1.bf16.msra.mxu0 %v6695_v38  ;;  %1963 = vmatpush1.bf16.msra.mxu1 %v6696_v59 }
 0x4f2   :  { %1923 = vmatprep.subr.bf16.mxu0 %v6697_v58  ;;  %1964 = vmatprep.subr.bf16.mxu1 %v6698_v26  ;;  %v6704_v58 = vld [vmem:[#allocation10_spill] sm:$0xff] }
 0x4f5   :  { %1924 = vmatpush1.bf16.msra.mxu0 %v6699_v16  ;;  %1965 = vmatpush1.bf16.msra.mxu1 %v6700_v62 }
 0x4f6   :  { %2004 = vmatprep.subr.bf16.mxu0 %v5146_v56  ;;  %2045 = vmatprep.subr.bf16.mxu1 %v5152_v44 }
 0x56b   :  { %v1704_v17 = vpop.f32.mrb[44].mxu0  ;;  %v1745_v23 = vpop.f32.mrb[44].mxu1 }
 0x56c   :  { %v1705_v16 = vadd.f32 %v1704_v17, %v6703_v61  ;;  %v1706_v26 = vpop.f32.mrb[45].mxu0  ;;  %v1747_v62 = vpop.f32.mrb[45].mxu1  ;;  %v1746_v22 = vadd.f32 %v1745_v23, %v6705_v33  ;;  %v6710_v33 = vld [vmem:[#allocation78_spill] sm:$0xff] }
 0x56d   :  { %v1707_v59 = vadd.f32 %v1706_v26, %v6704_v58  ;;  %v1708_v38 = vpop.f32.mrb[46].mxu0  ;;  %v1749_v54 = vpop.f32.mrb[46].mxu1  ;;  %v1748_v44 = vadd.f32 %v1747_v62, %v6706_v19 }
 0x56e   :  { %v2811_v25 = vmul.f32 -1.442695, %v1705_v16  ;;  %v1709_v34 = vpop.f32.mrb[47].mxu0  ;;  %v1750_v56 = vpop.f32.mrb[47].mxu1  ;;  %v2813_v60 = vmul.f32 -1.442695, %v1746_v22 }
 0x56f   :  { %v2812_v10 = vmul.f32 -1.442695, %v1707_v59  ;;  %v6707_v22 = vld [vmem:[#allocation75_spill] sm:$0xff] }
 0x570   :  { %3100 = vpow2.f32 %v2811_v25 }
 0x571   :  { %3102 = vpow2.f32 %v2812_v10 }
 0x572   :  { %3104 = vtanh.f32 %v1748_v44  ;;  %v6708_v44 = vld [vmem:[#allocation76_spill] sm:$0xff] }
 0x573   :  { %3106 = vpow2.f32 %v2813_v60 }
 0x57a   :  { %v3101_v14 = vpop.eup %3100 }
 0x57b   :  { %v1761_v52 = vadd.f32 1.0, %v3101_v14  ;;  %v3103_v17 = vpop.eup %3102 }
 0x57c   :  { %v1762_v26 = vadd.f32 1.0, %v3103_v17  ;;  %v3105_v54 = vpop.eup %3104  ;;  %v6709_v17 = vld [vmem:[#allocation77_spill] sm:$0xff] }
 0x57d   :  { %3108 = vrcp.f32 %v1761_v52  ;;  %v3107_v38 = vpop.eup %3106 }
 0x57e   :  { %3110 = vrcp.f32 %v1762_v26  ;;  %v1763_v25 = vadd.f32 1.0, %v3107_v38 }
 0x580   :  { %3112 = vrcp.f32 %v1763_v25 }
 0x587   :  { %v3109_v34 = vpop.eup %3108 }
 0x588   :  { %v1772_v16 = vmul.f32 %v3109_v34, %v3105_v54  ;;  %v3111_v59 = vpop.eup %3110 }
 0x589   :  { %v1771_v10 = vmul.f32 %v3111_v59, %v5036_v15 }
 0x58a   :  { %v3113_v59 = vpop.eup %3112 }
 0x58b   :  { %v1815_v56 = vpop.f32.mrb[48].mxu0  ;;  %v1856_v23 = vpop.f32.mrb[48].mxu1  ;;  %v5160_v62 = vadd.f32 %v1772_v16, %v1771_v10 }
 0x58c   :  { %v1863_v14 = vadd.f32 %v1815_v56, %v6707_v22  ;;  %v1865_v19 = vadd.f32 %v1856_v23, %v6708_v44  ;;  %v1817_v60 = vpop.f32.mrb[49].mxu0  ;;  %v1858_v52 = vpop.f32.mrb[49].mxu1 }
 0x58d   :  { %v1864_v26 = vadd.f32 %v1817_v60, %v6709_v17  ;;  %v1866_v58 = vadd.f32 %v1858_v52, %v6710_v33  ;;  %v1819_v54 = vpop.f32.mrb[50].mxu0  ;;  %v1860_v34 = vpop.f32.mrb[50].mxu1  ;;  %3114 = vtanh.f32 %v5160_v62 }
 0x58e   :  { %v2814_v38 = vmul.f32 -1.442695, %v1863_v14  ;;  %v1820_v61 = vpop.f32.mrb[51].mxu0  ;;  %v1861_v15 = vpop.f32.mrb[51].mxu1  ;;  %v2816_v56 = vmul.f32 -1.442695, %v1865_v19 }
 0x58f   :  { %v2815_v16 = vmul.f32 -1.442695, %v1864_v26 }
 0x590   :  { %3116 = vpow2.f32 %v2814_v38 }
 0x591   :  { %3118 = vpow2.f32 %v2815_v16 }
 0x592   :  { %3120 = vtanh.f32 %v1866_v58 }
 0x593   :  { %3122 = vpow2.f32 %v2816_v56  ;;  %v5196_v56 = vld [vmem:[%s5994_s2 + $0x2c] ss:$16 sps:$4 sm:$0xff]  }
 0x597   :  { %v3115_v10 = vpop.eup %3114 }
 0x598   :  { %v1775_v23 = vmul.f32 %v3115_v10, %v3113_v59  ;;  %v5178_v59 = vld [vmem:[%s5994_s2] ss:$16 sps:$4 sm:$0xff]   ;;  %v5190_v10 = vld [vmem:[%s5994_s2 + $0x24] ss:$16 sps:$4 sm:$0xff]  }
 0x59a   :  { %v3117_v22 = vpop.eup %3116  ;;  %v1892_v44 = vpack.c.bf16 %v1775_v23, %v1775_v23  ;;  %v5204_v23 = vld [vmem:[%s5994_s2 + $0x20] ss:$16 sps:$4 sm:$0xff]  }
 0x59b   :  { %v1876_v25 = vadd.f32 1.0, %v3117_v22  ;;  %v3119_v60 = vpop.eup %3118  ;;  %v5210_v22 = vld [vmem:[%s5994_s2 + $0x28] ss:$16 sps:$4 sm:$0xff]  }
 0x59c   :  { %v1877_v33 = vadd.f32 1.0, %v3119_v60  ;;  %1925 = vmatprep.mubr.bf16.mxu0 %v1892_v44  ;;  %1966 = vmatprep.mubr.bf16.mxu1 %v1892_v44  ;;  %v3121_v61 = vpop.eup %3120  ;;  %v5222_v44 = vld [vmem:[%s5994_s2 + $0x4c] ss:$16 sps:$4 sm:$0xff]   ;;  %v5228_v60 = vld [vmem:[%s5994_s2 + $0x40] ss:$16 sps:$4 sm:$0xff]  }
 0x59d   :  { %3124 = vrcp.f32 %v1876_v25  ;;  %v3123_v14 = vpop.eup %3122  ;;  %v5216_v25 = vld [vmem:[%s5994_s2 + $0x44] ss:$16 sps:$4 sm:$0xff]  }
 0x59e   :  { %3126 = vrcp.f32 %v1877_v33  ;;  %v1878_v54 = vadd.f32 1.0, %v3123_v14  ;;  %v5234_v33 = vld [vmem:[%s5994_s2 + $0x48] ss:$16 sps:$4 sm:$0xff]   ;;  %v5246_v14 = vld [vmem:[%s5994_s2 + $0x6c] ss:$16 sps:$4 sm:$0xff]  }
 0x5a0   :  { %3128 = vrcp.f32 %v1878_v54  ;;  %v5270_v54 = vld [vmem:[%s5994_s2 + $0x8c] ss:$16 sps:$4 sm:$0xff]  }
 0x5a7   :  { %v3125_v52 = vpop.eup %3124 }
 0x5a8   :  { %v1887_v17 = vmul.f32 %v3125_v52, %v3121_v61  ;;  %v3127_v26 = vpop.eup %3126  ;;  %v5240_v61 = vld [vmem:[%s5994_s2 + $0x64] ss:$16 sps:$4 sm:$0xff]   ;;  %v5252_v52 = vld [vmem:[%s5994_s2 + $0x60] ss:$16 sps:$4 sm:$0xff]  }
 0x5a9   :  { %v1886_v19 = vmul.f32 %v3127_v26, %v5044_v2  ;;  %v5184_v2 = vld [vmem:[%s5994_s2 + $0x8] ss:$16 sps:$4 sm:$0xff]   ;;  %v5264_v26 = vld [vmem:[%s5994_s2 + $0x84] ss:$16 sps:$4 sm:$0xff]  }
 0x5aa   :  { %v3129_v58 = vpop.eup %3128 }
 0x5ab   :  { %v5168_v34 = vadd.f32 %v1887_v17, %v1886_v19  ;;  %v5258_v17 = vld [vmem:[%s5994_s2 + $0x68] ss:$16 sps:$4 sm:$0xff]   ;;  %v5276_v19 = vld [vmem:[%s5994_s2 + $0x80] ss:$16 sps:$4 sm:$0xff]  }
 0x5ac   :  { %6711 = vst [vmem:[#allocation27_spill] sm:$0xff] %v5276_v19 }
 0x5ad   :  { %3130 = vtanh.f32 %v5168_v34 }
 0x5b7   :  { %v3131_v38 = vpop.eup %3130 }
 0x5b8   :  { %v1890_v15 = vmul.f32 %v3131_v38, %v3129_v58  ;;  %v5282_v58 = vld [vmem:[%s5994_s2 + $0x88] ss:$16 sps:$4 sm:$0xff]   ;;  %v5288_v38 = vld [vmem:[%s5994_s2 + $0xa4] ss:$16 sps:$4 sm:$0xff]  }
 0x5b9   :  { %6712 = vst [vmem:[#allocation28_spill] sm:$0xff] %v5282_v58  ;;  %6713 = vst [vmem:[#allocation29_spill] sm:$0xff] %v5288_v38 }
 0x5ba   :  { %v5171_v16 = vpack.c.bf16 %v1890_v15, %v1890_v15  ;;  %v5294_v15 = vld [vmem:[%s5994_s2 + $0xac] ss:$16 sps:$4 sm:$0xff]  }
 0x5bb   :  { %6714 = vst [vmem:[#allocation30_spill] sm:$0xff] %v5294_v15 }
 0x5bc   :  { %1926 = vmatmul.mubr.bf16.vlgmr.msra.gmra.mrb[52].mxu0 %v5171_v16  ;;  %1967 = vmatmul.mubr.bf16.vlgmr.msra.gmra.mrb[52].mxu1 %v5171_v16 }
 0x5bd   :  { %2005 = vmatpush1.bf16.msra.mxu0 %v5178_v59  ;;  %2046 = vmatpush1.bf16.msra.mxu1 %v5184_v2 }
 0x5be   :  { %2006 = vmatprep.subr.bf16.mxu0 %v5190_v10  ;;  %2047 = vmatprep.subr.bf16.mxu1 %v5196_v56 }
 0x5bf   :  { %2036 = vmatprep.mubr.bf16.mxu0 %v6457_v7  ;;  %2077 = vmatprep.mubr.bf16.mxu1 %v6457_v7 }
 0x5c1   :  { %2007 = vmatpush1.bf16.msra.mxu0 %v5204_v23  ;;  %2048 = vmatpush1.bf16.msra.mxu1 %v5210_v22 }
 0x5c2   :  { %2008 = vmatprep.subr.bf16.mxu0 %v5216_v25  ;;  %2049 = vmatprep.subr.bf16.mxu1 %v5222_v44 }
 0x5c5   :  { %2009 = vmatpush1.bf16.msra.mxu0 %v5228_v60  ;;  %2050 = vmatpush1.bf16.msra.mxu1 %v5234_v33 }
 0x5c6   :  { %2010 = vmatprep.subr.bf16.mxu0 %v5240_v61  ;;  %2051 = vmatprep.subr.bf16.mxu1 %v5246_v14 }
 0x5c9   :  { %2011 = vmatpush1.bf16.msra.mxu0 %v5252_v52  ;;  %2052 = vmatpush1.bf16.msra.mxu1 %v5258_v17 }
 0x5ca   :  { %2012 = vmatprep.subr.bf16.mxu0 %v5264_v26  ;;  %2053 = vmatprep.subr.bf16.mxu1 %v5270_v54 }
 0x5cd   :  { %2013 = vmatpush1.bf16.msra.mxu0 %v5276_v19  ;;  %2054 = vmatpush1.bf16.msra.mxu1 %v5282_v58  ;;  %v5300_v19 = vld [vmem:[%s5994_s2 + $0xa0] ss:$16 sps:$4 sm:$0xff]   ;;  %v5306_v58 = vld [vmem:[%s5994_s2 + $0xa8] ss:$16 sps:$4 sm:$0xff]  }
 0x5ce   :  { %2014 = vmatprep.subr.bf16.mxu0 %v5288_v38  ;;  %2055 = vmatprep.subr.bf16.mxu1 %v5294_v15  ;;  %6715 = vst [vmem:[#allocation71_spill] sm:$0xff] %v5300_v19  ;;  %6716 = vst [vmem:[#allocation72_spill] sm:$0xff] %v5306_v58  ;;  %v5312_v38 = vld [vmem:[%s5994_s2 + $0xc4] ss:$16 sps:$4 sm:$0xff]   ;;  %v5318_v15 = vld [vmem:[%s5994_s2 + $0xcc] ss:$16 sps:$4 sm:$0xff]  }
 0x5cf   :  { %6717 = vst [vmem:[#allocation73_spill] sm:$0xff] %v5312_v38  ;;  %6718 = vst [vmem:[#allocation74_spill] sm:$0xff] %v5318_v15 }
 0x5d1   :  { %2015 = vmatpush1.bf16.msra.mxu0 %v5300_v19  ;;  %2056 = vmatpush1.bf16.msra.mxu1 %v5306_v58  ;;  %v5324_v19 = vld [vmem:[%s5994_s2 + $0xc0] ss:$16 sps:$4 sm:$0xff]   ;;  %v5330_v58 = vld [vmem:[%s5994_s2 + $0xc8] ss:$16 sps:$4 sm:$0xff]  }
 0x5d2   :  { %2016 = vmatprep.subr.bf16.mxu0 %v5312_v38  ;;  %2057 = vmatprep.subr.bf16.mxu1 %v5318_v15  ;;  %6719 = vst [vmem:[#allocation31_spill] sm:$0xff] %v5324_v19  ;;  %6720 = vst [vmem:[#allocation32_spill] sm:$0xff] %v5330_v58  ;;  %v5336_v38 = vld [vmem:[%s5994_s2 + $0xe4] ss:$16 sps:$4 sm:$0xff]   ;;  %v5342_v15 = vld [vmem:[%s5994_s2 + $0xec] ss:$16 sps:$4 sm:$0xff]  }
 0x5d3   :  { %6721 = vst [vmem:[#allocation33_spill] sm:$0xff] %v5336_v38  ;;  %6722 = vst [vmem:[#allocation34_spill] sm:$0xff] %v5342_v15 }
 0x5d5   :  { %2017 = vmatpush1.bf16.msra.mxu0 %v5324_v19  ;;  %2058 = vmatpush1.bf16.msra.mxu1 %v5330_v58  ;;  %v5348_v19 = vld [vmem:[%s5994_s2 + $0xe0] ss:$16 sps:$4 sm:$0xff]   ;;  %v5354_v58 = vld [vmem:[%s5994_s2 + $0xe8] ss:$16 sps:$4 sm:$0xff]  }
 0x5d6   :  { %2018 = vmatprep.subr.bf16.mxu0 %v5336_v38  ;;  %2059 = vmatprep.subr.bf16.mxu1 %v5342_v15  ;;  %6723 = vst [vmem:[#allocation35_spill] sm:$0xff] %v5354_v58  ;;  %v5360_v38 = vld [vmem:[%s5995_s4 + $0x4] ss:$16 sps:$4 sm:$0xff]   ;;  %v5366_v15 = vld [vmem:[%s5995_s4 + $0xc] ss:$16 sps:$4 sm:$0xff]  }
 0x5d7   :  { %6724 = vst [vmem:[#allocation36_spill] sm:$0xff] %v5360_v38  ;;  %6725 = vst [vmem:[#allocation37_spill] sm:$0xff] %v5366_v15 }
 0x5d9   :  { %2019 = vmatpush1.bf16.msra.mxu0 %v5348_v19  ;;  %2060 = vmatpush1.bf16.msra.mxu1 %v5354_v58  ;;  %v5374_v58 = vld [vmem:[%s5995_s4] ss:$16 sps:$4 sm:$0xff]  }
 0x5da   :  { %2116 = vmatprep.subr.bf16.mxu0 %v5360_v38  ;;  %2157 = vmatprep.subr.bf16.mxu1 %v5366_v15  ;;  %6726 = vst [vmem:[#allocation38_spill] sm:$0xff] %v5374_v58  ;;  %v5380_v38 = vld [vmem:[%s5995_s4 + $0x8] ss:$16 sps:$4 sm:$0xff]   ;;  %v5386_v15 = vld [vmem:[%s5995_s4 + $0x24] ss:$16 sps:$4 sm:$0xff]  }
 0x5db   :  { %6727 = vst [vmem:[#allocation39_spill] sm:$0xff] %v5380_v38 }
 0x5dc   :  { %2037 = vmatmul.mubr.bf16.vlgmr.msra.gmra.mrb[56].mxu0 %v5171_v16  ;;  %2078 = vmatmul.mubr.bf16.vlgmr.msra.gmra.mrb[56].mxu1 %v5171_v16  ;;  %v5392_v16 = vld [vmem:[%s5995_s4 + $0x2c] ss:$16 sps:$4 sm:$0xff]  }
 0x5dd   :  { %2117 = vmatpush1.bf16.msra.mxu0 %v5374_v58  ;;  %2158 = vmatpush1.bf16.msra.mxu1 %v5380_v38  ;;  %v5398_v58 = vld [vmem:[%s5995_s4 + $0x20] ss:$16 sps:$4 sm:$0xff]   ;;  %v5404_v38 = vld [vmem:[%s5995_s4 + $0x28] ss:$16 sps:$4 sm:$0xff]  }
 0x5de   :  { %2118 = vmatprep.subr.bf16.mxu0 %v5386_v15  ;;  %2159 = vmatprep.subr.bf16.mxu1 %v5392_v16 }
 0x5e1   :  { %2119 = vmatpush1.bf16.msra.mxu0 %v5398_v58  ;;  %2160 = vmatpush1.bf16.msra.mxu1 %v5404_v38 }
 0x5e2   :  { %2120 = vmatprep.subr.bf16.mxu0 %v4696_v55  ;;  %2161 = vmatprep.subr.bf16.mxu1 %v4702_v57  ;;  %v6728_v55 = vld [vmem:[#allocation67_spill] sm:$0xff]  ;;  %v6729_v57 = vld [vmem:[#allocation68_spill] sm:$0xff] }
 0x5e5   :  { %2121 = vmatpush1.bf16.msra.mxu0 %v6647_v0  ;;  %2162 = vmatpush1.bf16.msra.mxu1 %v6648_v63  ;;  %v6730_v0 = vld [vmem:[#allocation69_spill] sm:$0xff]  ;;  %v6731_v63 = vld [vmem:[#allocation70_spill] sm:$0xff] }
 0x5e6   :  { %2122 = vmatprep.subr.bf16.mxu0 %v6649_v13  ;;  %2163 = vmatprep.subr.bf16.mxu1 %v6650_v3  ;;  %v6732_v13 = vld [vmem:[#allocation13_spill] sm:$0xff]  ;;  %v6733_v3 = vld [vmem:[#allocation14_spill] sm:$0xff] }
 0x5e9   :  { %2123 = vmatpush1.bf16.msra.mxu0 %v6651_v21  ;;  %2164 = vmatpush1.bf16.msra.mxu1 %v6652_v1  ;;  %v6734_v21 = vld [vmem:[#allocation15_spill] sm:$0xff]  ;;  %v6735_v1 = vld [vmem:[#allocation16_spill] sm:$0xff] }
 0x5ea   :  { %2124 = vmatprep.subr.bf16.mxu0 %v6653_v24  ;;  %2165 = vmatprep.subr.bf16.mxu1 %v6654_v53  ;;  %v6736_v24 = vld [vmem:[#allocation17_spill] sm:$0xff]  ;;  %v6737_v53 = vld [vmem:[#allocation18_spill] sm:$0xff] }
 0x5ed   :  { %2125 = vmatpush1.bf16.msra.mxu0 %v6655_v8  ;;  %2166 = vmatpush1.bf16.msra.mxu1 %v6656_v31  ;;  %v6738_v8 = vld [vmem:[#allocation19_spill] sm:$0xff]  ;;  %v6739_v31 = vld [vmem:[#allocation20_spill] sm:$0xff] }
 0x5ee   :  { %2126 = vmatprep.subr.bf16.mxu0 %v6657_v20  ;;  %2167 = vmatprep.subr.bf16.mxu1 %v6658_v42  ;;  %v6740_v20 = vld [vmem:[#allocation21_spill] sm:$0xff]  ;;  %v6741_v42 = vld [vmem:[#allocation22_spill] sm:$0xff] }
 0x5f1   :  { %2127 = vmatpush1.bf16.msra.mxu0 %v6659_v9  ;;  %2168 = vmatpush1.bf16.msra.mxu1 %v6660_v12  ;;  %v6742_v9 = vld [vmem:[#allocation23_spill] sm:$0xff]  ;;  %v6743_v12 = vld [vmem:[#allocation24_spill] sm:$0xff] }
 0x5f2   :  { %2128 = vmatprep.subr.bf16.mxu0 %v6661_v11  ;;  %2169 = vmatprep.subr.bf16.mxu1 %v6662_v35  ;;  %v6744_v11 = vld [vmem:[#allocation25_spill] sm:$0xff]  ;;  %v6745_v35 = vld [vmem:[#allocation26_spill] sm:$0xff] }
 0x5f5   :  { %2129 = vmatpush1.bf16.msra.mxu0 %v6663_v6  ;;  %2170 = vmatpush1.bf16.msra.mxu1 %v6664_v4 }
 0x5f6   :  { %2130 = vmatprep.subr.bf16.mxu0 %v6665_v46  ;;  %2171 = vmatprep.subr.bf16.mxu1 %v6666_v5  ;;  %v6746_v46 = vld [vmem:[#allocation9_spill] sm:$0xff] }
 0x5f9   :  { %2131 = vmatpush1.bf16.msra.mxu0 %v6667_v18  ;;  %2172 = vmatpush1.bf16.msra.mxu1 %v6668_v32 }
 0x5fa   :  { %2132 = vmatprep.subr.bf16.mxu0 %v6669_v27  ;;  %2173 = vmatprep.subr.bf16.mxu1 %v6670_v28  ;;  %v6747_v27 = vld [vmem:[#allocation10_spill] sm:$0xff] }
 0x5fd   :  { %2133 = vmatpush1.bf16.msra.mxu0 %v6671_v29  ;;  %2174 = vmatpush1.bf16.msra.mxu1 %v6672_v30 }
 0x5fe   :  { %2134 = vmatprep.subr.bf16.mxu0 %v6673_v36  ;;  %2175 = vmatprep.subr.bf16.mxu1 %v6674_v37 }
 0x601   :  { %2135 = vmatpush1.bf16.msra.mxu0 %v6675_v39  ;;  %2176 = vmatpush1.bf16.msra.mxu1 %v6676_v40 }
 0x602   :  { %2136 = vmatprep.subr.bf16.mxu0 %v6677_v41  ;;  %2177 = vmatprep.subr.bf16.mxu1 %v6678_v45  ;;  %v6748_v41 = vld [vmem:[#allocation11_spill] sm:$0xff] }
 0x605   :  { %2137 = vmatpush1.bf16.msra.mxu0 %v6679_v47  ;;  %2178 = vmatpush1.bf16.msra.mxu1 %v6680_v48  ;;  %v6749_v47 = vld [vmem:[#allocation12_spill] sm:$0xff] }
 0x606   :  { %2138 = vmatprep.subr.bf16.mxu0 %v6681_v43  ;;  %2179 = vmatprep.subr.bf16.mxu1 %v6682_v49 }
 0x609   :  { %2139 = vmatpush1.bf16.msra.mxu0 %v6683_v50  ;;  %2180 = vmatpush1.bf16.msra.mxu1 %v6684_v51 }
 0x60a   :  { %2140 = vmatprep.subr.bf16.mxu0 %v6728_v55  ;;  %2181 = vmatprep.subr.bf16.mxu1 %v6729_v57 }
 0x60d   :  { %2141 = vmatpush1.bf16.msra.mxu0 %v6730_v0  ;;  %2182 = vmatpush1.bf16.msra.mxu1 %v6731_v63 }
 0x60e   :  { %2142 = vmatprep.subr.bf16.mxu0 %v6732_v13  ;;  %2183 = vmatprep.subr.bf16.mxu1 %v6733_v3 }
 0x611   :  { %2143 = vmatpush1.bf16.msra.mxu0 %v6734_v21  ;;  %2184 = vmatpush1.bf16.msra.mxu1 %v6735_v1 }
 0x612   :  { %2144 = vmatprep.subr.bf16.mxu0 %v6736_v24  ;;  %2185 = vmatprep.subr.bf16.mxu1 %v6737_v53 }
 0x615   :  { %2145 = vmatpush1.bf16.msra.mxu0 %v6738_v8  ;;  %2186 = vmatpush1.bf16.msra.mxu1 %v6739_v31  ;;  %v6750_v31 = vld [vmem:[#allocation79_spill] sm:$0xff] }
 0x616   :  { %2146 = vmatprep.subr.bf16.mxu0 %v6740_v20  ;;  %2187 = vmatprep.subr.bf16.mxu1 %v6741_v42  ;;  %v6751_v42 = vld [vmem:[#allocation80_spill] sm:$0xff] }
 0x619   :  { %2147 = vmatpush1.bf16.msra.mxu0 %v6742_v9  ;;  %2188 = vmatpush1.bf16.msra.mxu1 %v6743_v12 }
 0x61a   :  { %2227 = vmatprep.subr.bf16.mxu0 %v6744_v11  ;;  %2268 = vmatprep.subr.bf16.mxu1 %v6745_v35 }
 0x68f   :  { %v1927_v6 = vpop.f32.mrb[52].mxu0  ;;  %v1968_v4 = vpop.f32.mrb[52].mxu1 }
 0x690   :  { %v1928_v5 = vadd.f32 %v1927_v6, %v6746_v46  ;;  %v1929_v18 = vpop.f32.mrb[53].mxu0  ;;  %v1970_v32 = vpop.f32.mrb[53].mxu1  ;;  %v1969_v45 = vadd.f32 %v1968_v4, %v6748_v41  ;;  %v6752_v4 = vld [vmem:[#allocation81_spill] sm:$0xff] }
 0x691   :  { %v1930_v28 = vadd.f32 %v1929_v18, %v6747_v27  ;;  %v1931_v29 = vpop.f32.mrb[54].mxu0  ;;  %v1972_v30 = vpop.f32.mrb[54].mxu1  ;;  %v1971_v48 = vadd.f32 %v1970_v32, %v6749_v47  ;;  %v6753_v18 = vld [vmem:[#allocation82_spill] sm:$0xff] }
 0x692   :  { %v2817_v36 = vmul.f32 -1.442695, %v1928_v5  ;;  %v1932_v37 = vpop.f32.mrb[55].mxu0  ;;  %v1973_v39 = vpop.f32.mrb[55].mxu1  ;;  %v2819_v43 = vmul.f32 -1.442695, %v1969_v45 }
 0x693   :  { %v2818_v40 = vmul.f32 -1.442695, %v1930_v28 }
 0x694   :  { %3132 = vpow2.f32 %v2817_v36 }
 0x695   :  { %3134 = vpow2.f32 %v2818_v40 }
 0x696   :  { %3136 = vtanh.f32 %v1971_v48 }
 0x697   :  { %3138 = vpow2.f32 %v2819_v43 }
 0x69e   :  { %v3133_v49 = vpop.eup %3132 }
 0x69f   :  { %v1984_v50 = vadd.f32 1.0, %v3133_v49  ;;  %v3135_v51 = vpop.eup %3134 }
 0x6a0   :  { %v1985_v55 = vadd.f32 1.0, %v3135_v51  ;;  %v3137_v57 = vpop.eup %3136 }
 0x6a1   :  { %3140 = vrcp.f32 %v1984_v50  ;;  %v3139_v0 = vpop.eup %3138 }
 0x6a2   :  { %3142 = vrcp.f32 %v1985_v55  ;;  %v1986_v21 = vadd.f32 1.0, %v3139_v0 }
 0x6a4   :  { %3144 = vrcp.f32 %v1986_v21 }
 0x6ab   :  { %v3141_v63 = vpop.eup %3140 }
 0x6ac   :  { %v1995_v13 = vmul.f32 %v3141_v63, %v3137_v57  ;;  %v3143_v3 = vpop.eup %3142 }
 0x6ad   :  { %v1994_v1 = vmul.f32 %v3143_v3, %v5160_v62 }
 0x6ae   :  { %v3145_v39 = vpop.eup %3144 }
 0x6af   :  { %v2038_v24 = vpop.f32.mrb[56].mxu0  ;;  %v2079_v53 = vpop.f32.mrb[56].mxu1  ;;  %v5470_v8 = vadd.f32 %v1995_v13, %v1994_v1 }
 0x6b0   :  { %v2086_v20 = vadd.f32 %v2038_v24, %v6750_v31  ;;  %v2088_v9 = vadd.f32 %v2079_v53, %v6751_v42  ;;  %v2040_v12 = vpop.f32.mrb[57].mxu0  ;;  %v2081_v6 = vpop.f32.mrb[57].mxu1 }
 0x6b1   :  { %v2087_v5 = vadd.f32 %v2040_v12, %v6752_v4  ;;  %v2089_v32 = vadd.f32 %v2081_v6, %v6753_v18  ;;  %v2042_v28 = vpop.f32.mrb[58].mxu0  ;;  %v2083_v29 = vpop.f32.mrb[58].mxu1  ;;  %3146 = vtanh.f32 %v5470_v8  ;;  %v6756_v12 = vld [vmem:[#allocation29_spill] sm:$0xff]  ;;  %v6757_v6 = vld [vmem:[#allocation30_spill] sm:$0xff]  ;;  %v6758_v4 = vld [vmem:[#allocation71_spill] sm:$0xff] }
 0x6b2   :  { %v2820_v30 = vmul.f32 -1.442695, %v2086_v20  ;;  %v2043_v36 = vpop.f32.mrb[59].mxu0  ;;  %v2084_v62 = vpop.f32.mrb[59].mxu1  ;;  %v2822_v45 = vmul.f32 -1.442695, %v2088_v9 }
 0x6b3   :  { %v2821_v37 = vmul.f32 -1.442695, %v2087_v5  ;;  %v6755_v9 = vld [vmem:[#allocation28_spill] sm:$0xff]  ;;  %v6760_v18 = vld [vmem:[#allocation73_spill] sm:$0xff]  ;;  %v6762_v28 = vld [vmem:[#allocation31_spill] sm:$0xff] }
 0x6b4   :  { %3148 = vpow2.f32 %v2820_v30  ;;  %v6759_v5 = vld [vmem:[#allocation72_spill] sm:$0xff]  ;;  %v6764_v30 = vld [vmem:[#allocation33_spill] sm:$0xff]  ;;  %v6765_v36 = vld [vmem:[#allocation34_spill] sm:$0xff] }
 0x6b5   :  { %3150 = vpow2.f32 %v2821_v37  ;;  %v6763_v29 = vld [vmem:[#allocation32_spill] sm:$0xff]  ;;  %v6766_v62 = vld [vmem:[#allocation35_spill] sm:$0xff] }
 0x6b6   :  { %3152 = vtanh.f32 %v2089_v32  ;;  %v6761_v32 = vld [vmem:[#allocation74_spill] sm:$0xff]  ;;  %v6767_v37 = vld [vmem:[#allocation36_spill] sm:$0xff] }
 0x6b7   :  { %3154 = vpow2.f32 %v2822_v45  ;;  %v6770_v45 = vld [vmem:[#allocation39_spill] sm:$0xff] }
 0x6bb   :  { %v3147_v40 = vpop.eup %3146 }
 0x6bc   :  { %v1998_v48 = vmul.f32 %v3147_v40, %v3145_v39  ;;  %v6768_v39 = vld [vmem:[#allocation37_spill] sm:$0xff]  ;;  %v6769_v40 = vld [vmem:[#allocation38_spill] sm:$0xff] }
 0x6be   :  { %v3149_v43 = vpop.eup %3148  ;;  %v2115_v50 = vpack.c.bf16 %v1998_v48, %v1998_v48  ;;  %v5524_v48 = vld [vmem:[%s5995_s4 + $0x44] ss:$16 sps:$4 sm:$0xff]  }
 0x6bf   :  { %v2099_v49 = vadd.f32 1.0, %v3149_v43  ;;  %v3151_v51 = vpop.eup %3150  ;;  %v5530_v43 = vld [vmem:[%s5995_s4 + $0x4c] ss:$16 sps:$4 sm:$0xff]  }
 0x6c0   :  { %v2100_v55 = vadd.f32 1.0, %v3151_v51  ;;  %2148 = vmatprep.mubr.bf16.mxu0 %v2115_v50  ;;  %2189 = vmatprep.mubr.bf16.mxu1 %v2115_v50  ;;  %v3153_v57 = vpop.eup %3152  ;;  %v5542_v50 = vld [vmem:[%s5995_s4 + $0x48] ss:$16 sps:$4 sm:$0xff]   ;;  %v5548_v51 = vld [vmem:[%s5995_s4 + $0x64] ss:$16 sps:$4 sm:$0xff]  }
 0x6c1   :  { %3156 = vrcp.f32 %v2099_v49  ;;  %v3155_v0 = vpop.eup %3154  ;;  %v5536_v49 = vld [vmem:[%s5995_s4 + $0x40] ss:$16 sps:$4 sm:$0xff]   ;;  %6772 = vst [vmem:[#allocation41_spill] sm:$0xff] %v5542_v50  ;;  %6773 = vst [vmem:[#allocation42_spill] sm:$0xff] %v5548_v51 }
 0x6c2   :  { %3158 = vrcp.f32 %v2100_v55  ;;  %v2101_v21 = vadd.f32 1.0, %v3155_v0  ;;  %6771 = vst [vmem:[#allocation40_spill] sm:$0xff] %v5536_v49  ;;  %v5554_v55 = vld [vmem:[%s5995_s4 + $0x6c] ss:$16 sps:$4 sm:$0xff]   ;;  %v5566_v0 = vld [vmem:[%s5995_s4 + $0x68] ss:$16 sps:$4 sm:$0xff]  }
 0x6c3   :  { %6774 = vst [vmem:[#allocation43_spill] sm:$0xff] %v5554_v55  ;;  %6776 = vst [vmem:[#allocation45_spill] sm:$0xff] %v5566_v0 }
 0x6c4   :  { %3160 = vrcp.f32 %v2101_v21  ;;  %v5590_v21 = vld [vmem:[%s5995_s4 + $0x88] ss:$16 sps:$4 sm:$0xff]  }
 0x6c5   :  { %6780 = vst [vmem:[#allocation64_spill] sm:$0xff] %v5590_v21 }
 0x6cb   :  { %v3157_v63 = vpop.eup %3156 }
 0x6cc   :  { %v2110_v13 = vmul.f32 %v3157_v63, %v3153_v57  ;;  %v3159_v3 = vpop.eup %3158  ;;  %v5560_v57 = vld [vmem:[%s5995_s4 + $0x60] ss:$16 sps:$4 sm:$0xff]   ;;  %v5572_v63 = vld [vmem:[%s5995_s4 + $0x84] ss:$16 sps:$4 sm:$0xff]  }
 0x6cd   :  { %v2109_v1 = vmul.f32 %v3159_v3, %v5168_v34  ;;  %v6754_v34 = vld [vmem:[#allocation27_spill] sm:$0xff]  ;;  %6775 = vst [vmem:[#allocation44_spill] sm:$0xff] %v5560_v57  ;;  %6777 = vst [vmem:[#allocation46_spill] sm:$0xff] %v5572_v63 }
 0x6ce   :  { %v3161_v53 = vpop.eup %3160  ;;  %v5584_v3 = vld [vmem:[%s5995_s4 + $0x80] ss:$16 sps:$4 sm:$0xff]  }
 0x6cf   :  { %v5478_v24 = vadd.f32 %v2110_v13, %v2109_v1  ;;  %v5578_v13 = vld [vmem:[%s5995_s4 + $0x8c] ss:$16 sps:$4 sm:$0xff]   ;;  %6779 = vst [vmem:[#allocation63_spill] sm:$0xff] %v5584_v3  ;;  %v5596_v1 = vld [vmem:[%s5995_s4 + $0xa4] ss:$16 sps:$4 sm:$0xff]  }
 0x6d0   :  { %6778 = vst [vmem:[#allocation62_spill] sm:$0xff] %v5578_v13  ;;  %6781 = vst [vmem:[#allocation65_spill] sm:$0xff] %v5596_v1 }
 0x6d1   :  { %3162 = vtanh.f32 %v5478_v24 }
 0x6db   :  { %v3163_v31 = vpop.eup %3162 }
 0x6dc   :  { %v2113_v20 = vmul.f32 %v3163_v31, %v3161_v53  ;;  %v5602_v53 = vld [vmem:[%s5995_s4 + $0xac] ss:$16 sps:$4 sm:$0xff]   ;;  %v5608_v31 = vld [vmem:[%s5995_s4 + $0xa0] ss:$16 sps:$4 sm:$0xff]  }
 0x6dd   :  { %6782 = vst [vmem:[#allocation66_spill] sm:$0xff] %v5602_v53  ;;  %6783 = vst [vmem:[#allocation47_spill] sm:$0xff] %v5608_v31 }
 0x6de   :  { %v2114_v42 = vpack.c.bf16 %v2113_v20, %v2113_v20  ;;  %v5614_v20 = vld [vmem:[%s5995_s4 + $0xa8] ss:$16 sps:$4 sm:$0xff]  }
 0x6df   :  { %6784 = vst [vmem:[#allocation48_spill] sm:$0xff] %v5614_v20 }
 0x6e0   :  { %2149 = vmatmul.mubr.bf16.vlgmr.msra.gmra.mrb[60].mxu0 %v2114_v42  ;;  %2190 = vmatmul.mubr.bf16.vlgmr.msra.gmra.mrb[60].mxu1 %v2114_v42 }
 0x6e1   :  { %2228 = vmatpush1.bf16.msra.mxu0 %v5178_v59  ;;  %2269 = vmatpush1.bf16.msra.mxu1 %v5184_v2 }
 0x6e2   :  { %2229 = vmatprep.subr.bf16.mxu0 %v5190_v10  ;;  %2270 = vmatprep.subr.bf16.mxu1 %v5196_v56 }
 0x6e3   :  { %2259 = vmatprep.mubr.bf16.mxu0 %v6457_v7  ;;  %2300 = vmatprep.mubr.bf16.mxu1 %v6457_v7 }
 0x6e5   :  { %2230 = vmatpush1.bf16.msra.mxu0 %v5204_v23  ;;  %2271 = vmatpush1.bf16.msra.mxu1 %v5210_v22 }
 0x6e6   :  { %2231 = vmatprep.subr.bf16.mxu0 %v5216_v25  ;;  %2272 = vmatprep.subr.bf16.mxu1 %v5222_v44 }
 0x6e9   :  { %2232 = vmatpush1.bf16.msra.mxu0 %v5228_v60  ;;  %2273 = vmatpush1.bf16.msra.mxu1 %v5234_v33 }
 0x6ea   :  { %2233 = vmatprep.subr.bf16.mxu0 %v5240_v61  ;;  %2274 = vmatprep.subr.bf16.mxu1 %v5246_v14 }
 0x6ed   :  { %2234 = vmatpush1.bf16.msra.mxu0 %v5252_v52  ;;  %2275 = vmatpush1.bf16.msra.mxu1 %v5258_v17 }
 0x6ee   :  { %2235 = vmatprep.subr.bf16.mxu0 %v5264_v26  ;;  %2276 = vmatprep.subr.bf16.mxu1 %v5270_v54 }
 0x6f1   :  { %2236 = vmatpush1.bf16.msra.mxu0 %v6754_v34  ;;  %2277 = vmatpush1.bf16.msra.mxu1 %v6755_v9 }
 0x6f2   :  { %2237 = vmatprep.subr.bf16.mxu0 %v6756_v12  ;;  %2278 = vmatprep.subr.bf16.mxu1 %v6757_v6 }
 0x6f5   :  { %2238 = vmatpush1.bf16.msra.mxu0 %v6758_v4  ;;  %2279 = vmatpush1.bf16.msra.mxu1 %v6759_v5 }
 0x6f6   :  { %2239 = vmatprep.subr.bf16.mxu0 %v6760_v18  ;;  %2280 = vmatprep.subr.bf16.mxu1 %v6761_v32 }
 0x6f9   :  { %2240 = vmatpush1.bf16.msra.mxu0 %v6762_v28  ;;  %2281 = vmatpush1.bf16.msra.mxu1 %v6763_v29 }
 0x6fa   :  { %2241 = vmatprep.subr.bf16.mxu0 %v6764_v30  ;;  %2282 = vmatprep.subr.bf16.mxu1 %v6765_v36 }
 0x6fd   :  { %2242 = vmatpush1.bf16.msra.mxu0 %v5348_v19  ;;  %2283 = vmatpush1.bf16.msra.mxu1 %v6766_v62 }
 0x6fe   :  { %2339 = vmatprep.subr.bf16.mxu0 %v6767_v37  ;;  %2380 = vmatprep.subr.bf16.mxu1 %v6768_v39 }
 0x700   :  { %2260 = vmatmul.mubr.bf16.vlgmr.msra.gmra.mrb[64].mxu0 %v2114_v42  ;;  %2301 = vmatmul.mubr.bf16.vlgmr.msra.gmra.mrb[64].mxu1 %v2114_v42  ;;  %v5620_v42 = vld [vmem:[%s5995_s4 + $0xc4] ss:$16 sps:$4 sm:$0xff]  }
 0x701   :  { %2340 = vmatpush1.bf16.msra.mxu0 %v6769_v40  ;;  %2381 = vmatpush1.bf16.msra.mxu1 %v6770_v45  ;;  %6785 = vst [vmem:[#allocation49_spill] sm:$0xff] %v5620_v42 }
 0x702   :  { %2341 = vmatprep.subr.bf16.mxu0 %v5386_v15  ;;  %2382 = vmatprep.subr.bf16.mxu1 %v5392_v16 }
 0x705   :  { %2342 = vmatpush1.bf16.msra.mxu0 %v5398_v58  ;;  %2383 = vmatpush1.bf16.msra.mxu1 %v5404_v38 }
 0x706   :  { %2343 = vmatprep.subr.bf16.mxu0 %v5524_v48  ;;  %2384 = vmatprep.subr.bf16.mxu1 %v5530_v43 }
 0x709   :  { %2344 = vmatpush1.bf16.msra.mxu0 %v5536_v49  ;;  %2385 = vmatpush1.bf16.msra.mxu1 %v5542_v50 }
 0x70a   :  { %2345 = vmatprep.subr.bf16.mxu0 %v5548_v51  ;;  %2386 = vmatprep.subr.bf16.mxu1 %v5554_v55 }
 0x70d   :  { %2346 = vmatpush1.bf16.msra.mxu0 %v5560_v57  ;;  %2387 = vmatpush1.bf16.msra.mxu1 %v5566_v0 }
 0x70e   :  { %2347 = vmatprep.subr.bf16.mxu0 %v5572_v63  ;;  %2388 = vmatprep.subr.bf16.mxu1 %v5578_v13 }
 0x711   :  { %2348 = vmatpush1.bf16.msra.mxu0 %v5584_v3  ;;  %2389 = vmatpush1.bf16.msra.mxu1 %v5590_v21 }
 0x712   :  { %2349 = vmatprep.subr.bf16.mxu0 %v5596_v1  ;;  %2390 = vmatprep.subr.bf16.mxu1 %v5602_v53  ;;  %v5626_v53 = vld [vmem:[%s5995_s4 + $0xcc] ss:$16 sps:$4 sm:$0xff]  }
 0x713   :  { %6786 = vst [vmem:[#allocation50_spill] sm:$0xff] %v5626_v53 }
 0x715   :  { %2350 = vmatpush1.bf16.msra.mxu0 %v5608_v31  ;;  %2391 = vmatpush1.bf16.msra.mxu1 %v5614_v20  ;;  %v5632_v31 = vld [vmem:[%s5995_s4 + $0xc0] ss:$16 sps:$4 sm:$0xff]   ;;  %v5638_v20 = vld [vmem:[%s5995_s4 + $0xc8] ss:$16 sps:$4 sm:$0xff]  }
 0x716   :  { %2351 = vmatprep.subr.bf16.mxu0 %v5620_v42  ;;  %2392 = vmatprep.subr.bf16.mxu1 %v5626_v53  ;;  %6787 = vst [vmem:[#allocation51_spill] sm:$0xff] %v5632_v31  ;;  %6788 = vst [vmem:[#allocation52_spill] sm:$0xff] %v5638_v20  ;;  %v5644_v42 = vld [vmem:[%s5995_s4 + $0xe4] ss:$16 sps:$4 sm:$0xff]   ;;  %v5650_v53 = vld [vmem:[%s5995_s4 + $0xec] ss:$16 sps:$4 sm:$0xff]  }
 0x717   :  { %6789 = vst [vmem:[#allocation53_spill] sm:$0xff] %v5644_v42  ;;  %6790 = vst [vmem:[#allocation54_spill] sm:$0xff] %v5650_v53 }
 0x719   :  { %2352 = vmatpush1.bf16.msra.mxu0 %v5632_v31  ;;  %2393 = vmatpush1.bf16.msra.mxu1 %v5638_v20  ;;  %v5656_v31 = vld [vmem:[%s5995_s4 + $0xe0] ss:$16 sps:$4 sm:$0xff]   ;;  %v5662_v20 = vld [vmem:[%s5995_s4 + $0xe8] ss:$16 sps:$4 sm:$0xff]  }
 0x71a   :  { %2353 = vmatprep.subr.bf16.mxu0 %v5644_v42  ;;  %2394 = vmatprep.subr.bf16.mxu1 %v5650_v53  ;;  %6791 = vst [vmem:[#allocation55_spill] sm:$0xff] %v5656_v31  ;;  %6792 = vst [vmem:[#allocation56_spill] sm:$0xff] %v5662_v20  ;;  %v5668_v42 = vld [vmem:[%s5995_s4 + $0x104] ss:$16 sps:$4 sm:$0xff]   ;;  %v5674_v53 = vld [vmem:[%s5995_s4 + $0x10c] ss:$16 sps:$4 sm:$0xff]  }
 0x71b   :  { %6793 = vst [vmem:[#allocation57_spill] sm:$0xff] %v5668_v42  ;;  %6794 = vst [vmem:[#allocation58_spill] sm:$0xff] %v5674_v53 }
 0x71d   :  { %2354 = vmatpush1.bf16.msra.mxu0 %v5656_v31  ;;  %2395 = vmatpush1.bf16.msra.mxu1 %v5662_v20  ;;  %v5680_v31 = vld [vmem:[%s5995_s4 + $0x100] ss:$16 sps:$4 sm:$0xff]   ;;  %v5686_v20 = vld [vmem:[%s5995_s4 + $0x108] ss:$16 sps:$4 sm:$0xff]  }
 0x71e   :  { %2355 = vmatprep.subr.bf16.mxu0 %v5668_v42  ;;  %2396 = vmatprep.subr.bf16.mxu1 %v5674_v53  ;;  %6795 = vst [vmem:[#allocation59_spill] sm:$0xff] %v5680_v31  ;;  %6796 = vst [vmem:[#allocation60_spill] sm:$0xff] %v5686_v20  ;;  %v5692_v42 = vld [vmem:[%s5995_s4 + $0x124] ss:$16 sps:$4 sm:$0xff]   ;;  %v5698_v53 = vld [vmem:[%s5995_s4 + $0x12c] ss:$16 sps:$4 sm:$0xff]  }
 0x71f   :  { %6797 = vst [vmem:[#allocation61_spill] sm:$0xff] %v5692_v42  ;;  %6798 = vst [vmem:[#allocation7_spill] sm:$0xff] %v5698_v53 }
 0x721   :  { %2356 = vmatpush1.bf16.msra.mxu0 %v5680_v31  ;;  %2397 = vmatpush1.bf16.msra.mxu1 %v5686_v20  ;;  %v5704_v31 = vld [vmem:[%s5995_s4 + $0x120] ss:$16 sps:$4 sm:$0xff]   ;;  %v5710_v20 = vld [vmem:[%s5995_s4 + $0x128] ss:$16 sps:$4 sm:$0xff]  }
 0x722   :  { %2357 = vmatprep.subr.bf16.mxu0 %v5692_v42  ;;  %2398 = vmatprep.subr.bf16.mxu1 %v5698_v53  ;;  %6799 = vst [vmem:[#allocation8_spill] sm:$0xff] %v5704_v31  ;;  %6800 = vst [vmem:[#allocation75_spill] sm:$0xff] %v5710_v20  ;;  %v5716_v42 = vld [vmem:[%s5995_s4 + $0x144] ss:$16 sps:$4 sm:$0xff]   ;;  %v5722_v53 = vld [vmem:[%s5995_s4 + $0x14c] ss:$16 sps:$4 sm:$0xff]  }
 0x723   :  { %6801 = vst [vmem:[#allocation76_spill] sm:$0xff] %v5716_v42  ;;  %6802 = vst [vmem:[#allocation77_spill] sm:$0xff] %v5722_v53 }
 0x725   :  { %2358 = vmatpush1.bf16.msra.mxu0 %v5704_v31  ;;  %2399 = vmatpush1.bf16.msra.mxu1 %v5710_v20  ;;  %v5728_v31 = vld [vmem:[%s5995_s4 + $0x140] ss:$16 sps:$4 sm:$0xff]   ;;  %v5734_v20 = vld [vmem:[%s5995_s4 + $0x148] ss:$16 sps:$4 sm:$0xff]  }
 0x726   :  { %2359 = vmatprep.subr.bf16.mxu0 %v5716_v42  ;;  %2400 = vmatprep.subr.bf16.mxu1 %v5722_v53  ;;  %6803 = vst [vmem:[#allocation78_spill] sm:$0xff] %v5728_v31  ;;  %6804 = vst [vmem:[#allocation67_spill] sm:$0xff] %v5734_v20  ;;  %v5740_v42 = vld [vmem:[%s5995_s4 + $0x164] ss:$16 sps:$4 sm:$0xff]   ;;  %v5746_v53 = vld [vmem:[%s5995_s4 + $0x16c] ss:$16 sps:$4 sm:$0xff]  }
 0x727   :  { %6805 = vst [vmem:[#allocation68_spill] sm:$0xff] %v5740_v42  ;;  %6806 = vst [vmem:[#allocation69_spill] sm:$0xff] %v5746_v53 }
 0x729   :  { %2360 = vmatpush1.bf16.msra.mxu0 %v5728_v31  ;;  %2401 = vmatpush1.bf16.msra.mxu1 %v5734_v20  ;;  %v5752_v31 = vld [vmem:[%s5995_s4 + $0x160] ss:$16 sps:$4 sm:$0xff]   ;;  %v5758_v20 = vld [vmem:[%s5995_s4 + $0x168] ss:$16 sps:$4 sm:$0xff]  }
 0x72a   :  { %2361 = vmatprep.subr.bf16.mxu0 %v5740_v42  ;;  %2402 = vmatprep.subr.bf16.mxu1 %v5746_v53  ;;  %6807 = vst [vmem:[#allocation70_spill] sm:$0xff] %v5752_v31  ;;  %6808 = vst [vmem:[#allocation13_spill] sm:$0xff] %v5758_v20  ;;  %v5764_v42 = vld [vmem:[%s5995_s4 + $0x184] ss:$16 sps:$4 sm:$0xff]   ;;  %v5770_v53 = vld [vmem:[%s5995_s4 + $0x18c] ss:$16 sps:$4 sm:$0xff]  }
 0x72b   :  { %6809 = vst [vmem:[#allocation14_spill] sm:$0xff] %v5764_v42  ;;  %6810 = vst [vmem:[#allocation15_spill] sm:$0xff] %v5770_v53 }
 0x72d   :  { %2362 = vmatpush1.bf16.msra.mxu0 %v5752_v31  ;;  %2403 = vmatpush1.bf16.msra.mxu1 %v5758_v20  ;;  %v5776_v31 = vld [vmem:[%s5995_s4 + $0x180] ss:$16 sps:$4 sm:$0xff]   ;;  %v5782_v20 = vld [vmem:[%s5995_s4 + $0x188] ss:$16 sps:$4 sm:$0xff]  }
 0x72e   :  { %2363 = vmatprep.subr.bf16.mxu0 %v5764_v42  ;;  %2404 = vmatprep.subr.bf16.mxu1 %v5770_v53  ;;  %6811 = vst [vmem:[#allocation16_spill] sm:$0xff] %v5776_v31  ;;  %6812 = vst [vmem:[#allocation17_spill] sm:$0xff] %v5782_v20  ;;  %v5788_v42 = vld [vmem:[%s5995_s4 + $0x1a4] ss:$16 sps:$4 sm:$0xff]   ;;  %v5794_v53 = vld [vmem:[%s5995_s4 + $0x1ac] ss:$16 sps:$4 sm:$0xff]  }
 0x72f   :  { %6813 = vst [vmem:[#allocation18_spill] sm:$0xff] %v5788_v42  ;;  %6814 = vst [vmem:[#allocation19_spill] sm:$0xff] %v5794_v53 }
 0x731   :  { %2364 = vmatpush1.bf16.msra.mxu0 %v5776_v31  ;;  %2405 = vmatpush1.bf16.msra.mxu1 %v5782_v20  ;;  %v5800_v31 = vld [vmem:[%s5995_s4 + $0x1a0] ss:$16 sps:$4 sm:$0xff]   ;;  %v5806_v20 = vld [vmem:[%s5995_s4 + $0x1a8] ss:$16 sps:$4 sm:$0xff]  }
 0x732   :  { %2365 = vmatprep.subr.bf16.mxu0 %v5788_v42  ;;  %2406 = vmatprep.subr.bf16.mxu1 %v5794_v53  ;;  %6815 = vst [vmem:[#allocation20_spill] sm:$0xff] %v5800_v31  ;;  %6816 = vst [vmem:[#allocation21_spill] sm:$0xff] %v5806_v20  ;;  %v5812_v42 = vld [vmem:[%s5995_s4 + $0x1c4] ss:$16 sps:$4 sm:$0xff]   ;;  %v5818_v53 = vld [vmem:[%s5995_s4 + $0x1cc] ss:$16 sps:$4 sm:$0xff]  }
 0x733   :  { %6817 = vst [vmem:[#allocation22_spill] sm:$0xff] %v5812_v42  ;;  %6818 = vst [vmem:[#allocation23_spill] sm:$0xff] %v5818_v53 }
 0x735   :  { %2366 = vmatpush1.bf16.msra.mxu0 %v5800_v31  ;;  %2407 = vmatpush1.bf16.msra.mxu1 %v5806_v20  ;;  %v5824_v31 = vld [vmem:[%s5995_s4 + $0x1c0] ss:$16 sps:$4 sm:$0xff]   ;;  %v5830_v20 = vld [vmem:[%s5995_s4 + $0x1c8] ss:$16 sps:$4 sm:$0xff]  }
 0x736   :  { %2367 = vmatprep.subr.bf16.mxu0 %v5812_v42  ;;  %2408 = vmatprep.subr.bf16.mxu1 %v5818_v53  ;;  %6819 = vst [vmem:[#allocation24_spill] sm:$0xff] %v5824_v31  ;;  %6820 = vst [vmem:[#allocation25_spill] sm:$0xff] %v5830_v20  ;;  %v5836_v42 = vld [vmem:[%s5995_s4 + $0x1e4] ss:$16 sps:$4 sm:$0xff]   ;;  %v5842_v53 = vld [vmem:[%s5995_s4 + $0x1ec] ss:$16 sps:$4 sm:$0xff]  }
 0x737   :  { %6821 = vst [vmem:[#allocation26_spill] sm:$0xff] %v5836_v42  ;;  %6822 = vst [vmem:[#allocation79_spill] sm:$0xff] %v5842_v53 }
 0x739   :  { %2368 = vmatpush1.bf16.msra.mxu0 %v5824_v31  ;;  %2409 = vmatpush1.bf16.msra.mxu1 %v5830_v20  ;;  %v5848_v31 = vld [vmem:[%s5995_s4 + $0x1e0] ss:$16 sps:$4 sm:$0xff]   ;;  %v5854_v20 = vld [vmem:[%s5995_s4 + $0x1e8] ss:$16 sps:$4 sm:$0xff]  }
 0x73a   :  { %2369 = vmatprep.subr.bf16.mxu0 %v5836_v42  ;;  %2410 = vmatprep.subr.bf16.mxu1 %v5842_v53  ;;  %6823 = vst [vmem:[#allocation80_spill] sm:$0xff] %v5848_v31  ;;  %6824 = vst [vmem:[#allocation81_spill] sm:$0xff] %v5854_v20 }
 0x73d   :  { %2370 = vmatpush1.bf16.msra.mxu0 %v5848_v31  ;;  %2411 = vmatpush1.bf16.msra.mxu1 %v5854_v20 }
 0x73e   :  { %2450 = vmatprep.subr.bf16.mxu0 %v6744_v11  ;;  %2491 = vmatprep.subr.bf16.mxu1 %v6745_v35 }
 0x7b3   :  { %v2150_v42 = vpop.f32.mrb[60].mxu0  ;;  %v2191_v53 = vpop.f32.mrb[60].mxu1 }
 0x7b4   :  { %v2151_v1 = vadd.f32 %v2150_v42, %v6746_v46  ;;  %v2152_v21 = vpop.f32.mrb[61].mxu0  ;;  %v2193_v3 = vpop.f32.mrb[61].mxu1  ;;  %v2192_v11 = vadd.f32 %v2191_v53, %v6748_v41  ;;  %v6828_v41 = vld [vmem:[#allocation86_spill] sm:$0xff] }
 0x7b5   :  { %v2153_v13 = vadd.f32 %v2152_v21, %v6747_v27  ;;  %v2154_v31 = vpop.f32.mrb[62].mxu0  ;;  %v2195_v63 = vpop.f32.mrb[62].mxu1  ;;  %v2194_v35 = vadd.f32 %v2193_v3, %v6749_v47 }
 0x7b6   :  { %v2823_v0 = vmul.f32 -1.442695, %v2151_v1  ;;  %v2155_v57 = vpop.f32.mrb[63].mxu0  ;;  %v2196_v55 = vpop.f32.mrb[63].mxu1  ;;  %v2825_v20 = vmul.f32 -1.442695, %v2192_v11 }
 0x7b7   :  { %v2824_v51 = vmul.f32 -1.442695, %v2153_v13  ;;  %v6825_v11 = vld [vmem:[#allocation83_spill] sm:$0xff] }
 0x7b8   :  { %3164 = vpow2.f32 %v2823_v0 }
 0x7b9   :  { %3166 = vpow2.f32 %v2824_v51 }
 0x7ba   :  { %3168 = vtanh.f32 %v2194_v35  ;;  %v6826_v35 = vld [vmem:[#allocation84_spill] sm:$0xff] }
 0x7bb   :  { %3170 = vpow2.f32 %v2825_v20 }
 0x7c2   :  { %v3165_v50 = vpop.eup %3164 }
 0x7c3   :  { %v2207_v49 = vadd.f32 1.0, %v3165_v50  ;;  %v3167_v42 = vpop.eup %3166 }
 0x7c4   :  { %v2208_v21 = vadd.f32 1.0, %v3167_v42  ;;  %v3169_v63 = vpop.eup %3168  ;;  %v6827_v42 = vld [vmem:[#allocation85_spill] sm:$0xff] }
 0x7c5   :  { %3172 = vrcp.f32 %v2207_v49  ;;  %v3171_v1 = vpop.eup %3170 }
 0x7c6   :  { %3174 = vrcp.f32 %v2208_v21  ;;  %v2209_v0 = vadd.f32 1.0, %v3171_v1 }
 0x7c8   :  { %3176 = vrcp.f32 %v2209_v0 }
 0x7cf   :  { %v3173_v57 = vpop.eup %3172 }
 0x7d0   :  { %v2218_v55 = vmul.f32 %v3173_v57, %v3169_v63  ;;  %v3175_v13 = vpop.eup %3174 }
 0x7d1   :  { %v2217_v51 = vmul.f32 %v3175_v13, %v5470_v8 }
 0x7d2   :  { %v3177_v13 = vpop.eup %3176 }
 0x7d3   :  { %v2261_v53 = vpop.f32.mrb[64].mxu0  ;;  %v2302_v31 = vpop.f32.mrb[64].mxu1  ;;  %v5864_v3 = vadd.f32 %v2218_v55, %v2217_v51 }
 0x7d4   :  { %v2309_v50 = vadd.f32 %v2261_v53, %v6825_v11  ;;  %v2311_v47 = vadd.f32 %v2302_v31, %v6826_v35  ;;  %v2263_v20 = vpop.f32.mrb[65].mxu0  ;;  %v2304_v49 = vpop.f32.mrb[65].mxu1 }
 0x7d5   :  { %v2310_v21 = vadd.f32 %v2263_v20, %v6827_v42  ;;  %v2312_v27 = vadd.f32 %v2304_v49, %v6828_v41  ;;  %v2265_v63 = vpop.f32.mrb[66].mxu0  ;;  %v2306_v57 = vpop.f32.mrb[66].mxu1  ;;  %3178 = vtanh.f32 %v5864_v3 }
 0x7d6   :  { %v2826_v1 = vmul.f32 -1.442695, %v2309_v50  ;;  %v2266_v46 = vpop.f32.mrb[67].mxu0  ;;  %v2307_v8 = vpop.f32.mrb[67].mxu1  ;;  %v2828_v53 = vmul.f32 -1.442695, %v2311_v47 }
 0x7d7   :  { %v2827_v55 = vmul.f32 -1.442695, %v2310_v21 }
 0x7d8   :  { %3180 = vpow2.f32 %v2826_v1 }
 0x7d9   :  { %3182 = vpow2.f32 %v2827_v55 }
 0x7da   :  { %3184 = vtanh.f32 %v2312_v27 }
 0x7db   :  { %3186 = vpow2.f32 %v2828_v53  ;;  %v6873_v53 = vld [vmem:[#allocation20_spill] sm:$0xff] }
 0x7df   :  { %v3179_v51 = vpop.eup %3178 }
 0x7e0   :  { %v2221_v31 = vmul.f32 %v3179_v51, %v3177_v13  ;;  %v6871_v13 = vld [vmem:[#allocation18_spill] sm:$0xff]  ;;  %v6872_v51 = vld [vmem:[#allocation19_spill] sm:$0xff] }
 0x7e2   :  { %v3181_v11 = vpop.eup %3180  ;;  %v2338_v35 = vpack.c.bf16 %v2221_v31, %v2221_v31  ;;  %v6874_v31 = vld [vmem:[#allocation21_spill] sm:$0xff] }
 0x7e3   :  { %v2322_v0 = vadd.f32 1.0, %v3181_v11  ;;  %v3183_v20 = vpop.eup %3182  ;;  %v6875_v11 = vld [vmem:[#allocation22_spill] sm:$0xff] }
 0x7e4   :  { %v2323_v41 = vadd.f32 1.0, %v3183_v20  ;;  %2371 = vmatprep.mubr.bf16.mxu0 %v2338_v35  ;;  %2412 = vmatprep.mubr.bf16.mxu1 %v2338_v35  ;;  %v3185_v46 = vpop.eup %3184  ;;  %v6877_v35 = vld [vmem:[#allocation24_spill] sm:$0xff]  ;;  %v6878_v20 = vld [vmem:[#allocation25_spill] sm:$0xff] }
 0x7e5   :  { %3188 = vrcp.f32 %v2322_v0  ;;  %v3187_v50 = vpop.eup %3186  ;;  %v6876_v0 = vld [vmem:[#allocation23_spill] sm:$0xff] }
 0x7e6   :  { %3190 = vrcp.f32 %v2323_v41  ;;  %v2324_v63 = vadd.f32 1.0, %v3187_v50  ;;  %v6879_v41 = vld [vmem:[#allocation26_spill] sm:$0xff]  ;;  %v6881_v50 = vld [vmem:[#allocation80_spill] sm:$0xff] }
 0x7e8   :  { %3192 = vrcp.f32 %v2324_v63  ;;  %v6883_v63 = vld [vmem:[#allocation9_spill] sm:$0xff] }
 0x7ef   :  { %v3189_v49 = vpop.eup %3188 }
 0x7f0   :  { %v2333_v42 = vmul.f32 %v3189_v49, %v3185_v46  ;;  %v3191_v21 = vpop.eup %3190  ;;  %v6880_v46 = vld [vmem:[#allocation79_spill] sm:$0xff]  ;;  %v6882_v49 = vld [vmem:[#allocation81_spill] sm:$0xff] }
 0x7f1   :  { %v2332_v47 = vmul.f32 %v3191_v21, %v5478_v24  ;;  %v6851_v24 = vld [vmem:[#allocation57_spill] sm:$0xff] }
 0x7f2   :  { %v3193_v27 = vpop.eup %3192 }
 0x7f3   :  { %v5872_v57 = vadd.f32 %v2333_v42, %v2332_v47 }
 0x7f5   :  { %3194 = vtanh.f32 %v5872_v57 }
 0x7ff   :  { %v3195_v1 = vpop.eup %3194 }
 0x800   :  { %v2336_v8 = vmul.f32 %v3195_v1, %v3193_v27 }
 0x802   :  { %v2337_v55 = vpack.c.bf16 %v2336_v8, %v2336_v8  ;;  %v6884_v8 = vld [vmem:[#allocation10_spill] sm:$0xff] }
 0x804   :  { %2372 = vmatmul.mubr.bf16.vlgmr.msra.gmra.mrb[68].mxu0 %v2337_v55  ;;  %2413 = vmatmul.mubr.bf16.vlgmr.msra.gmra.mrb[68].mxu1 %v2337_v55 }
 0x805   :  { %2451 = vmatpush1.bf16.msra.mxu0 %v5178_v59  ;;  %2492 = vmatpush1.bf16.msra.mxu1 %v5184_v2  ;;  %v6830_v59 = vld [vmem:[#allocation41_spill] sm:$0xff]  ;;  %v6831_v2 = vld [vmem:[#allocation42_spill] sm:$0xff] }
 0x806   :  { %2452 = vmatprep.subr.bf16.mxu0 %v5190_v10  ;;  %2493 = vmatprep.subr.bf16.mxu1 %v5196_v56  ;;  %v6832_v10 = vld [vmem:[#allocation43_spill] sm:$0xff]  ;;  %v6833_v56 = vld [vmem:[#allocation44_spill] sm:$0xff] }
 0x807   :  { %2482 = vmatprep.mubr.bf16.mxu0 %v6457_v7  ;;  %2523 = vmatprep.mubr.bf16.mxu1 %v6457_v7  ;;  %v6829_v7 = vld [vmem:[#allocation40_spill] sm:$0xff] }
 0x809   :  { %2453 = vmatpush1.bf16.msra.mxu0 %v5204_v23  ;;  %2494 = vmatpush1.bf16.msra.mxu1 %v5210_v22  ;;  %v6834_v23 = vld [vmem:[#allocation45_spill] sm:$0xff]  ;;  %v6835_v22 = vld [vmem:[#allocation46_spill] sm:$0xff] }
 0x80a   :  { %2454 = vmatprep.subr.bf16.mxu0 %v5216_v25  ;;  %2495 = vmatprep.subr.bf16.mxu1 %v5222_v44  ;;  %v6836_v25 = vld [vmem:[#allocation62_spill] sm:$0xff]  ;;  %v6837_v44 = vld [vmem:[#allocation63_spill] sm:$0xff] }
 0x80d   :  { %2455 = vmatpush1.bf16.msra.mxu0 %v5228_v60  ;;  %2496 = vmatpush1.bf16.msra.mxu1 %v5234_v33  ;;  %v6838_v60 = vld [vmem:[#allocation64_spill] sm:$0xff]  ;;  %v6839_v33 = vld [vmem:[#allocation65_spill] sm:$0xff] }
 0x80e   :  { %2456 = vmatprep.subr.bf16.mxu0 %v5240_v61  ;;  %2497 = vmatprep.subr.bf16.mxu1 %v5246_v14  ;;  %v6840_v61 = vld [vmem:[#allocation66_spill] sm:$0xff]  ;;  %v6841_v14 = vld [vmem:[#allocation47_spill] sm:$0xff] }
 0x811   :  { %2457 = vmatpush1.bf16.msra.mxu0 %v5252_v52  ;;  %2498 = vmatpush1.bf16.msra.mxu1 %v5258_v17  ;;  %v6842_v52 = vld [vmem:[#allocation48_spill] sm:$0xff]  ;;  %v6843_v17 = vld [vmem:[#allocation49_spill] sm:$0xff] }
 0x812   :  { %2458 = vmatprep.subr.bf16.mxu0 %v5264_v26  ;;  %2499 = vmatprep.subr.bf16.mxu1 %v5270_v54  ;;  %v6844_v26 = vld [vmem:[#allocation50_spill] sm:$0xff]  ;;  %v6845_v54 = vld [vmem:[#allocation51_spill] sm:$0xff] }
 0x815   :  { %2459 = vmatpush1.bf16.msra.mxu0 %v6754_v34  ;;  %2500 = vmatpush1.bf16.msra.mxu1 %v6755_v9  ;;  %v6852_v34 = vld [vmem:[#allocation58_spill] sm:$0xff]  ;;  %v6853_v9 = vld [vmem:[#allocation59_spill] sm:$0xff] }
 0x816   :  { %2460 = vmatprep.subr.bf16.mxu0 %v6756_v12  ;;  %2501 = vmatprep.subr.bf16.mxu1 %v6757_v6  ;;  %v6854_v12 = vld [vmem:[#allocation60_spill] sm:$0xff]  ;;  %v6855_v6 = vld [vmem:[#allocation61_spill] sm:$0xff] }
 0x819   :  { %2461 = vmatpush1.bf16.msra.mxu0 %v6758_v4  ;;  %2502 = vmatpush1.bf16.msra.mxu1 %v6759_v5  ;;  %v6856_v4 = vld [vmem:[#allocation7_spill] sm:$0xff]  ;;  %v6857_v5 = vld [vmem:[#allocation8_spill] sm:$0xff] }
 0x81a   :  { %2462 = vmatprep.subr.bf16.mxu0 %v6760_v18  ;;  %2503 = vmatprep.subr.bf16.mxu1 %v6761_v32  ;;  %v6858_v18 = vld [vmem:[#allocation75_spill] sm:$0xff]  ;;  %v6859_v32 = vld [vmem:[#allocation76_spill] sm:$0xff] }
 0x81d   :  { %2463 = vmatpush1.bf16.msra.mxu0 %v6762_v28  ;;  %2504 = vmatpush1.bf16.msra.mxu1 %v6763_v29  ;;  %v6860_v28 = vld [vmem:[#allocation77_spill] sm:$0xff]  ;;  %v6861_v29 = vld [vmem:[#allocation78_spill] sm:$0xff] }
 0x81e   :  { %2464 = vmatprep.subr.bf16.mxu0 %v6764_v30  ;;  %2505 = vmatprep.subr.bf16.mxu1 %v6765_v36  ;;  %v6862_v30 = vld [vmem:[#allocation67_spill] sm:$0xff]  ;;  %v6863_v36 = vld [vmem:[#allocation68_spill] sm:$0xff] }
 0x821   :  { %2465 = vmatpush1.bf16.msra.mxu0 %v5348_v19  ;;  %2506 = vmatpush1.bf16.msra.mxu1 %v6766_v62  ;;  %v6846_v19 = vld [vmem:[#allocation52_spill] sm:$0xff]  ;;  %v6864_v62 = vld [vmem:[#allocation69_spill] sm:$0xff] }
 0x822   :  { %2562 = vmatprep.subr.bf16.mxu0 %v6767_v37  ;;  %2603 = vmatprep.subr.bf16.mxu1 %v6768_v39  ;;  %v6865_v37 = vld [vmem:[#allocation70_spill] sm:$0xff]  ;;  %v6866_v39 = vld [vmem:[#allocation13_spill] sm:$0xff] }
 0x824   :  { %2483 = vmatmul.mubr.bf16.vlgmr.msra.gmra.mrb[72].mxu0 %v2337_v55  ;;  %2524 = vmatmul.mubr.bf16.vlgmr.msra.gmra.mrb[72].mxu1 %v2337_v55 }
 0x825   :  { %2563 = vmatpush1.bf16.msra.mxu0 %v6769_v40  ;;  %2604 = vmatpush1.bf16.msra.mxu1 %v6770_v45  ;;  %v6867_v40 = vld [vmem:[#allocation14_spill] sm:$0xff]  ;;  %v6868_v45 = vld [vmem:[#allocation15_spill] sm:$0xff] }
 0x826   :  { %2564 = vmatprep.subr.bf16.mxu0 %v5386_v15  ;;  %2605 = vmatprep.subr.bf16.mxu1 %v5392_v16  ;;  %v6849_v15 = vld [vmem:[#allocation55_spill] sm:$0xff]  ;;  %v6850_v16 = vld [vmem:[#allocation56_spill] sm:$0xff] }
 0x829   :  { %2565 = vmatpush1.bf16.msra.mxu0 %v5398_v58  ;;  %2606 = vmatpush1.bf16.msra.mxu1 %v5404_v38  ;;  %v6847_v58 = vld [vmem:[#allocation53_spill] sm:$0xff]  ;;  %v6848_v38 = vld [vmem:[#allocation54_spill] sm:$0xff] }
 0x82a   :  { %2566 = vmatprep.subr.bf16.mxu0 %v5524_v48  ;;  %2607 = vmatprep.subr.bf16.mxu1 %v5530_v43  ;;  %v6869_v48 = vld [vmem:[#allocation16_spill] sm:$0xff]  ;;  %v6870_v43 = vld [vmem:[#allocation17_spill] sm:$0xff] }
 0x82d   :  { %2567 = vmatpush1.bf16.msra.mxu0 %v6829_v7  ;;  %2608 = vmatpush1.bf16.msra.mxu1 %v6830_v59 }
 0x82e   :  { %2568 = vmatprep.subr.bf16.mxu0 %v6831_v2  ;;  %2609 = vmatprep.subr.bf16.mxu1 %v6832_v10 }
 0x831   :  { %2569 = vmatpush1.bf16.msra.mxu0 %v6833_v56  ;;  %2610 = vmatpush1.bf16.msra.mxu1 %v6834_v23 }
 0x832   :  { %2570 = vmatprep.subr.bf16.mxu0 %v6835_v22  ;;  %2611 = vmatprep.subr.bf16.mxu1 %v6836_v25  ;;  %v6885_v22 = vld [vmem:[#allocation11_spill] sm:$0xff] }
 0x835   :  { %2571 = vmatpush1.bf16.msra.mxu0 %v6837_v44  ;;  %2612 = vmatpush1.bf16.msra.mxu1 %v6838_v60  ;;  %v6886_v44 = vld [vmem:[#allocation12_spill] sm:$0xff] }
 0x836   :  { %2572 = vmatprep.subr.bf16.mxu0 %v6839_v33  ;;  %2613 = vmatprep.subr.bf16.mxu1 %v6840_v61 }
 0x839   :  { %2573 = vmatpush1.bf16.msra.mxu0 %v6841_v14  ;;  %2614 = vmatpush1.bf16.msra.mxu1 %v6842_v52 }
 0x83a   :  { %2574 = vmatprep.subr.bf16.mxu0 %v6843_v17  ;;  %2615 = vmatprep.subr.bf16.mxu1 %v6844_v26 }
 0x83d   :  { %2575 = vmatpush1.bf16.msra.mxu0 %v6845_v54  ;;  %2616 = vmatpush1.bf16.msra.mxu1 %v6846_v19 }
 0x83e   :  { %2576 = vmatprep.subr.bf16.mxu0 %v6847_v58  ;;  %2617 = vmatprep.subr.bf16.mxu1 %v6848_v38 }
 0x841   :  { %2577 = vmatpush1.bf16.msra.mxu0 %v6849_v15  ;;  %2618 = vmatpush1.bf16.msra.mxu1 %v6850_v16 }
 0x842   :  { %2578 = vmatprep.subr.bf16.mxu0 %v6851_v24  ;;  %2619 = vmatprep.subr.bf16.mxu1 %v6852_v34 }
 0x845   :  { %2579 = vmatpush1.bf16.msra.mxu0 %v6853_v9  ;;  %2620 = vmatpush1.bf16.msra.mxu1 %v6854_v12  ;;  %v6887_v12 = vld [vmem:[#allocation87_spill] sm:$0xff] }
 0x846   :  { %2580 = vmatprep.subr.bf16.mxu0 %v6855_v6  ;;  %2621 = vmatprep.subr.bf16.mxu1 %v6856_v4  ;;  %v6888_v4 = vld [vmem:[#allocation88_spill] sm:$0xff] }
 0x849   :  { %2581 = vmatpush1.bf16.msra.mxu0 %v6857_v5  ;;  %2622 = vmatpush1.bf16.msra.mxu1 %v6858_v18 }
 0x84a   :  { %2582 = vmatprep.subr.bf16.mxu0 %v6859_v32  ;;  %2623 = vmatprep.subr.bf16.mxu1 %v6860_v28  ;;  %v6889_v28 = vld [vmem:[#allocation89_spill] sm:$0xff] }
 0x84d   :  { %2583 = vmatpush1.bf16.msra.mxu0 %v6861_v29  ;;  %2624 = vmatpush1.bf16.msra.mxu1 %v6862_v30  ;;  %v6890_v30 = vld [vmem:[#allocation90_spill] sm:$0xff] }
 0x84e   :  { %2584 = vmatprep.subr.bf16.mxu0 %v6863_v36  ;;  %2625 = vmatprep.subr.bf16.mxu1 %v6864_v62 }
 0x851   :  { %2585 = vmatpush1.bf16.msra.mxu0 %v6865_v37  ;;  %2626 = vmatpush1.bf16.msra.mxu1 %v6866_v39 }
 0x852   :  { %2586 = vmatprep.subr.bf16.mxu0 %v6867_v40  ;;  %2627 = vmatprep.subr.bf16.mxu1 %v6868_v45 }
 0x855   :  { %2587 = vmatpush1.bf16.msra.mxu0 %v6869_v48  ;;  %2628 = vmatpush1.bf16.msra.mxu1 %v6870_v43 }
 0x856   :  { %2588 = vmatprep.subr.bf16.mxu0 %v6871_v13  ;;  %2629 = vmatprep.subr.bf16.mxu1 %v6872_v51 }
 0x859   :  { %2589 = vmatpush1.bf16.msra.mxu0 %v6873_v53  ;;  %2630 = vmatpush1.bf16.msra.mxu1 %v6874_v31 }
 0x85a   :  { %2590 = vmatprep.subr.bf16.mxu0 %v6875_v11  ;;  %2631 = vmatprep.subr.bf16.mxu1 %v6876_v0 }
 0x85d   :  { %2591 = vmatpush1.bf16.msra.mxu0 %v6877_v35  ;;  %2632 = vmatpush1.bf16.msra.mxu1 %v6878_v20 }
 0x85e   :  { %2592 = vmatprep.subr.bf16.mxu0 %v6879_v41  ;;  %2633 = vmatprep.subr.bf16.mxu1 %v6880_v46 }
 0x861   :  { %2593 = vmatpush1.bf16.msra.mxu0 %v6881_v50  ;;  %2634 = vmatpush1.bf16.msra.mxu1 %v6882_v49 }
 0x8d7   :  { %v2373_v42 = vpop.f32.mrb[68].mxu0  ;;  %v2414_v21 = vpop.f32.mrb[68].mxu1 }
 0x8d8   :  { %v2374_v47 = vadd.f32 %v2373_v42, %v6883_v63  ;;  %v2375_v27 = vpop.f32.mrb[69].mxu0  ;;  %v2416_v1 = vpop.f32.mrb[69].mxu1  ;;  %v2415_v25 = vadd.f32 %v2414_v21, %v6885_v22 }
 0x8d9   :  { %v2376_v55 = vadd.f32 %v2375_v27, %v6884_v8  ;;  %v2377_v7 = vpop.f32.mrb[70].mxu0  ;;  %v2418_v59 = vpop.f32.mrb[70].mxu1  ;;  %v2417_v60 = vadd.f32 %v2416_v1, %v6886_v44 }
 0x8da   :  { %v2829_v2 = vmul.f32 -1.442695, %v2374_v47  ;;  %v2378_v10 = vpop.f32.mrb[71].mxu0  ;;  %v2419_v56 = vpop.f32.mrb[71].mxu1  ;;  %v2831_v33 = vmul.f32 -1.442695, %v2415_v25 }
 0x8db   :  { %v2830_v23 = vmul.f32 -1.442695, %v2376_v55 }
 0x8dc   :  { %3196 = vpow2.f32 %v2829_v2 }
 0x8dd   :  { %3198 = vpow2.f32 %v2830_v23 }
 0x8de   :  { %3200 = vtanh.f32 %v2417_v60 }
 0x8df   :  { %3202 = vpow2.f32 %v2831_v33 }
 0x8e6   :  { %v3197_v61 = vpop.eup %3196 }
 0x8e7   :  { %v2430_v14 = vadd.f32 1.0, %v3197_v61  ;;  %v3199_v52 = vpop.eup %3198 }
 0x8e8   :  { %v2431_v17 = vadd.f32 1.0, %v3199_v52  ;;  %v3201_v26 = vpop.eup %3200 }
 0x8e9   :  { %3204 = vrcp.f32 %v2430_v14  ;;  %v3203_v54 = vpop.eup %3202 }
 0x8ea   :  { %3206 = vrcp.f32 %v2431_v17  ;;  %v2432_v15 = vadd.f32 1.0, %v3203_v54 }
 0x8ec   :  { %3208 = vrcp.f32 %v2432_v15 }
 0x8f3   :  { %v3205_v19 = vpop.eup %3204 }
 0x8f4   :  { %v2441_v58 = vmul.f32 %v3205_v19, %v3201_v26  ;;  %v3207_v38 = vpop.eup %3206 }
 0x8f5   :  { %v2440_v16 = vmul.f32 %v3207_v38, %v5864_v3 }
 0x8f6   :  { %v3209_v48 = vpop.eup %3208 }
 0x8f7   :  { %v2484_v24 = vpop.f32.mrb[72].mxu0  ;;  %v2525_v34 = vpop.f32.mrb[72].mxu1  ;;  %v5976_v9 = vadd.f32 %v2441_v58, %v2440_v16 }
 0x8f8   :  { %v2532_v6 = vadd.f32 %v2484_v24, %v6887_v12  ;;  %v2534_v5 = vadd.f32 %v2525_v34, %v6888_v4  ;;  %v2486_v18 = vpop.f32.mrb[73].mxu0  ;;  %v2527_v32 = vpop.f32.mrb[73].mxu1 }
 0x8f9   :  { %v2533_v29 = vadd.f32 %v2486_v18, %v6889_v28  ;;  %v2535_v36 = vadd.f32 %v2527_v32, %v6890_v30  ;;  %v2488_v62 = vpop.f32.mrb[74].mxu0  ;;  %v2529_v37 = vpop.f32.mrb[74].mxu1  ;;  %3210 = vtanh.f32 %v5976_v9 }
 0x8fa   :  { %v2832_v39 = vmul.f32 -1.442695, %v2532_v6  ;;  %v2489_v40 = vpop.f32.mrb[75].mxu0  ;;  %v2530_v3 = vpop.f32.mrb[75].mxu1  ;;  %v2834_v13 = vmul.f32 -1.442695, %v2534_v5 }
 0x8fb   :  { %v2833_v45 = vmul.f32 -1.442695, %v2533_v29 }
 0x8fc   :  { %3212 = vpow2.f32 %v2832_v39 }
 0x8fd   :  { %3214 = vpow2.f32 %v2833_v45 }
 0x8fe   :  { %3216 = vtanh.f32 %v2535_v36 }
 0x8ff   :  { %3218 = vpow2.f32 %v2834_v13 }
 0x903   :  { %v3211_v43 = vpop.eup %3210 }
 0x904   :  { %v2444_v51 = vmul.f32 %v3211_v43, %v3209_v48 }
 0x906   :  { %v3213_v53 = vpop.eup %3212  ;;  %v2561_v11 = vpack.c.bf16 %v2444_v51, %v2444_v51 }
 0x907   :  { %v2545_v31 = vadd.f32 1.0, %v3213_v53  ;;  %v3215_v0 = vpop.eup %3214 }
 0x908   :  { %v2546_v35 = vadd.f32 1.0, %v3215_v0  ;;  %2594 = vmatprep.mubr.bf16.mxu0 %v2561_v11  ;;  %2635 = vmatprep.mubr.bf16.mxu1 %v2561_v11  ;;  %v3217_v20 = vpop.eup %3216 }
 0x909   :  { %3220 = vrcp.f32 %v2545_v31  ;;  %v3219_v41 = vpop.eup %3218 }
 0x90a   :  { %3222 = vrcp.f32 %v2546_v35  ;;  %v2547_v42 = vadd.f32 1.0, %v3219_v41 }
 0x90c   :  { %3224 = vrcp.f32 %v2547_v42 }
 0x913   :  { %v3221_v46 = vpop.eup %3220 }
 0x914   :  { %v2556_v50 = vmul.f32 %v3221_v46, %v3217_v20  ;;  %v3223_v49 = vpop.eup %3222 }
 0x915   :  { %v2555_v21 = vmul.f32 %v3223_v49, %v5872_v57 }
 0x916   :  { %v3225_v27 = vpop.eup %3224 }
 0x917   :  { %v2557_v47 = vadd.f32 %v2556_v50, %v2555_v21 }
 0x919   :  { %3226 = vtanh.f32 %v2557_v47 }
 0x923   :  { %v3227_v1 = vpop.eup %3226 }
 0x924   :  { %v2559_v55 = vmul.f32 %v3227_v1, %v3225_v27 }
 0x926   :  { %v2560_v7 = vpack.c.bf16 %v2559_v55, %v2559_v55 }
 0x928   :  { %2595 = vmatmul.mubr.bf16.vlgmr.msra.gmra.mrb[76].mxu0 %v2560_v7  ;;  %2636 = vmatmul.mubr.bf16.vlgmr.msra.gmra.mrb[76].mxu1 %v2560_v7 }
 0x9fb   :  { %v2596_v59 = vpop.f32.mrb[76].mxu0  ;;  %v2637_v2 = vpop.f32.mrb[76].mxu1 }
 0x9fc   :  { %v2597_v10 = vadd.f32 %v2596_v59, %v6883_v63  ;;  %v2598_v56 = vpop.f32.mrb[77].mxu0  ;;  %v2639_v23 = vpop.f32.mrb[77].mxu1  ;;  %v2638_v17 = vadd.f32 %v2637_v2, %v6885_v22 }
 0x9fd   :  { %v2599_v25 = vadd.f32 %v2598_v56, %v6884_v8  ;;  %v2600_v60 = vpop.f32.mrb[78].mxu0  ;;  %v2641_v33 = vpop.f32.mrb[78].mxu1  ;;  %v2640_v26 = vadd.f32 %v2639_v23, %v6886_v44 }
 0x9fe   :  { %v2835_v57 = vmul.f32 -1.442695, %v2597_v10  ;;  %v2601_v61 = vpop.f32.mrb[79].mxu0  ;;  %v2642_v14 = vpop.f32.mrb[79].mxu1  ;;  %v2837_v54 = vmul.f32 -1.442695, %v2638_v17 }
 0x9ff   :  { %v2836_v52 = vmul.f32 -1.442695, %v2599_v25 }
 0xa00   :  { %3228 = vpow2.f32 %v2835_v57 }
 0xa01   :  { %3230 = vpow2.f32 %v2836_v52 }
 0xa02   :  { %3232 = vtanh.f32 %v2640_v26 }
 0xa03   :  { %3234 = vpow2.f32 %v2837_v54 }
 0xa0a   :  { %v3229_v19 = vpop.eup %3228 }
 0xa0b   :  { %v2653_v58 = vadd.f32 1.0, %v3229_v19  ;;  %v3231_v63 = vpop.eup %3230 }
 0xa0c   :  { %v2654_v8 = vadd.f32 1.0, %v3231_v63  ;;  %v3233_v38 = vpop.eup %3232 }
 0xa0d   :  { %3236 = vrcp.f32 %v2653_v58  ;;  %v3235_v15 = vpop.eup %3234 }
 0xa0e   :  { %3238 = vrcp.f32 %v2654_v8  ;;  %v2655_v12 = vadd.f32 1.0, %v3235_v15 }
 0xa10   :  { %3240 = vrcp.f32 %v2655_v12 }
 0xa17   :  { %v3237_v16 = vpop.eup %3236 }
 0xa18   :  { %v2664_v24 = vmul.f32 %v3237_v16, %v3233_v38  ;;  %v3239_v34 = vpop.eup %3238 }
 0xa19   :  { %v2663_v6 = vmul.f32 %v3239_v34, %v5976_v9 }
 0xa1a   :  { %v3241_v44 = vpop.eup %3240 }
 0xa1b   :  { %v2665_v22 = vadd.f32 %v2664_v24, %v2663_v6 }
 0xa1d   :  { %3242 = vtanh.f32 %v2665_v22 }
 0xa27   :  { %v3243_v4 = vpop.eup %3242 }
 0xa28   :  { %v2667_v5 = vmul.f32 %v3243_v4, %v3241_v44 }
 0xa2a   :  { %2675 = vst [vmem:[%s5998_s6] sm:$0xff] %v2667_v5 }

</bundles_post_ra>
